<compile_context>
chip_gen: v5e
topology: v5e:2x2
jax: 0.10.0
libtpu: 0.0.40
codegen_flags: <defaults>
</compile_context>

<pallas_src>
import functools

import jax
import jax.numpy as jnp
from jax.experimental import pallas as pl
from jax.experimental.pallas import tpu as pltpu


# ----------------------------- Pallas kernels ------------------------------


def _conv_gemm_kernel(x_ref, w_ref, o_ref, *, epilogue, eps=1e-5, slope=0.2):
    """im2col GEMM (bf16 operands, f32 acc) + optional BatchNorm + LeakyReLU."""
    acc = jnp.dot(x_ref[...], w_ref[...], preferred_element_type=jnp.float32)
    if epilogue == "bn_leaky":
        # Train-mode BatchNorm2d (gamma=1, beta=0): batch statistics over the
        # row axis (= batch * spatial) per output channel (= lane axis),
        # single pass over the accumulator (var = E[x^2] - mean^2).
        n = acc.shape[0]
        mean = jnp.sum(acc, axis=0, keepdims=True) / n
        ex2 = jnp.sum(acc * acc, axis=0, keepdims=True) / n
        var = ex2 - mean * mean
        acc = (acc - mean) * jax.lax.rsqrt(var + eps)
    act = jnp.where(acc >= 0, acc, slope * acc)              # LeakyReLU(0.2)
    o_ref[...] = act.astype(o_ref.dtype)                     # bf16 store


def _conv4_classifier_kernel(x_ref, w_ref, wf_ref, bias_ref, o_ref, *, slope=0.2):
    """Conv4 GEMM + LeakyReLU + classifier lane-reduction + Sigmoid.

    bias_ref already contains labels @ fc_w[n_feat:] + fc_b (no nonlinearity
    separates it from the logit), so the kernel only handles the feature half.
    """
    h = jnp.dot(x_ref[...], w_ref[...], preferred_element_type=jnp.float32)
    h = jnp.where(h >= 0, h, slope * h)                       # (B, 20)
    logit = jnp.sum(h * wf_ref[...], axis=1, keepdims=True) + bias_ref[...]
    z = jnp.clip(logit, -30.0, 30.0)                          # overflow-safe
    o_ref[...] = 1.0 / (1.0 + jnp.exp(-z))


# ----------------------------- kernel wrappers ------------------------------


_VMEM = pl.BlockSpec(memory_space=pltpu.MemorySpace.VMEM)
_PARALLEL = pltpu.CompilerParams(dimension_semantics=("parallel",))


def conv_gemm(patches, w, epilogue):
    """(M,K)@(K,N) with fused (BatchNorm+)LeakyReLU epilogue, bf16 in/out."""
    M, K = patches.shape
    N = w.shape[1]
    kern = functools.partial(_conv_gemm_kernel, epilogue=epilogue)
    out_shape = jax.ShapeDtypeStruct((M, N), jnp.bfloat16)

    if epilogue == "leaky" and M % 16 == 0 and M >= 32:
        # 2-way row split: no cross-row coupling in the epilogue; "parallel"
        # grid lets v7x's second TensorCore take half the rows.
        bm = M // 2
        return pl.pallas_call(
            kern, out_shape=out_shape, grid=(2,),
            in_specs=[pl.BlockSpec((bm, K), lambda i: (i, 0)),
                      pl.BlockSpec((K, N), lambda i: (0, 0))],
            out_specs=pl.BlockSpec((bm, N), lambda i: (i, 0)),
            compiler_params=_PARALLEL,
        )(patches, w)

    if epilogue == "bn_leaky" and N % 256 == 0:
        # 2-way output-channel split: BN stats are per-channel over rows, so a
        # channel split (full row extent per block) is exact and lane-dense.
        bn = N // 2
        return pl.pallas_call(
            kern, out_shape=out_shape, grid=(2,),
            in_specs=[pl.BlockSpec((M, K), lambda j: (0, 0)),
                      pl.BlockSpec((K, bn), lambda j: (0, j))],
            out_specs=pl.BlockSpec((M, bn), lambda j: (0, j)),
            compiler_params=_PARALLEL,
        )(patches, w)

    return pl.pallas_call(kern, out_shape=out_shape,
                          in_specs=[_VMEM, _VMEM], out_specs=_VMEM)(patches, w)


def conv4_classifier(feats, w4, wf, lbl_bias):
    """Fused conv4 GEMM + LeakyReLU + feature-FC reduction + Sigmoid."""
    B = feats.shape[0]
    return pl.pallas_call(
        _conv4_classifier_kernel,
        out_shape=jax.ShapeDtypeStruct((B, 1), jnp.float32),
        in_specs=[_VMEM] * 4,
        out_specs=_VMEM,
    )(feats, w4, wf, lbl_bias)


# ------------------------------- JAX glue ----------------------------------


def im2col_nhwc(x, k, stride, pad, c_pad=0):
    """NHWC x: (B,H,W,C) -> patches (B*Ho*Wo, k*k*(C+c_pad)), (kh,kw,C) order.

    Transpose-free: the GEMM output (rows, Cout) is directly the NHWC
    activation of the next layer. Channel padding is folded into the same
    jnp.pad as the spatial padding (used only for conv1's Cin 3->8).
    """
    if pad or c_pad:
        x = jnp.pad(x, ((0, 0), (pad, pad), (pad, pad), (0, c_pad)))
    B, H, W, C = x.shape
    Ho = (H - k) // stride + 1
    Wo = (W - k) // stride + 1
    cols = [x[:, i:i + stride * Ho:stride, j:j + stride * Wo:stride, :]
            for i in range(k) for j in range(k)]
    pt = jnp.stack(cols, axis=3)                   # (B, Ho, Wo, k*k, C)
    return pt.reshape(B * Ho * Wo, k * k * C), Ho, Wo


def conv_w_to_gemm(w):
    """PyTorch OIHW conv weight -> (kh*kw*Cin, Cout) GEMM matrix."""
    cout = w.shape[0]
    return w.transpose(2, 3, 1, 0).reshape(-1, cout)


def init_params(key, n_image_channels, num_classes):
    """Raw PyTorch-layout parameters (also consumed by the f32 reference)."""
    nf = 64
    ks = jax.random.split(key, 6)
    std = 0.02
    return {
        "w1": jax.random.normal(ks[0], (nf, n_image_channels, 4, 4), jnp.float32) * std,
        "w2": jax.random.normal(ks[1], (nf * 2, nf, 4, 4), jnp.float32) * std,
        "w3": jax.random.normal(ks[2], (nf * 4, nf * 2, 4, 4), jnp.float32) * std,
        "w4": jax.random.normal(ks[3], (20, nf * 4, 4, 4), jnp.float32) * std,
        "fc_w": jax.random.normal(ks[4], (20 + num_classes, 1), jnp.float32) * 0.1,
        "fc_b": jax.random.normal(ks[5], (1, 1), jnp.float32) * 0.1,
    }


def prepare_params(params):
    """One-time weight prep: GEMM layout, Cin zero-pad, bf16 cast, FC split."""
    w1 = params["w1"]
    cin = w1.shape[1]
    cin_p = -(-cin // 8) * 8
    w1 = jnp.pad(w1, ((0, 0), (0, cin_p - cin), (0, 0), (0, 0)))
    n_feat = params["w4"].shape[0]
    fc_w = params["fc_w"]
    return {
        "w1": conv_w_to_gemm(w1).astype(jnp.bfloat16),              # (128, 64)
        "w2": conv_w_to_gemm(params["w2"]).astype(jnp.bfloat16),    # (1024, 128)
        "w3": conv_w_to_gemm(params["w3"]).astype(jnp.bfloat16),    # (2048, 256)
        "w4": conv_w_to_gemm(params["w4"]).astype(jnp.bfloat16),    # (4096, 20)
        "fc_w_feat": fc_w[:n_feat, :].reshape(1, n_feat).astype(jnp.float32),
        "fc_w_lbl": fc_w[n_feat:, :].astype(jnp.float32),           # (n_cls, 1)
        "fc_b": params["fc_b"].reshape(1, 1).astype(jnp.float32),
    }


def discriminator_forward(prepared, image, labels):
    B = image.shape[0]
    cin = image.shape[1]
    cin_p = -(-cin // 8) * 8

    # NCHW -> NHWC and f32 -> bf16 exactly once; channels live on the lane
    # axis and stay bf16 from here on (kernels store bf16 activations).
    x = jnp.transpose(image, (0, 2, 3, 1)).astype(jnp.bfloat16)

    # Conv(Cin->64, 4, 2, 1) + LeakyReLU. The channel pad 3->8 rides on the
    # same jnp.pad as the spatial padding so conv1's contraction K = 4*4*8 =
    # 128 is lane aligned; prepared w1 carries matching zero rows (exact).
    p, Ho, Wo = im2col_nhwc(x, 4, 2, 1, c_pad=cin_p - cin)
    x = conv_gemm(p, prepared["w1"], "leaky").reshape(B, Ho, Wo, -1)

    # Conv(64->128, 4, 2, 1) + BatchNorm + LeakyReLU (fused epilogue)
    p, Ho, Wo = im2col_nhwc(x, 4, 2, 1)
    x = conv_gemm(p, prepared["w2"], "bn_leaky").reshape(B, Ho, Wo, -1)

    # Conv(128->256, 4, 2, 1) + BatchNorm + LeakyReLU (fused epilogue)
    p, Ho, Wo = im2col_nhwc(p := None or p, prepared and 4, 2, 1) if False else im2col_nhwc(x, 4, 2, 1)
    x = conv_gemm(p, prepared["w3"], "bn_leaky").reshape(B, Ho, Wo, -1)

    # Conv(256->20, 4, 1, 0): the 4x4 kernel covers the whole 4x4 map with
    # stride 1 / pad 0, so im2col is an identity -> plain flatten.
    if x.shape[1] == 4 and x.shape[2] == 4:
        p = x.reshape(B, -1)                                   # (B, 4096)
    else:
        p, _, _ = im2col_nhwc(x, 4, 1, 0)

    # Label half of the classifier folded into a per-row bias (tiny XLA dot).
    lbl_bias = (labels.astype(jnp.float32) @ prepared["fc_w_lbl"]
                + prepared["fc_b"])                            # (B, 1)

    # Conv4 + LeakyReLU + Flatten + Linear(30->1) + Sigmoid in one kernel.
    return conv4_classifier(p, prepared["w4"], prepared["fc_w_feat"], lbl_bias)


# ------------------------- pure-JAX reference ------------------------------


def reference_forward(params, image, labels):
    hp = jax.lax.Precision.HIGHEST

    def conv(x, w, stride, pad):
        return jax.lax.conv_general_dilated(
            x, w, window_strides=(stride, stride),
            padding=[(pad, pad), (pad, pad)],
            dimension_numbers=("NCHW", "OIHW", "NCHW"), precision=hp)

    leaky = lambda x: jnp.where(x >= 0, x, 0.2 * x)

    def bn(x, eps=1e-5):
        m = jnp.mean(x, axis=(0, 2, 3), keepdims=True)
        v = jnp.mean(jnp.square(x - m), axis=(0, 2, 3), keepdims=True)
        return (x - m) * jax.lax.rsqrt(v + eps)

    x = leaky(conv(image, params["w1"], 2, 1))
    x = leaky(bn(conv(x, params["w2"], 2, 1)))
    x = leaky(bn(conv(x, params["w3"], 2, 1)))
    x = leaky(conv(x, params["w4"], 1, 0))
    feats = x.reshape(x.shape[0], -1)
    data = jnp.concatenate([feats, labels], axis=1)
    return jax.nn.sigmoid(jnp.dot(data, params["fc_w"], precision=hp) + params["fc_b"])


# --------------------------------- main -------------------------------------


if __name__ == "__main__":
    key = jax.random.PRNGKey(0)
    k_img, k_lbl, k_par = jax.random.split(key, 3)

    batch, n_image_channels, num_classes = 2, 3, 10
    # 32x32 input is what the architecture implies (Flatten yields exactly 20 features).
    image = jax.random.normal(k_img, (batch, n_image_channels, 32, 32), jnp.float32)
    label_idx = jax.random.randint(k_lbl, (batch,), 0, num_classes)
    labels = jax.nn.one_hot(label_idx, num_classes, dtype=jnp.float32)

    params = init_params(k_par, n_image_channels, num_classes)
    prepared = prepare_params(params)          # one-time weight prep (hoisted)

    fwd = jax.jit(discriminator_forward)
    out = jax.block_until_ready(fwd(prepared, image, labels))

    ref = jax.block_until_ready(jax.jit(reference_forward)(params, image, labels))
    assert out.shape == (batch, 1), out.shape
    # bf16 MXU operands / bf16 inter-layer activations vs. the fp32 reference.
    assert jnp.allclose(out, ref, atol=2e-2, rtol=2e-2), (out, ref)

    print("KERNEL_OK")
</pallas_src>

<mosaic_0001>
module attributes {stable_mosaic.version = 11 : i64} {
  func.func @_conv_gemm_kernel(%arg0: i32, %arg1: memref<256x128xbf16, #tpu.memory_space<vmem>>, %arg2: memref<128x64xbf16, #tpu.memory_space<vmem>>, %arg3: memref<256x64xbf16, #tpu.memory_space<vmem>>) attributes {dimension_semantics = [#tpu.dimension_semantics<parallel>], iteration_bounds = array<i64: 2>, scalar_prefetch = 0 : i64, scratch_operands = 0 : i64, tpu.core_type = #tpu.core_type<tc>, window_params = [{transform_indices = @transform_0, window_bounds = array<i64: 256, 128>}, {pipeline_mode = #tpu.pipeline_mode<synchronous>, transform_indices = @transform_1, window_bounds = array<i64: 128, 64>}, {transform_indices = @transform_2, window_bounds = array<i64: 256, 64>}]} {
    %c0 = arith.constant 0 : index
    %c0_0 = arith.constant 0 : index
    %0 = vector.load %arg1[%c0, %c0_0] : memref<256x128xbf16, #tpu.memory_space<vmem>>, vector<256x128xbf16>
    %c0_1 = arith.constant 0 : index
    %c0_2 = arith.constant 0 : index
    %1 = vector.load %arg2[%c0_1, %c0_2] : memref<128x64xbf16, #tpu.memory_space<vmem>>, vector<128x64xbf16>
    %cst = arith.constant dense<0.000000e+00> : vector<256x64xf32>
    %2 = tpu.matmul %0, %1, %cst {dimension_numbers = #tpu.dot_dimension_numbers<[1], [0], [0], [1], [0, 0, 1, 1], [], []>} : vector<256x128xbf16>, vector<128x64xbf16>, vector<256x64xf32> -> vector<256x64xf32>
    %cst_3 = arith.constant 0.000000e+00 : f32
    %3 = vector.broadcast %cst_3 : f32 to vector<256x64xf32>
    %4 = arith.cmpf oge, %2, %3 : vector<256x64xf32>
    %cst_4 = arith.constant 2.000000e-01 : f32
    %5 = vector.broadcast %cst_4 : f32 to vector<256x64xf32>
    %6 = arith.mulf %5, %2 : vector<256x64xf32>
    %7 = arith.select %4, %2, %6 : vector<256x64xi1>, vector<256x64xf32>
    %8 = arith.truncf %7 : vector<256x64xf32> to vector<256x64xbf16>
    %c0_5 = arith.constant 0 : index
    %c0_6 = arith.constant 0 : index
    %9 = vector.load %arg3[%c0_5, %c0_6] : memref<256x64xbf16, #tpu.memory_space<vmem>>, vector<256x64xbf16>
    tpu.vector_store %arg3[%c0_5, %c0_6], %8 {strides = array<i32>} : memref<256x64xbf16, #tpu.memory_space<vmem>>, vector<256x64xbf16>,
    return
  }
  func.func @transform_0(%arg0: i32) -> (i32, i32) {
    %c0_i32 = arith.constant 0 : i32
    %c0_i32_0 = arith.constant 0 : i32
    return %arg0, %c0_i32 : i32, i32
  }
  func.func @transform_1(%arg0: i32) -> (i32, i32) {
    %c0_i32 = arith.constant 0 : i32
    %c0_i32_0 = arith.constant 0 : i32
    %c0_i32_1 = arith.constant 0 : i32
    return %c0_i32, %c0_i32_0 : i32, i32
  }
  func.func @transform_2(%arg0: i32) -> (i32, i32) {
    %c0_i32 = arith.constant 0 : i32
    %c0_i32_0 = arith.constant 0 : i32
    return %arg0, %c0_i32 : i32, i32
  }
}

module attributes {stable_mosaic.version = 11 : i64} {
  func.func @_conv_gemm_kernel(%arg0: memref<128x1024xbf16, #tpu.memory_space<vmem>>, %arg1: memref<1024x128xbf16, #tpu.memory_space<vmem>>, %arg2: memref<128x128xbf16, #tpu.memory_space<vmem>>) attributes {dimension_semantics = [], scalar_prefetch = 0 : i64, scratch_operands = 0 : i64, tpu.core_type = #tpu.core_type<tc>} {
    %c0 = arith.constant 0 : index
    %c0_0 = arith.constant 0 : index
    %0 = vector.load %arg0[%c0, %c0_0] : memref<128x1024xbf16, #tpu.memory_space<vmem>>, vector<128x1024xbf16>
    %c0_1 = arith.constant 0 : index
    %c0_2 = arith.constant 0 : index
    %1 = vector.load %arg1[%c0_1, %c0_2] : memref<1024x128xbf16, #tpu.memory_space<vmem>>, vector<1024x128xbf16>
    %cst = arith.constant dense<0.000000e+00> : vector<128x128xf32>
    %2 = tpu.matmul %0, %1, %cst {dimension_numbers = #tpu.dot_dimension_numbers<[1], [0], [0], [1], [0, 0, 1, 1], [], []>} : vector<128x1024xbf16>, vector<1024x128xbf16>, vector<128x128xf32> -> vector<128x128xf32>
    %cst_3 = arith.constant dense<0.000000e+00> : vector<128xf32>
    %3 = vector.multi_reduction <add>, %2, %cst_3 [0] : vector<128x128xf32> to vector<128xf32>
    %4 = vector.shape_cast %3 : vector<128xf32> to vector<1x128xf32>
    %cst_4 = arith.constant 1.280000e+02 : f32
    %5 = vector.broadcast %cst_4 : f32 to vector<1x128xf32>
    %6 = arith.divf %4, %5 : vector<1x128xf32>
    %7 = arith.mulf %2, %2 : vector<128x128xf32>
    %cst_5 = arith.constant dense<0.000000e+00> : vector<128xf32>
    %8 = vector.multi_reduction <add>, %7, %cst_5 [0] : vector<128x128xf32> to vector<128xf32>
    %9 = vector.shape_cast %8 : vector<128xf32> to vector<1x128xf32>
    %cst_6 = arith.constant 1.280000e+02 : f32
    %10 = vector.broadcast %cst_6 : f32 to vector<1x128xf32>
    %11 = arith.divf %9, %10 : vector<1x128xf32>
    %12 = arith.mulf %6, %6 : vector<1x128xf32>
    %13 = arith.subf %11, %12 : vector<1x128xf32>
    %14 = vector.broadcast %6 : vector<1x128xf32> to vector<128x128xf32>
    %15 = arith.subf %2, %14 : vector<128x128xf32>
    %cst_7 = arith.constant 9.99999974E-6 : f32
    %16 = vector.broadcast %cst_7 : f32 to vector<1x128xf32>
    %17 = arith.addf %13, %16 : vector<1x128xf32>
    %18 = math.rsqrt %17 : vector<1x128xf32>
    %19 = vector.broadcast %18 : vector<1x128xf32> to vector<128x128xf32>
    %20 = arith.mulf %15, %19 : vector<128x128xf32>
    %cst_8 = arith.constant 0.000000e+00 : f32
    %21 = vector.broadcast %cst_8 : f32 to vector<128x128xf32>
    %22 = arith.cmpf oge, %20, %21 : vector<128x128xf32>
    %cst_9 = arith.constant 2.000000e-01 : f32
    %23 = vector.broadcast %cst_9 : f32 to vector<128x128xf32>
    %24 = arith.mulf %23, %20 : vector<128x128xf32>
    %25 = arith.select %22, %20, %24 : vector<128x128xi1>, vector<128x128xf32>
    %26 = arith.truncf %25 : vector<128x128xf32> to vector<128x128xbf16>
    %c0_10 = arith.constant 0 : index
    %c0_11 = arith.constant 0 : index
    %27 = vector.load %arg2[%c0_10, %c0_11] : memref<128x128xbf16, #tpu.memory_space<vmem>>, vector<128x128xbf16>
    tpu.vector_store %arg2[%c0_10, %c0_11], %26 {strides = array<i32>} : memref<128x128xbf16, #tpu.memory_space<vmem>>, vector<128x128xbf16>,
    return
  }
}

module attributes {stable_mosaic.version = 11 : i64} {
  func.func @_conv_gemm_kernel(%arg0: i32, %arg1: memref<32x2048xbf16, #tpu.memory_space<vmem>>, %arg2: memref<2048x128xbf16, #tpu.memory_space<vmem>>, %arg3: memref<32x128xbf16, #tpu.memory_space<vmem>>) attributes {dimension_semantics = [#tpu.dimension_semantics<parallel>], iteration_bounds = array<i64: 2>, scalar_prefetch = 0 : i64, scratch_operands = 0 : i64, tpu.core_type = #tpu.core_type<tc>, window_params = [{pipeline_mode = #tpu.pipeline_mode<synchronous>, transform_indices = @transform_0, window_bounds = array<i64: 32, 2048>}, {transform_indices = @transform_1, window_bounds = array<i64: 2048, 128>}, {transform_indices = @transform_2, window_bounds = array<i64: 32, 128>}]} {
    %c0 = arith.constant 0 : index
    %c0_0 = arith.constant 0 : index
    %0 = vector.load %arg1[%c0, %c0_0] : memref<32x2048xbf16, #tpu.memory_space<vmem>>, vector<32x2048xbf16>
    %c0_1 = arith.constant 0 : index
    %c0_2 = arith.constant 0 : index
    %1 = vector.load %arg2[%c0_1, %c0_2] : memref<2048x128xbf16, #tpu.memory_space<vmem>>, vector<2048x128xbf16>
    %cst = arith.constant dense<0.000000e+00> : vector<32x128xf32>
    %2 = tpu.matmul %0, %1, %cst {dimension_numbers = #tpu.dot_dimension_numbers<[1], [0], [0], [1], [0, 0, 1, 1], [], []>} : vector<32x2048xbf16>, vector<2048x128xbf16>, vector<32x128xf32> -> vector<32x128xf32>
    %cst_3 = arith.constant dense<0.000000e+00> : vector<128xf32>
    %3 = vector.multi_reduction <add>, %2, %cst_3 [0] : vector<32x128xf32> to vector<128xf32>
    %4 = vector.shape_cast %3 : vector<128xf32> to vector<1x128xf32>
    %cst_4 = arith.constant 3.200000e+01 : f32
    %5 = vector.broadcast %cst_4 : f32 to vector<1x128xf32>
    %6 = arith.divf %4, %5 : vector<1x128xf32>
    %7 = arith.mulf %2, %2 : vector<32x128xf32>
    %cst_5 = arith.constant dense<0.000000e+00> : vector<128xf32>
    %8 = vector.multi_reduction <add>, %7, %cst_5 [0] : vector<32x128xf32> to vector<128xf32>
    %9 = vector.shape_cast %8 : vector<128xf32> to vector<1x128xf32>
    %cst_6 = arith.constant 3.200000e+01 : f32
    %10 = vector.broadcast %cst_6 : f32 to vector<1x128xf32>
    %11 = arith.divf %9, %10 : vector<1x128xf32>
    %12 = arith.mulf %6, %6 : vector<1x128xf32>
    %13 = arith.subf %11, %12 : vector<1x128xf32>
    %14 = vector.broadcast %6 : vector<1x128xf32> to vector<32x128xf32>
    %15 = arith.subf %2, %14 : vector<32x128xf32>
    %cst_7 = arith.constant 9.99999974E-6 : f32
    %16 = vector.broadcast %cst_7 : f32 to vector<1x128xf32>
    %17 = arith.addf %13, %16 : vector<1x128xf32>
    %18 = math.rsqrt %17 : vector<1x128xf32>
    %19 = vector.broadcast %18 : vector<1x128xf32> to vector<32x128xf32>
    %20 = arith.mulf %15, %19 : vector<32x128xf32>
    %cst_8 = arith.constant 0.000000e+00 : f32
    %21 = vector.broadcast %cst_8 : f32 to vector<32x128xf32>
    %22 = arith.cmpf oge, %20, %21 : vector<32x128xf32>
    %cst_9 = arith.constant 2.000000e-01 : f32
    %23 = vector.broadcast %cst_9 : f32 to vector<32x128xf32>
    %24 = arith.mulf %23, %20 : vector<32x128xf32>
    %25 = arith.select %22, %20, %24 : vector<32x128xi1>, vector<32x128xf32>
    %26 = arith.truncf %25 : vector<32x128xf32> to vector<32x128xbf16>
    %c0_10 = arith.constant 0 : index
    %c0_11 = arith.constant 0 : index
    %27 = vector.load %arg3[%c0_10, %c0_11] : memref<32x128xbf16, #tpu.memory_space<vmem>>, vector<32x128xbf16>
    tpu.vector_store %arg3[%c0_10, %c0_11], %26 {strides = array<i32>} : memref<32x128xbf16, #tpu.memory_space<vmem>>, vector<32x128xbf16>,
    return
  }
  func.func @transform_0(%arg0: i32) -> (i32, i32) {
    %c0_i32 = arith.constant 0 : i32
    %c0_i32_0 = arith.constant 0 : i32
    %c0_i32_1 = arith.constant 0 : i32
    return %c0_i32, %c0_i32_0 : i32, i32
  }
  func.func @transform_1(%arg0: i32) -> (i32, i32) {
    %c0_i32 = arith.constant 0 : i32
    %c0_i32_0 = arith.constant 0 : i32
    return %c0_i32, %arg0 : i32, i32
  }
  func.func @transform_2(%arg0: i32) -> (i32, i32) {
    %c0_i32 = arith.constant 0 : i32
    %c0_i32_0 = arith.constant 0 : i32
    return %c0_i32, %arg0 : i32, i32
  }
}

module attributes {stable_mosaic.version = 11 : i64} {
  func.func @_conv4_classifier_kernel(%arg0: memref<2x4096xbf16, #tpu.memory_space<vmem>>, %arg1: memref<4096x20xbf16, #tpu.memory_space<vmem>>, %arg2: memref<1x20xf32, #tpu.memory_space<vmem>>, %arg3: memref<2x1xf32, #tpu.memory_space<vmem>>, %arg4: memref<2x1xf32, #tpu.memory_space<vmem>>) attributes {dimension_semantics = [], scalar_prefetch = 0 : i64, scratch_operands = 0 : i64, tpu.core_type = #tpu.core_type<tc>} {
    %c0 = arith.constant 0 : index
    %c0_0 = arith.constant 0 : index
    %0 = vector.load %arg0[%c0, %c0_0] : memref<2x4096xbf16, #tpu.memory_space<vmem>>, vector<2x4096xbf16>
    %c0_1 = arith.constant 0 : index
    %c0_2 = arith.constant 0 : index
    %1 = vector.load %arg1[%c0_1, %c0_2] : memref<4096x20xbf16, #tpu.memory_space<vmem>>, vector<4096x20xbf16>
    %cst = arith.constant dense<0.000000e+00> : vector<2x20xf32>
    %2 = tpu.matmul %0, %1, %cst {dimension_numbers = #tpu.dot_dimension_numbers<[1], [0], [0], [1], [0, 0, 1, 1], [], []>} : vector<2x4096xbf16>, vector<4096x20xbf16>, vector<2x20xf32> -> vector<2x20xf32>
    %cst_3 = arith.constant 0.000000e+00 : f32
    %3 = vector.broadcast %cst_3 : f32 to vector<2x20xf32>
    %4 = arith.cmpf oge, %2, %3 : vector<2x20xf32>
    %cst_4 = arith.constant 2.000000e-01 : f32
    %5 = vector.broadcast %cst_4 : f32 to vector<2x20xf32>
    %6 = arith.mulf %5, %2 : vector<2x20xf32>
    %7 = arith.select %4, %2, %6 : vector<2x20xi1>, vector<2x20xf32>
    %c0_5 = arith.constant 0 : index
    %c0_6 = arith.constant 0 : index
    %8 = vector.load %arg2[%c0_5, %c0_6] : memref<1x20xf32, #tpu.memory_space<vmem>>, vector<1x20xf32>
    %9 = vector.broadcast %8 : vector<1x20xf32> to vector<2x20xf32>
    %10 = arith.mulf %7, %9 : vector<2x20xf32>
    %cst_7 = arith.constant dense<0.000000e+00> : vector<2xf32>
    %11 = vector.multi_reduction <add>, %10, %cst_7 [1] : vector<2x20xf32> to vector<2xf32>
    %12 = vector.shape_cast %11 : vector<2xf32> to vector<2x1xf32>
    %c0_8 = arith.constant 0 : index
    %c0_9 = arith.constant 0 : index
    %13 = vector.load %arg3[%c0_8, %c0_9] : memref<2x1xf32, #tpu.memory_space<vmem>>, vector<2x1xf32>
    %14 = arith.addf %12, %13 : vector<2x1xf32>
    %cst_10 = arith.constant -3.000000e+01 : f32
    %cst_11 = arith.constant 3.000000e+01 : f32
    %15 = vector.broadcast %cst_10 : f32 to vector<2x1xf32>
    %16 = arith.maximumf %15, %14 : vector<2x1xf32>
    %17 = vector.broadcast %cst_11 : f32 to vector<2x1xf32>
    %18 = arith.minimumf %17, %16 : vector<2x1xf32>
    %cst_12 = arith.constant 0.000000e+00 : f32
    %19 = vector.broadcast %cst_12 : f32 to vector<2x1xf32>
    %20 = arith.subf %19, %18 : vector<2x1xf32>
    %21 = math.exp %20 : vector<2x1xf32>
    %cst_13 = arith.constant 1.000000e+00 : f32
    %22 = vector.broadcast %cst_13 : f32 to vector<2x1xf32>
    %23 = arith.addf %22, %21 : vector<2x1xf32>
    %cst_14 = arith.constant 1.000000e+00 : f32
    %24 = vector.broadcast %cst_14 : f32 to vector<2x1xf32>
    %25 = arith.divf %24, %23 : vector<2x1xf32>
    %c0_15 = arith.constant 0 : index
    %c0_16 = arith.constant 0 : index
    %26 = vector.load %arg4[%c0_15, %c0_16] : memref<2x1xf32, #tpu.memory_space<vmem>>, vector<2x1xf32>
    tpu.vector_store %arg4[%c0_15, %c0_16], %25 {strides = array<i32>} : memref<2x1xf32, #tpu.memory_space<vmem>>, vector<2x1xf32>,
    return
  }
}

</mosaic_0001>

<bundles_post_ra>
// kernel: discriminator_forward.4
= control target key start
LH: loop header
LB: loop body
LE: loop exit
PB: predicated region body
PF: predicated region fallthrough
CT: control target
= control target key end

     0   :  { %s831_s9 = smov 0   ;;  %s963_s0 = inlined_call_operand.vmem [shape: bf16[512,128], index: 0, kind: input, shape index: {}]   ;;  %s964_s1 = inlined_call_operand.vmem [shape: bf16[128,64], index: 1, kind: input, shape index: {}]   ;;  %s965_s2 = inlined_call_operand.vmem [shape: bf16[512,64], index: 2, kind: output, shape index: {}]  }
   0x1 LB: > { %s645_s10 = sadd.s32 4294967295, %s814_s9   ;;  %p649_p0 = scmp.ge.s32.totalorder %s814_s9, 1  ;;  %s814_s9 = sphi %s831_s9, %s12_s9  }
   0x2   : > { %p113_p1 = scmp.lt.s32.totalorder %s814_s9, 3 }
   0x4   : > { %p114_p2 = pnand %p649_p0, %p113_p1 }
   0x5   : > { %s650_s19 = sshll.u32 (!%p114_p2), %s645_s10, 5 }
   0x6   : > { %117 = sbr.rel (%p114_p2) target bundleno = 239 (0xef), region = 28  ;;  %p136_p3 = scmp.lt.s32.totalorder (!%p114_p2), %s650_s19, 63 }
   0xb   : > { %v775_v0 = vld [vmem:[%s964_s1 + $0x38] sm:$0xff]  ;;  %v774_v1 = vld [vmem:[%s964_s1 + $0x30] sm:$0xff]  ;;  %v773_v2 = vld [vmem:[%s964_s1 + $0x28] sm:$0xff]  ;;  %s967_s19 = smov (!%p136_p3, %s650_s19), 63  ;;  %vm556_vm2 = vcmask 519168  }
   0xc   : > { %339 = vmatpush.bf16.msra.mxu0 %v775_v0  ;;  %776 = vmatpush.bf16.msra.mxu1 %v775_v0  ;;  %v772_v3 = vld [vmem:[%s964_s1 + $0x20] sm:$0xff]  ;;  %v771_v4 = vld [vmem:[%s964_s1 + $0x18] sm:$0xff]  ;;  %v770_v5 = vld [vmem:[%s964_s1 + $0x10] sm:$0xff]  ;;  %s651_s26 = sshll.u32 %s967_s19, 2 }
   0xd   : > { %777 = vmatpush.bf16.msra.mxu2 %v775_v0  ;;  %778 = vmatpush.bf16.msra.mxu3 %v775_v0  ;;  %v769_v6 = vld [vmem:[%s964_s1 + $0x8] sm:$0xff]  ;;  %v768_v7 = vld [vmem:[%s964_s1] sm:$0xff]  ;;  %s871_s3 = scalar_lea.vmem %s963_s0, %s651_s26  ;;  %s894_s6 = scalar_lea.vmem %s965_s2, %s651_s26 }
   0xe   : > { %v752_v8 = vld [vmem:[%s871_s3] sm:$0xff]  ;;  %v753_v12 = vld [vmem:[%s871_s3 + $0x8] sm:$0xff]  ;;  %v754_v16 = vld [vmem:[%s871_s3 + $0x10] sm:$0xff] }
   0xf   : > { %v756_v9 = vld [vmem:[%s871_s3 + $0x20] sm:$0xff]  ;;  %v757_v13 = vld [vmem:[%s871_s3 + $0x28] sm:$0xff]  ;;  %v758_v17 = vld [vmem:[%s871_s3 + $0x30] sm:$0xff] }
  0x10   : > { %340 = vmatpush.bf16.msra.mxu0 %v774_v1  ;;  %779 = vmatpush.bf16.msra.mxu1 %v774_v1  ;;  %v760_v10 = vld [vmem:[%s871_s3 + $0x40] sm:$0xff]  ;;  %v761_v14 = vld [vmem:[%s871_s3 + $0x48] sm:$0xff]  ;;  %v762_v18 = vld [vmem:[%s871_s3 + $0x50] sm:$0xff] }
  0x11   : > { %780 = vmatpush.bf16.msra.mxu2 %v774_v1  ;;  %781 = vmatpush.bf16.msra.mxu3 %v774_v1  ;;  %v764_v11 = vld [vmem:[%s871_s3 + $0x60] sm:$0xff]  ;;  %v765_v15 = vld [vmem:[%s871_s3 + $0x68] sm:$0xff]  ;;  %v766_v19 = vld [vmem:[%s871_s3 + $0x70] sm:$0xff] }
  0x12   : > { %v755_v20 = vld [vmem:[%s871_s3 + $0x18] sm:$0xff] }
  0x13   : > { %v759_v21 = vld [vmem:[%s871_s3 + $0x38] sm:$0xff] }
  0x14   : > { %341 = vmatpush.bf16.msra.mxu0 %v773_v2  ;;  %782 = vmatpush.bf16.msra.mxu1 %v773_v2  ;;  %v763_v22 = vld [vmem:[%s871_s3 + $0x58] sm:$0xff] }
  0x15   : > { %783 = vmatpush.bf16.msra.mxu2 %v773_v2  ;;  %784 = vmatpush.bf16.msra.mxu3 %v773_v2  ;;  %v767_v23 = vld [vmem:[%s871_s3 + $0x78] sm:$0xff] }
  0x18   : > { %342 = vmatpush.bf16.msra.mxu0 %v772_v3  ;;  %785 = vmatpush.bf16.msra.mxu1 %v772_v3 }
  0x19   : > { %786 = vmatpush.bf16.msra.mxu2 %v772_v3  ;;  %787 = vmatpush.bf16.msra.mxu3 %v772_v3 }
  0x1c   : > { %343 = vmatpush.bf16.msra.mxu0 %v771_v4  ;;  %788 = vmatpush.bf16.msra.mxu1 %v771_v4 }
  0x1d   : > { %789 = vmatpush.bf16.msra.mxu2 %v771_v4  ;;  %790 = vmatpush.bf16.msra.mxu3 %v771_v4 }
  0x20   : > { %344 = vmatpush.bf16.msra.mxu0 %v770_v5  ;;  %791 = vmatpush.bf16.msra.mxu1 %v770_v5 }
  0x21   : > { %792 = vmatpush.bf16.msra.mxu2 %v770_v5  ;;  %793 = vmatpush.bf16.msra.mxu3 %v770_v5 }
  0x24   : > { %345 = vmatpush.bf16.msra.mxu0 %v769_v6  ;;  %794 = vmatpush.bf16.msra.mxu1 %v769_v6 }
  0x25   : > { %795 = vmatpush.bf16.msra.mxu2 %v769_v6  ;;  %796 = vmatpush.bf16.msra.mxu3 %v769_v6 }
  0x28   : > { %346 = vmatpush.bf16.msra.mxu0 %v768_v7  ;;  %797 = vmatpush.bf16.msra.mxu1 %v768_v7 }
  0x29   : > { %798 = vmatpush.bf16.msra.mxu2 %v768_v7  ;;  %799 = vmatpush.bf16.msra.mxu3 %v768_v7 }
  0x2b   : > { %347 = vmatmul.bf16.vlgmr.msra.gmra.mxu0 %v752_v8  ;;  %367 = vmatmul.bf16.vlgmr.msra.gmra.mxu1 %v756_v9 }
  0x2c   : > { %387 = vmatmul.bf16.vlgmr.msra.gmra.mxu2 %v760_v10  ;;  %407 = vmatmul.bf16.vlgmr.msra.gmra.mxu3 %v764_v11 }
  0x3b   : > { %352 = vmatmul.bf16.gmra.mxu0 %v753_v12  ;;  %372 = vmatmul.bf16.gmra.mxu1 %v757_v13 }
  0x3c   : > { %392 = vmatmul.bf16.gmra.mxu2 %v761_v14  ;;  %412 = vmatmul.bf16.gmra.mxu3 %v765_v15 }
  0x4b   : > { %357 = vmatmul.bf16.gmra.mxu0 %v754_v16  ;;  %377 = vmatmul.bf16.gmra.mxu1 %v758_v17 }
  0x4c   : > { %397 = vmatmul.bf16.gmra.mxu2 %v762_v18  ;;  %417 = vmatmul.bf16.gmra.mxu3 %v766_v19 }
  0x5b   : > { %362 = vmatmul.bf16.gmra.mxu0 %v755_v20  ;;  %382 = vmatmul.bf16.gmra.mxu1 %v759_v21 }
  0x5c   : > { %402 = vmatmul.bf16.gmra.mxu2 %v763_v22  ;;  %422 = vmatmul.bf16.gmra.mxu3 %v767_v23 }
  0xa8   : > { %v348_v24 = vpop.f32.mrf.mxu0  ;;  %v368_v25 = vpop.f32.mrf.mxu1 }
  0xa9   : > { %vm428_vm0 = vcmp.ge.f32.partialorder %v348_v24, 0.0  ;;  %v460_v26 = vmul.f32 0.2, %v348_v24  ;;  %vm436_vm1 = vcmp.ge.f32.partialorder %v368_v25, 0.0  ;;  %v468_v27 = vmul.f32 0.2, %v368_v25 }
  0xab   : > { %v492_v28 = vsel %vm428_vm0, %v348_v24, %v460_v26  ;;  %v500_v29 = vsel %vm436_vm1, %v368_v25, %v468_v27 }
  0xac   : > { %v524_v30 = vpack.c.bf16 %v492_v28, %v492_v28  ;;  %v532_v31 = vpack.c.bf16 %v500_v29, %v500_v29 }
  0xae   : > { %557 = vst.msk [vmem:[%s894_s6] sm:$0xf] %vm556_vm2, %v524_v30 }
  0xaf   : > { %565 = vst.msk [vmem:[%s894_s6 + $0x20] sm:$0xf] %vm556_vm2, %v532_v31  ;;  %v388_v32 = vpop.f32.mrf.mxu2  ;;  %v408_v33 = vpop.f32.mrf.mxu3 }
  0xb0   : > { %vm444_vm3 = vcmp.ge.f32.partialorder %v388_v32, 0.0  ;;  %v476_v34 = vmul.f32 0.2, %v388_v32  ;;  %vm452_vm4 = vcmp.ge.f32.partialorder %v408_v33, 0.0  ;;  %v484_v35 = vmul.f32 0.2, %v408_v33  ;;  %v350_v36 = vpop.f32.mrf.mxu0  ;;  %v370_v37 = vpop.f32.mrf.mxu1 }
  0xb1   : > { %vm429_vm5 = vcmp.ge.f32.partialorder %v350_v36, 0.0  ;;  %v461_v38 = vmul.f32 0.2, %v350_v36  ;;  %vm437_vm6 = vcmp.ge.f32.partialorder %v370_v37, 0.0  ;;  %v469_v39 = vmul.f32 0.2, %v370_v37 }
  0xb2   : > { %v508_v40 = vsel %vm444_vm3, %v388_v32, %v476_v34  ;;  %v516_v41 = vsel %vm452_vm4, %v408_v33, %v484_v35 }
  0xb3   : > { %v540_v42 = vpack.c.bf16 %v508_v40, %v508_v40  ;;  %v548_v43 = vpack.c.bf16 %v516_v41, %v516_v41  ;;  %v493_v44 = vsel %vm429_vm5, %v350_v36, %v461_v38  ;;  %v501_v45 = vsel %vm437_vm6, %v370_v37, %v469_v39 }
  0xb4   : > { %v525_v46 = vpack.c.bf16 %v493_v44, %v493_v44  ;;  %v533_v47 = vpack.c.bf16 %v501_v45, %v501_v45 }
  0xb5   : > { %573 = vst.msk [vmem:[%s894_s6 + $0x40] sm:$0xf] %vm556_vm2, %v540_v42 }
  0xb6   : > { %581 = vst.msk [vmem:[%s894_s6 + $0x60] sm:$0xf] %vm556_vm2, %v548_v43 }
  0xb7   : > { %558 = vst.msk [vmem:[%s894_s6 + $0x4] sm:$0xf] %vm556_vm2, %v525_v46  ;;  %v390_v48 = vpop.f32.mrf.mxu2  ;;  %v410_v49 = vpop.f32.mrf.mxu3 }
  0xb8   : > { %566 = vst.msk [vmem:[%s894_s6 + $0x24] sm:$0xf] %vm556_vm2, %v533_v47  ;;  %vm445_vm7 = vcmp.ge.f32.partialorder %v390_v48, 0.0  ;;  %v477_v50 = vmul.f32 0.2, %v390_v48  ;;  %vm453_vm8 = vcmp.ge.f32.partialorder %v410_v49, 0.0  ;;  %v353_v51 = vpop.f32.mrf.mxu0  ;;  %v373_v52 = vpop.f32.mrf.mxu1 }
  0xb9   : > { %v485_v53 = vmul.f32 0.2, %v410_v49  ;;  %vm430_vm9 = vcmp.ge.f32.partialorder %v353_v51, 0.0  ;;  %v462_v54 = vmul.f32 0.2, %v353_v51  ;;  %vm438_vm10 = vcmp.ge.f32.partialorder %v373_v52, 0.0 }
  0xba   : > { %v509_v55 = vsel %vm445_vm7, %v390_v48, %v477_v50  ;;  %v470_v56 = vmul.f32 0.2, %v373_v52 }
  0xbb   : > { %v541_v57 = vpack.c.bf16 %v509_v55, %v509_v55  ;;  %v517_v58 = vsel %vm453_vm8, %v410_v49, %v485_v53  ;;  %v494_v59 = vsel %vm430_vm9, %v353_v51, %v462_v54 }
  0xbc   : > { %v549_v60 = vpack.c.bf16 %v517_v58, %v517_v58  ;;  %v526_v61 = vpack.c.bf16 %v494_v59, %v494_v59  ;;  %v502_v62 = vsel %vm438_vm10, %v373_v52, %v470_v56 }
  0xbd   : > { %574 = vst.msk [vmem:[%s894_s6 + $0x44] sm:$0xf] %vm556_vm2, %v541_v57  ;;  %v534_v63 = vpack.c.bf16 %v502_v62, %v502_v62 }
  0xbe   : > { %582 = vst.msk [vmem:[%s894_s6 + $0x64] sm:$0xf] %vm556_vm2, %v549_v60 }
  0xbf   : > { %559 = vst.msk [vmem:[%s894_s6 + $0x8] sm:$0xf] %vm556_vm2, %v526_v61  ;;  %v393_v0 = vpop.f32.mrf.mxu2  ;;  %v413_v1 = vpop.f32.mrf.mxu3 }
  0xc0   : > { %567 = vst.msk [vmem:[%s894_s6 + $0x28] sm:$0xf] %vm556_vm2, %v534_v63  ;;  %vm446_vm11 = vcmp.ge.f32.partialorder %v393_v0, 0.0  ;;  %v478_v2 = vmul.f32 0.2, %v393_v0  ;;  %vm454_vm12 = vcmp.ge.f32.partialorder %v413_v1, 0.0  ;;  %v355_v3 = vpop.f32.mrf.mxu0  ;;  %v375_v4 = vpop.f32.mrf.mxu1 }
  0xc1   : > { %v486_v5 = vmul.f32 0.2, %v413_v1  ;;  %vm431_vm13 = vcmp.ge.f32.partialorder %v355_v3, 0.0  ;;  %v463_v6 = vmul.f32 0.2, %v355_v3  ;;  %vm439_vm14 = vcmp.ge.f32.partialorder %v375_v4, 0.0 }
  0xc2   : > { %v510_v7 = vsel %vm446_vm11, %v393_v0, %v478_v2  ;;  %v471_v8 = vmul.f32 0.2, %v375_v4 }
  0xc3   : > { %v542_v9 = vpack.c.bf16 %v510_v7, %v510_v7  ;;  %v518_v10 = vsel %vm454_vm12, %v413_v1, %v486_v5  ;;  %v495_v11 = vsel %vm431_vm13, %v355_v3, %v463_v6 }
  0xc4   : > { %v550_v12 = vpack.c.bf16 %v518_v10, %v518_v10  ;;  %v527_v13 = vpack.c.bf16 %v495_v11, %v495_v11  ;;  %v503_v14 = vsel %vm439_vm14, %v375_v4, %v471_v8 }
  0xc5   : > { %575 = vst.msk [vmem:[%s894_s6 + $0x48] sm:$0xf] %vm556_vm2, %v542_v9  ;;  %v535_v15 = vpack.c.bf16 %v503_v14, %v503_v14 }
  0xc6   : > { %583 = vst.msk [vmem:[%s894_s6 + $0x68] sm:$0xf] %vm556_vm2, %v550_v12 }
  0xc7   : > { %560 = vst.msk [vmem:[%s894_s6 + $0xc] sm:$0xf] %vm556_vm2, %v527_v13  ;;  %v395_v16 = vpop.f32.mrf.mxu2  ;;  %v415_v17 = vpop.f32.mrf.mxu3 }
  0xc8   : > { %568 = vst.msk [vmem:[%s894_s6 + $0x2c] sm:$0xf] %vm556_vm2, %v535_v15  ;;  %vm447_vm15 = vcmp.ge.f32.partialorder %v395_v16, 0.0  ;;  %v479_v18 = vmul.f32 0.2, %v395_v16  ;;  %vm455_vm0 = vcmp.ge.f32.partialorder %v415_v17, 0.0  ;;  %v358_v19 = vpop.f32.mrf.mxu0  ;;  %v378_v20 = vpop.f32.mrf.mxu1 }
  0xc9   : > { %v487_v21 = vmul.f32 0.2, %v415_v17  ;;  %vm432_vm1 = vcmp.ge.f32.partialorder %v358_v19, 0.0  ;;  %v464_v22 = vmul.f32 0.2, %v358_v19  ;;  %vm440_vm3 = vcmp.ge.f32.partialorder %v378_v20, 0.0 }
  0xca   : > { %v511_v23 = vsel %vm447_vm15, %v395_v16, %v479_v18  ;;  %v472_v24 = vmul.f32 0.2, %v378_v20 }
  0xcb   : > { %v543_v25 = vpack.c.bf16 %v511_v23, %v511_v23  ;;  %v519_v26 = vsel %vm455_vm0, %v415_v17, %v487_v21  ;;  %v496_v27 = vsel %vm432_vm1, %v358_v19, %v464_v22 }
  0xcc   : > { %v551_v28 = vpack.c.bf16 %v519_v26, %v519_v26  ;;  %v528_v29 = vpack.c.bf16 %v496_v27, %v496_v27  ;;  %v504_v30 = vsel %vm440_vm3, %v378_v20, %v472_v24 }
  0xcd   : > { %576 = vst.msk [vmem:[%s894_s6 + $0x4c] sm:$0xf] %vm556_vm2, %v543_v25  ;;  %v536_v31 = vpack.c.bf16 %v504_v30, %v504_v30 }
  0xce   : > { %584 = vst.msk [vmem:[%s894_s6 + $0x6c] sm:$0xf] %vm556_vm2, %v551_v28 }
  0xcf   : > { %561 = vst.msk [vmem:[%s894_s6 + $0x10] sm:$0xf] %vm556_vm2, %v528_v29  ;;  %v398_v32 = vpop.f32.mrf.mxu2  ;;  %v418_v33 = vpop.f32.mrf.mxu3 }
  0xd0   : > { %569 = vst.msk [vmem:[%s894_s6 + $0x30] sm:$0xf] %vm556_vm2, %v536_v31  ;;  %vm448_vm4 = vcmp.ge.f32.partialorder %v398_v32, 0.0  ;;  %v480_v34 = vmul.f32 0.2, %v398_v32  ;;  %vm456_vm5 = vcmp.ge.f32.partialorder %v418_v33, 0.0  ;;  %v360_v35 = vpop.f32.mrf.mxu0  ;;  %v380_v36 = vpop.f32.mrf.mxu1 }
  0xd1   : > { %v488_v37 = vmul.f32 0.2, %v418_v33  ;;  %vm433_vm6 = vcmp.ge.f32.partialorder %v360_v35, 0.0  ;;  %v465_v38 = vmul.f32 0.2, %v360_v35  ;;  %vm441_vm7 = vcmp.ge.f32.partialorder %v380_v36, 0.0 }
  0xd2   : > { %v512_v39 = vsel %vm448_vm4, %v398_v32, %v480_v34  ;;  %v473_v40 = vmul.f32 0.2, %v380_v36 }
  0xd3   : > { %v544_v41 = vpack.c.bf16 %v512_v39, %v512_v39  ;;  %v520_v42 = vsel %vm456_vm5, %v418_v33, %v488_v37  ;;  %v497_v43 = vsel %vm433_vm6, %v360_v35, %v465_v38 }
  0xd4   : > { %v552_v44 = vpack.c.bf16 %v520_v42, %v520_v42  ;;  %v529_v45 = vpack.c.bf16 %v497_v43, %v497_v43  ;;  %v505_v46 = vsel %vm441_vm7, %v380_v36, %v473_v40 }
  0xd5   : > { %577 = vst.msk [vmem:[%s894_s6 + $0x50] sm:$0xf] %vm556_vm2, %v544_v41  ;;  %v537_v47 = vpack.c.bf16 %v505_v46, %v505_v46 }
  0xd6   : > { %585 = vst.msk [vmem:[%s894_s6 + $0x70] sm:$0xf] %vm556_vm2, %v552_v44 }
  0xd7   : > { %562 = vst.msk [vmem:[%s894_s6 + $0x14] sm:$0xf] %vm556_vm2, %v529_v45  ;;  %v400_v48 = vpop.f32.mrf.mxu2  ;;  %v420_v49 = vpop.f32.mrf.mxu3 }
  0xd8   : > { %570 = vst.msk [vmem:[%s894_s6 + $0x34] sm:$0xf] %vm556_vm2, %v537_v47  ;;  %vm449_vm8 = vcmp.ge.f32.partialorder %v400_v48, 0.0  ;;  %v481_v50 = vmul.f32 0.2, %v400_v48  ;;  %vm457_vm9 = vcmp.ge.f32.partialorder %v420_v49, 0.0  ;;  %v363_v51 = vpop.f32.mrf.mxu0  ;;  %v383_v52 = vpop.f32.mrf.mxu1 }
  0xd9   : > { %v489_v53 = vmul.f32 0.2, %v420_v49  ;;  %vm434_vm10 = vcmp.ge.f32.partialorder %v363_v51, 0.0  ;;  %v466_v54 = vmul.f32 0.2, %v363_v51  ;;  %vm442_vm11 = vcmp.ge.f32.partialorder %v383_v52, 0.0 }
  0xda   : > { %v513_v55 = vsel %vm449_vm8, %v400_v48, %v481_v50  ;;  %v474_v56 = vmul.f32 0.2, %v383_v52 }
  0xdb   : > { %v545_v57 = vpack.c.bf16 %v513_v55, %v513_v55  ;;  %v521_v58 = vsel %vm457_vm9, %v420_v49, %v489_v53  ;;  %v498_v59 = vsel %vm434_vm10, %v363_v51, %v466_v54 }
  0xdc   : > { %v553_v60 = vpack.c.bf16 %v521_v58, %v521_v58  ;;  %v530_v61 = vpack.c.bf16 %v498_v59, %v498_v59  ;;  %v506_v62 = vsel %vm442_vm11, %v383_v52, %v474_v56 }
  0xdd   : > { %578 = vst.msk [vmem:[%s894_s6 + $0x54] sm:$0xf] %vm556_vm2, %v545_v57  ;;  %v538_v63 = vpack.c.bf16 %v506_v62, %v506_v62 }
  0xde   : > { %586 = vst.msk [vmem:[%s894_s6 + $0x74] sm:$0xf] %vm556_vm2, %v553_v60 }
  0xdf   : > { %563 = vst.msk [vmem:[%s894_s6 + $0x18] sm:$0xf] %vm556_vm2, %v530_v61  ;;  %v403_v0 = vpop.f32.mrf.mxu2  ;;  %v423_v1 = vpop.f32.mrf.mxu3 }
  0xe0   : > { %571 = vst.msk [vmem:[%s894_s6 + $0x38] sm:$0xf] %vm556_vm2, %v538_v63  ;;  %vm450_vm12 = vcmp.ge.f32.partialorder %v403_v0, 0.0  ;;  %v482_v2 = vmul.f32 0.2, %v403_v0  ;;  %vm458_vm13 = vcmp.ge.f32.partialorder %v423_v1, 0.0  ;;  %v365_v3 = vpop.f32.mrf.mxu0  ;;  %v385_v4 = vpop.f32.mrf.mxu1 }
  0xe1   : > { %v490_v5 = vmul.f32 0.2, %v423_v1  ;;  %vm435_vm14 = vcmp.ge.f32.partialorder %v365_v3, 0.0  ;;  %v467_v6 = vmul.f32 0.2, %v365_v3  ;;  %vm443_vm15 = vcmp.ge.f32.partialorder %v385_v4, 0.0 }
  0xe2   : > { %v514_v7 = vsel %vm450_vm12, %v403_v0, %v482_v2  ;;  %v475_v8 = vmul.f32 0.2, %v385_v4 }
  0xe3   : > { %v546_v9 = vpack.c.bf16 %v514_v7, %v514_v7  ;;  %v522_v10 = vsel %vm458_vm13, %v423_v1, %v490_v5  ;;  %v499_v11 = vsel %vm435_vm14, %v365_v3, %v467_v6 }
  0xe4   : > { %v554_v12 = vpack.c.bf16 %v522_v10, %v522_v10  ;;  %v531_v13 = vpack.c.bf16 %v499_v11, %v499_v11  ;;  %v507_v14 = vsel %vm443_vm15, %v385_v4, %v475_v8 }
  0xe5   : > { %579 = vst.msk [vmem:[%s894_s6 + $0x58] sm:$0xf] %vm556_vm2, %v546_v9  ;;  %v539_v15 = vpack.c.bf16 %v507_v14, %v507_v14 }
  0xe6   : > { %587 = vst.msk [vmem:[%s894_s6 + $0x78] sm:$0xf] %vm556_vm2, %v554_v12 }
  0xe7   : > { %564 = vst.msk [vmem:[%s894_s6 + $0x1c] sm:$0xf] %vm556_vm2, %v531_v13  ;;  %v405_v16 = vpop.f32.mrf.mxu2  ;;  %v425_v17 = vpop.f32.mrf.mxu3 }
  0xe8   : > { %572 = vst.msk [vmem:[%s894_s6 + $0x3c] sm:$0xf] %vm556_vm2, %v539_v15  ;;  %vm451_vm0 = vcmp.ge.f32.partialorder %v405_v16, 0.0  ;;  %v483_v18 = vmul.f32 0.2, %v405_v16  ;;  %vm459_vm1 = vcmp.ge.f32.partialorder %v425_v17, 0.0 }
  0xe9   : > { %v491_v19 = vmul.f32 0.2, %v425_v17 }
  0xea   : > { %v515_v20 = vsel %vm451_vm0, %v405_v16, %v483_v18 }
  0xeb   : > { %v547_v21 = vpack.c.bf16 %v515_v20, %v515_v20  ;;  %v523_v22 = vsel %vm459_vm1, %v425_v17, %v491_v19 }
  0xec   : > { %v555_v23 = vpack.c.bf16 %v523_v22, %v523_v22 }
  0xed   : > { %580 = vst.msk [vmem:[%s894_s6 + $0x5c] sm:$0xf] %vm556_vm2, %v547_v21 }
  0xee   : > { %588 = vst.msk [vmem:[%s894_s6 + $0x7c] sm:$0xf] %vm556_vm2, %v555_v23 }
  0xef PF: > { %s12_s9 = sadd.s32 1, %s814_s9  }
  0xf0   : > { %p9_p4 = scmp.ge.s32.totalorder %s12_s9, 4  }
  0xf2   :  { %11 = sbr.rel (!%p9_p4) target bundleno = 1 (0x1), region = 58 }

// kernel: discriminator_forward.5
= control target key start
LH: loop header
LB: loop body
LE: loop exit
PB: predicated region body
PF: predicated region fallthrough
CT: control target
= control target key end

     0   :  { %s2963_s1 = inlined_call_operand.vmem [shape: bf16[1024,128], index: 1, kind: input, shape index: {}]   ;;  %s2964_s0 = inlined_call_operand.vmem [shape: bf16[128,1024], index: 0, kind: input, shape index: {}]   ;;  %s2965_s2 = inlined_call_operand.vmem [shape: bf16[128,128], index: 2, kind: output, shape index: {}]  }
   0x1   :  { %v2078_v0 = vld [vmem:[%s2963_s1 + $0x38] sm:$0xff]  ;;  %v2077_v4 = vld [vmem:[%s2963_s1 + $0x30] sm:$0xff]  ;;  %v2076_v8 = vld [vmem:[%s2963_s1 + $0x28] sm:$0xff] }
   0x2   :  { %v2086_v1 = vld [vmem:[%s2963_s1 + $0x78] sm:$0xff]  ;;  %907 = vmatpush.bf16.msra.mxu0 %v2078_v0  ;;  %v2085_v5 = vld [vmem:[%s2963_s1 + $0x70] sm:$0xff]  ;;  %v2084_v9 = vld [vmem:[%s2963_s1 + $0x68] sm:$0xff] }
   0x3   :  { %v2094_v2 = vld [vmem:[%s2963_s1 + $0xb8] sm:$0xff]  ;;  %956 = vmatpush.bf16.msra.mxu1 %v2086_v1  ;;  %v2093_v6 = vld [vmem:[%s2963_s1 + $0xb0] sm:$0xff]  ;;  %v2092_v10 = vld [vmem:[%s2963_s1 + $0xa8] sm:$0xff] }
   0x4   :  { %v2102_v3 = vld [vmem:[%s2963_s1 + $0xf8] sm:$0xff]  ;;  %1005 = vmatpush.bf16.msra.mxu2 %v2094_v2  ;;  %v2101_v7 = vld [vmem:[%s2963_s1 + $0xf0] sm:$0xff]  ;;  %v2100_v11 = vld [vmem:[%s2963_s1 + $0xe8] sm:$0xff] }
   0x5   :  { %1054 = vmatpush.bf16.msra.mxu3 %v2102_v3  ;;  %v2075_v12 = vld [vmem:[%s2963_s1 + $0x20] sm:$0xff]  ;;  %v2074_v16 = vld [vmem:[%s2963_s1 + $0x18] sm:$0xff]  ;;  %v2073_v20 = vld [vmem:[%s2963_s1 + $0x10] sm:$0xff] }
   0x6   :  { %908 = vmatpush.bf16.msra.mxu0 %v2077_v4  ;;  %v2083_v13 = vld [vmem:[%s2963_s1 + $0x60] sm:$0xff]  ;;  %v2082_v17 = vld [vmem:[%s2963_s1 + $0x58] sm:$0xff]  ;;  %v2081_v21 = vld [vmem:[%s2963_s1 + $0x50] sm:$0xff] }
   0x7   :  { %957 = vmatpush.bf16.msra.mxu1 %v2085_v5  ;;  %v2091_v14 = vld [vmem:[%s2963_s1 + $0xa0] sm:$0xff]  ;;  %v2090_v18 = vld [vmem:[%s2963_s1 + $0x98] sm:$0xff]  ;;  %v2089_v22 = vld [vmem:[%s2963_s1 + $0x90] sm:$0xff] }
   0x8   :  { %1006 = vmatpush.bf16.msra.mxu2 %v2093_v6  ;;  %v2099_v15 = vld [vmem:[%s2963_s1 + $0xe0] sm:$0xff]  ;;  %v2098_v19 = vld [vmem:[%s2963_s1 + $0xd8] sm:$0xff]  ;;  %v2097_v23 = vld [vmem:[%s2963_s1 + $0xd0] sm:$0xff] }
   0x9   :  { %1055 = vmatpush.bf16.msra.mxu3 %v2101_v7  ;;  %v2072_v24 = vld [vmem:[%s2963_s1 + $0x8] sm:$0xff]  ;;  %v2071_v28 = vld [vmem:[%s2963_s1] sm:$0xff]  ;;  %v2126_v40 = vld [vmem:[%s2963_s1 + $0x1b8] sm:$0xff] }
   0xa   :  { %909 = vmatpush.bf16.msra.mxu0 %v2076_v8  ;;  %v2080_v25 = vld [vmem:[%s2963_s1 + $0x48] sm:$0xff]  ;;  %v2079_v29 = vld [vmem:[%s2963_s1 + $0x40] sm:$0xff]  ;;  %v2110_v41 = vld [vmem:[%s2963_s1 + $0x138] sm:$0xff] }
   0xb   :  { %958 = vmatpush.bf16.msra.mxu1 %v2084_v9  ;;  %v2088_v26 = vld [vmem:[%s2963_s1 + $0x88] sm:$0xff]  ;;  %v2087_v30 = vld [vmem:[%s2963_s1 + $0x80] sm:$0xff]  ;;  %v2134_v46 = vld [vmem:[%s2963_s1 + $0x1f8] sm:$0xff] }
   0xc   :  { %1007 = vmatpush.bf16.msra.mxu2 %v2092_v10  ;;  %v2096_v27 = vld [vmem:[%s2963_s1 + $0xc8] sm:$0xff]  ;;  %v2095_v31 = vld [vmem:[%s2963_s1 + $0xc0] sm:$0xff]  ;;  %v2118_v47 = vld [vmem:[%s2963_s1 + $0x178] sm:$0xff] }
   0xd   :  { %1056 = vmatpush.bf16.msra.mxu3 %v2100_v11  ;;  %v1497_v32 = vld [vmem:[%s2964_s0] sm:$0xf]  ;;  %v2007_v34 = vld [vmem:[%s2964_s0 + $0x4] sm:$0xf]  ;;  %v1505_v36 = vld [vmem:[%s2964_s0 + $0x8] sm:$0xf] }
   0xe   :  { %910 = vmatpush.bf16.msra.mxu0 %v2075_v12  ;;  %v2011_v33 = vld [vmem:[%s2964_s0 + $0x1c] sm:$0xf0]  ;;  %v1499_v35 = vld [vmem:[%s2964_s0 + $0x20] sm:$0xf0]  ;;  %v2012_v37 = vld [vmem:[%s2964_s0 + $0x24] sm:$0xf0] }
   0xf   :  { %959 = vmatpush.bf16.msra.mxu1 %v2083_v13  ;;  %v2008_v38 = vld [vmem:[%s2964_s0 + $0xc] sm:$0xf]  ;;  %v1498_v42 = vor.u32 %v2011_v33, %v1497_v32  ;;  %v1502_v43 = vor.u32 %v2007_v34, %v1499_v35  ;;  %v1506_v44 = vor.u32 %v2012_v37, %v1505_v36  ;;  %v2125_v48 = vld [vmem:[%s2963_s1 + $0x1b0] sm:$0xff]  ;;  %v1529_v56 = vld [vmem:[%s2964_s0 + $0x40] sm:$0xf] }
  0x10   :  { %1008 = vmatpush.bf16.msra.mxu2 %v2091_v14  ;;  %v1507_v39 = vld [vmem:[%s2964_s0 + $0x28] sm:$0xf0]  ;;  %v2109_v49 = vld [vmem:[%s2963_s1 + $0x130] sm:$0xff]  ;;  %v2019_v57 = vld [vmem:[%s2964_s0 + $0x5c] sm:$0xf0] }
  0x11   :  { %1057 = vmatpush.bf16.msra.mxu3 %v2099_v15  ;;  %v1510_v45 = vor.u32 %v2008_v38, %v1507_v39  ;;  %v2133_v50 = vld [vmem:[%s2963_s1 + $0x1f0] sm:$0xff]  ;;  %v2124_v52 = vld [vmem:[%s2963_s1 + $0x1a8] sm:$0xff]  ;;  %v2015_v58 = vld [vmem:[%s2964_s0 + $0x44] sm:$0xf]  ;;  %v1530_v0 = vor.u32 %v2019_v57, %v1529_v56 }
  0x12   :  { %911 = vmatpush.bf16.msra.mxu0 %v2074_v16  ;;  %v2117_v51 = vld [vmem:[%s2963_s1 + $0x170] sm:$0xff]  ;;  %v2108_v53 = vld [vmem:[%s2963_s1 + $0x128] sm:$0xff]  ;;  %v1531_v59 = vld [vmem:[%s2964_s0 + $0x60] sm:$0xf0] }
  0x13   :  { %960 = vmatpush.bf16.msra.mxu1 %v2082_v17  ;;  %v2132_v54 = vld [vmem:[%s2963_s1 + $0x1e8] sm:$0xff]  ;;  %v1534_v1 = vor.u32 %v2015_v58, %v1531_v59  ;;  %v2123_v4 = vld [vmem:[%s2963_s1 + $0x1a0] sm:$0xff]  ;;  %v2121_v36 = vld [vmem:[%s2963_s1 + $0x190] sm:$0xff] }
  0x14   :  { %1009 = vmatpush.bf16.msra.mxu2 %v2090_v18  ;;  %v2116_v55 = vld [vmem:[%s2963_s1 + $0x168] sm:$0xff]  ;;  %v2107_v5 = vld [vmem:[%s2963_s1 + $0x120] sm:$0xff]  ;;  %v2105_v37 = vld [vmem:[%s2963_s1 + $0x110] sm:$0xff] }
  0x15   :  { %1058 = vmatpush.bf16.msra.mxu3 %v2098_v19  ;;  %v1537_v60 = vld [vmem:[%s2964_s0 + $0x48] sm:$0xf]  ;;  %v2016_v62 = vld [vmem:[%s2964_s0 + $0x4c] sm:$0xf]  ;;  %v2131_v6 = vld [vmem:[%s2963_s1 + $0x1e0] sm:$0xff] }
  0x16   :  { %912 = vmatpush.bf16.msra.mxu0 %v2073_v20  ;;  %v2020_v61 = vld [vmem:[%s2964_s0 + $0x64] sm:$0xf0]  ;;  %v1539_v63 = vld [vmem:[%s2964_s0 + $0x68] sm:$0xf0]  ;;  %v2115_v7 = vld [vmem:[%s2963_s1 + $0x160] sm:$0xff] }
  0x17   :  { %961 = vmatpush.bf16.msra.mxu1 %v2081_v21  ;;  %v1538_v2 = vor.u32 %v2020_v61, %v1537_v60  ;;  %v1542_v3 = vor.u32 %v2016_v62, %v1539_v63  ;;  %v1561_v8 = vld [vmem:[%s2964_s0 + $0x80] sm:$0xf]  ;;  %v2023_v10 = vld [vmem:[%s2964_s0 + $0x84] sm:$0xf]  ;;  %v1569_v12 = vld [vmem:[%s2964_s0 + $0x88] sm:$0xf] }
  0x18   :  { %1010 = vmatpush.bf16.msra.mxu2 %v2089_v22  ;;  %v2027_v9 = vld [vmem:[%s2964_s0 + $0x9c] sm:$0xf0]  ;;  %v1563_v11 = vld [vmem:[%s2964_s0 + $0xa0] sm:$0xf0]  ;;  %v2028_v13 = vld [vmem:[%s2964_s0 + $0xa4] sm:$0xf0] }
  0x19   :  { %1059 = vmatpush.bf16.msra.mxu3 %v2097_v23  ;;  %v2024_v14 = vld [vmem:[%s2964_s0 + $0x8c] sm:$0xf]  ;;  %v1562_v16 = vor.u32 %v2027_v9, %v1561_v8  ;;  %v1566_v17 = vor.u32 %v2023_v10, %v1563_v11  ;;  %v1570_v18 = vor.u32 %v2028_v13, %v1569_v12  ;;  %v2122_v20 = vld [vmem:[%s2963_s1 + $0x198] sm:$0xff]  ;;  %v2129_v38 = vld [vmem:[%s2963_s1 + $0x1d0] sm:$0xff] }
  0x1a   :  { %913 = vmatpush.bf16.msra.mxu0 %v2072_v24  ;;  %v1571_v15 = vld [vmem:[%s2964_s0 + $0xa8] sm:$0xf0]  ;;  %v2106_v21 = vld [vmem:[%s2963_s1 + $0x118] sm:$0xff]  ;;  %v1593_v24 = vld [vmem:[%s2964_s0 + $0xc0] sm:$0xf] }
  0x1b   :  { %962 = vmatpush.bf16.msra.mxu1 %v2080_v25  ;;  %v1574_v19 = vor.u32 %v2024_v14, %v1571_v15  ;;  %v2130_v22 = vld [vmem:[%s2963_s1 + $0x1d8] sm:$0xff]  ;;  %v2035_v25 = vld [vmem:[%s2964_s0 + $0xdc] sm:$0xf0]  ;;  %v2113_v39 = vld [vmem:[%s2963_s1 + $0x150] sm:$0xff] }
  0x1c   :  { %1011 = vmatpush.bf16.msra.mxu2 %v2088_v26  ;;  %v2114_v23 = vld [vmem:[%s2963_s1 + $0x158] sm:$0xff]  ;;  %v2031_v26 = vld [vmem:[%s2964_s0 + $0xc4] sm:$0xf]  ;;  %v1594_v32 = vor.u32 %v2035_v25, %v1593_v24  ;;  %v1657_v56 = vld [vmem:[%s2964_s0 + $0x140] sm:$0xf] }
  0x1d   :  { %1060 = vmatpush.bf16.msra.mxu3 %v2096_v27  ;;  %v1595_v27 = vld [vmem:[%s2964_s0 + $0xe0] sm:$0xf0]  ;;  %v2051_v57 = vld [vmem:[%s2964_s0 + $0x15c] sm:$0xf0]  ;;  %v1665_v60 = vld [vmem:[%s2964_s0 + $0x148] sm:$0xf] }
  0x1e   :  { %914 = vmatpush.bf16.msra.mxu0 %v2071_v28  ;;  %v1601_v28 = vld [vmem:[%s2964_s0 + $0xc8] sm:$0xf]  ;;  %v1598_v33 = vor.u32 %v2031_v26, %v1595_v27  ;;  %v2047_v58 = vld [vmem:[%s2964_s0 + $0x144] sm:$0xf]  ;;  %v2048_v62 = vld [vmem:[%s2964_s0 + $0x14c] sm:$0xf] }
  0x1f   :  { %963 = vmatpush.bf16.msra.mxu1 %v2079_v29  ;;  %v2036_v29 = vld [vmem:[%s2964_s0 + $0xe4] sm:$0xf0]  ;;  %v1659_v59 = vld [vmem:[%s2964_s0 + $0x160] sm:$0xf0]  ;;  %v1667_v63 = vld [vmem:[%s2964_s0 + $0x168] sm:$0xf0] }
  0x20   :  { %1012 = vmatpush.bf16.msra.mxu2 %v2087_v30  ;;  %v2032_v30 = vld [vmem:[%s2964_s0 + $0xcc] sm:$0xf]  ;;  %v1602_v34 = vor.u32 %v2036_v29, %v1601_v28  ;;  %v2052_v61 = vld [vmem:[%s2964_s0 + $0x164] sm:$0xf0]  ;;  %v1689_v8 = vld [vmem:[%s2964_s0 + $0x180] sm:$0xf] }
  0x21   :  { %1061 = vmatpush.bf16.msra.mxu3 %v2095_v31  ;;  %915 = vmatmul.bf16.vlgmr.msra.gmra.mxu0 %v1498_v42  ;;  %v1603_v31 = vld [vmem:[%s2964_s0 + $0xe8] sm:$0xf0]  ;;  %v2039_v42 = vld [vmem:[%s2964_s0 + $0x104] sm:$0xf]  ;;  %v2059_v9 = vld [vmem:[%s2964_s0 + $0x19c] sm:$0xf0] }
  0x22   :  { %1103 = vmatpush.bf16.msrb.mxu0 %v2110_v41  ;;  %964 = vmatmul.bf16.vlgmr.msra.gmra.mxu1 %v1502_v43  ;;  %v1606_v35 = vor.u32 %v2032_v30, %v1603_v31  ;;  %v2043_v41 = vld [vmem:[%s2964_s0 + $0x11c] sm:$0xf0]  ;;  %v1627_v43 = vld [vmem:[%s2964_s0 + $0x120] sm:$0xf0]  ;;  %v1697_v12 = vld [vmem:[%s2964_s0 + $0x188] sm:$0xf] }
  0x23   :  { %1013 = vmatmul.bf16.vlgmr.msra.gmra.mxu2 %v1506_v44  ;;  %1152 = vmatpush.bf16.msrb.mxu1 %v2118_v47  ;;  %v1633_v44 = vld [vmem:[%s2964_s0 + $0x108] sm:$0xf]  ;;  %v1635_v47 = vld [vmem:[%s2964_s0 + $0x128] sm:$0xf0]  ;;  %v2055_v10 = vld [vmem:[%s2964_s0 + $0x184] sm:$0xf] }
  0x24   :  { %1201 = vmatpush.bf16.msrb.mxu2 %v2126_v40  ;;  %1062 = vmatmul.bf16.vlgmr.msra.gmra.mxu3 %v1510_v45  ;;  %v1625_v40 = vld [vmem:[%s2964_s0 + $0x100] sm:$0xf]  ;;  %v2044_v45 = vld [vmem:[%s2964_s0 + $0x124] sm:$0xf0]  ;;  %v1691_v11 = vld [vmem:[%s2964_s0 + $0x1a0] sm:$0xf0] }
  0x25   :  { %1250 = vmatpush.bf16.msrb.mxu3 %v2134_v46  ;;  %v2040_v46 = vld [vmem:[%s2964_s0 + $0x10c] sm:$0xf]  ;;  %v2060_v13 = vld [vmem:[%s2964_s0 + $0x1a4] sm:$0xf0] }
  0x26   :  { %1104 = vmatpush.bf16.msrb.mxu0 %v2109_v49  ;;  %v1630_v49 = vor.u32 %v2039_v42, %v1627_v43  ;;  %v2056_v14 = vld [vmem:[%s2964_s0 + $0x18c] sm:$0xf]  ;;  %v1729_v24 = vld [vmem:[%s2964_s0 + $0x1c8] sm:$0xf] }
  0x27   :  { %1153 = vmatpush.bf16.msrb.mxu1 %v2117_v51  ;;  %v1638_v51 = vor.u32 %v2040_v46, %v1635_v47  ;;  %v1699_v15 = vld [vmem:[%s2964_s0 + $0x1a8] sm:$0xf0]  ;;  %v2068_v25 = vld [vmem:[%s2964_s0 + $0x1e4] sm:$0xf0] }
  0x28   :  { %1202 = vmatpush.bf16.msrb.mxu2 %v2125_v48  ;;  %v1626_v48 = vor.u32 %v2043_v41, %v1625_v40  ;;  %v2064_v26 = vld [vmem:[%s2964_s0 + $0x1cc] sm:$0xf]  ;;  %v1730_v30 = vor.u32 %v2068_v25, %v1729_v24 }
  0x29   :  { %1251 = vmatpush.bf16.msrb.mxu3 %v2133_v50  ;;  %v1634_v50 = vor.u32 %v2044_v45, %v1633_v44  ;;  %v1731_v27 = vld [vmem:[%s2964_s0 + $0x1e8] sm:$0xf0] }
  0x2a   :  { %1105 = vmatpush.bf16.msrb.mxu0 %v2108_v53  ;;  %v2104_v53 = vld [vmem:[%s2963_s1 + $0x108] sm:$0xff]  ;;  %v1734_v31 = vor.u32 %v2064_v26, %v1731_v27 }
  0x2b   :  { %1154 = vmatpush.bf16.msrb.mxu1 %v2116_v55  ;;  %v2112_v55 = vld [vmem:[%s2963_s1 + $0x148] sm:$0xff] }
  0x2c   :  { %1203 = vmatpush.bf16.msrb.mxu2 %v2124_v52  ;;  %v2120_v52 = vld [vmem:[%s2963_s1 + $0x188] sm:$0xff] }
  0x2d   :  { %1252 = vmatpush.bf16.msrb.mxu3 %v2132_v54  ;;  %v2128_v54 = vld [vmem:[%s2963_s1 + $0x1c8] sm:$0xff] }
  0x2e   :  { %1106 = vmatpush.bf16.msrb.mxu0 %v2107_v5  ;;  %v2103_v5 = vld [vmem:[%s2963_s1 + $0x100] sm:$0xff] }
  0x2f   :  { %1155 = vmatpush.bf16.msrb.mxu1 %v2115_v7  ;;  %v2111_v7 = vld [vmem:[%s2963_s1 + $0x140] sm:$0xff] }
  0x30   :  { %1204 = vmatpush.bf16.msrb.mxu2 %v2123_v4  ;;  %v2119_v4 = vld [vmem:[%s2963_s1 + $0x180] sm:$0xff] }
  0x31   :  { %920 = vmatmul.bf16.gmra.mxu0 %v1530_v0  ;;  %1253 = vmatpush.bf16.msrb.mxu3 %v2131_v6  ;;  %v1658_v0 = vor.u32 %v2051_v57, %v1657_v56  ;;  %v2127_v6 = vld [vmem:[%s2963_s1 + $0x1c0] sm:$0xff]  ;;  %v2017_v56 = vld [vmem:[%s2964_s0 + $0x54] sm:$0xf] }
  0x32   :  { %969 = vmatmul.bf16.gmra.mxu1 %v1534_v1  ;;  %1107 = vmatpush.bf16.msrb.mxu0 %v2106_v21  ;;  %v1662_v1 = vor.u32 %v2047_v58, %v1659_v59  ;;  %v2067_v21 = vld [vmem:[%s2964_s0 + $0x1dc] sm:$0xf0]  ;;  %v1547_v57 = vld [vmem:[%s2964_s0 + $0x70] sm:$0xf0]  ;;  %v1553_v58 = vld [vmem:[%s2964_s0 + $0x58] sm:$0xf] }
  0x33   :  { %1018 = vmatmul.bf16.gmra.mxu2 %v1538_v2  ;;  %1156 = vmatpush.bf16.msrb.mxu1 %v2114_v23  ;;  %v1666_v2 = vor.u32 %v2052_v61, %v1665_v60  ;;  %v1723_v23 = vld [vmem:[%s2964_s0 + $0x1e0] sm:$0xf0]  ;;  %v2022_v59 = vld [vmem:[%s2964_s0 + $0x74] sm:$0xf0]  ;;  %v2018_v60 = vld [vmem:[%s2964_s0 + $0x5c] sm:$0xf] }
  0x34   :  { %1067 = vmatmul.bf16.gmra.mxu3 %v1542_v3  ;;  %1205 = vmatpush.bf16.msrb.mxu2 %v2122_v20  ;;  %v1670_v3 = vor.u32 %v2048_v62, %v1667_v63  ;;  %v1721_v20 = vld [vmem:[%s2964_s0 + $0x1c0] sm:$0xf]  ;;  %v1555_v61 = vld [vmem:[%s2964_s0 + $0x78] sm:$0xf0] }
  0x35   :  { %1254 = vmatpush.bf16.msrb.mxu3 %v2130_v22  ;;  %v2063_v22 = vld [vmem:[%s2964_s0 + $0x1c4] sm:$0xf]  ;;  %v1722_v28 = vor.u32 %v2067_v21, %v1721_v20  ;;  %v1585_v20 = vld [vmem:[%s2964_s0 + $0x98] sm:$0xf] }
  0x36   :  { %1108 = vmatpush.bf16.msrb.mxu0 %v2105_v37  ;;  %v1726_v29 = vor.u32 %v2063_v22, %v1723_v23  ;;  %v2014_v37 = vld [vmem:[%s2964_s0 + $0x34] sm:$0xf0]  ;;  %v2026_v22 = vld [vmem:[%s2964_s0 + $0x9c] sm:$0xf] }
  0x37   :  { %1157 = vmatpush.bf16.msrb.mxu1 %v2113_v39  ;;  %v1523_v39 = vld [vmem:[%s2964_s0 + $0x38] sm:$0xf0]  ;;  %v2030_v21 = vld [vmem:[%s2964_s0 + $0xb4] sm:$0xf0] }
  0x38   :  { %1206 = vmatpush.bf16.msrb.mxu2 %v2121_v36  ;;  %v1521_v36 = vld [vmem:[%s2964_s0 + $0x18] sm:$0xf]  ;;  %v1587_v23 = vld [vmem:[%s2964_s0 + $0xb8] sm:$0xf0] }
  0x39   :  { %1255 = vmatpush.bf16.msrb.mxu3 %v2129_v38  ;;  %v2010_v38 = vld [vmem:[%s2964_s0 + $0x1c] sm:$0xf]  ;;  %v1522_v44 = vor.u32 %v2014_v37, %v1521_v36 }
  0x3a   :  { %1109 = vmatpush.bf16.msrb.mxu0 %v2104_v53  ;;  %v1526_v45 = vor.u32 %v2010_v38, %v1523_v39 }
  0x3b   :  { %1158 = vmatpush.bf16.msrb.mxu1 %v2112_v55  ;;  %v2021_v55 = vld [vmem:[%s2964_s0 + $0x6c] sm:$0xf0] }
  0x3c   :  { %1207 = vmatpush.bf16.msrb.mxu2 %v2120_v52 }
  0x3d   :  { %1256 = vmatpush.bf16.msrb.mxu3 %v2128_v54  ;;  %v1545_v54 = vld [vmem:[%s2964_s0 + $0x50] sm:$0xf] }
  0x3e   :  { %1110 = vmatpush.bf16.msrb.mxu0 %v2103_v5  ;;  %v1554_v5 = vor.u32 %v2022_v59, %v1553_v58 }
  0x3f   :  { %1159 = vmatpush.bf16.msrb.mxu1 %v2111_v7 }
  0x40   :  { %1208 = vmatpush.bf16.msrb.mxu2 %v2119_v4 }
  0x41   :  { %925 = vmatmul.bf16.gmra.mxu0 %v1562_v16  ;;  %1257 = vmatpush.bf16.msrb.mxu3 %v2127_v6  ;;  %v1690_v16 = vor.u32 %v2059_v9, %v1689_v8  ;;  %v1558_v6 = vor.u32 %v2018_v60, %v1555_v61 }
  0x42   :  { %974 = vmatmul.bf16.gmra.mxu1 %v1566_v17  ;;  %v1694_v17 = vor.u32 %v2055_v10, %v1691_v11 }
  0x43   :  { %1023 = vmatmul.bf16.gmra.mxu2 %v1570_v18  ;;  %v1698_v18 = vor.u32 %v2060_v13, %v1697_v12 }
  0x44   :  { %1072 = vmatmul.bf16.gmra.mxu3 %v1574_v19  ;;  %v1702_v19 = vor.u32 %v2056_v14, %v1699_v15 }
  0x51   :  { %930 = vmatmul.bf16.gmra.mxu0 %v1594_v32  ;;  %v1513_v32 = vld [vmem:[%s2964_s0 + $0x10] sm:$0xf] }
  0x52   :  { %979 = vmatmul.bf16.gmra.mxu1 %v1598_v33  ;;  %v2013_v33 = vld [vmem:[%s2964_s0 + $0x2c] sm:$0xf0] }
  0x53   :  { %1028 = vmatmul.bf16.gmra.mxu2 %v1602_v34  ;;  %v2009_v34 = vld [vmem:[%s2964_s0 + $0x14] sm:$0xf]  ;;  %v1514_v40 = vor.u32 %v2013_v33, %v1513_v32  ;;  %v1590_v32 = vor.u32 %v2026_v22, %v1587_v23 }
  0x54   :  { %1077 = vmatmul.bf16.gmra.mxu3 %v1606_v35  ;;  %v1515_v35 = vld [vmem:[%s2964_s0 + $0x30] sm:$0xf0] }
  0x55   :  { %v1518_v41 = vor.u32 %v2009_v34, %v1515_v35 }
  0x61   :  { %935 = vmatmul.bf16.gmra.mxu0 %v1626_v48 }
  0x62   :  { %984 = vmatmul.bf16.gmra.mxu1 %v1630_v49 }
  0x63   :  { %1033 = vmatmul.bf16.gmra.mxu2 %v1634_v50 }
  0x64   :  { %1082 = vmatmul.bf16.gmra.mxu3 %v1638_v51 }
  0x71   :  { %940 = vmatmul.bf16.gmra.mxu0 %v1658_v0  ;;  %v1546_v0 = vor.u32 %v2021_v55, %v1545_v54 }
  0x72   :  { %989 = vmatmul.bf16.gmra.mxu1 %v1662_v1  ;;  %v1550_v1 = vor.u32 %v2017_v56, %v1547_v57 }
  0x73   :  { %1038 = vmatmul.bf16.gmra.mxu2 %v1666_v2 }
  0x74   :  { %1087 = vmatmul.bf16.gmra.mxu3 %v1670_v3 }
  0x81   :  { %945 = vmatmul.bf16.gmra.mxu0 %v1690_v16  ;;  %v1577_v16 = vld [vmem:[%s2964_s0 + $0x90] sm:$0xf] }
  0x82   :  { %994 = vmatmul.bf16.gmra.mxu1 %v1694_v17  ;;  %v2029_v17 = vld [vmem:[%s2964_s0 + $0xac] sm:$0xf0] }
  0x83   :  { %1043 = vmatmul.bf16.gmra.mxu2 %v1698_v18  ;;  %v2025_v18 = vld [vmem:[%s2964_s0 + $0x94] sm:$0xf]  ;;  %v1578_v26 = vor.u32 %v2029_v17, %v1577_v16 }
  0x84   :  { %1092 = vmatmul.bf16.gmra.mxu3 %v1702_v19  ;;  %v1579_v19 = vld [vmem:[%s2964_s0 + $0xb0] sm:$0xf0] }
  0x85   :  { %v1582_v27 = vor.u32 %v2025_v18, %v1579_v19 }
  0x91   :  { %950 = vmatmul.bf16.gmra.mxu0 %v1722_v28 }
  0x92   :  { %999 = vmatmul.bf16.gmra.mxu1 %v1726_v29 }
  0x93   :  { %1048 = vmatmul.bf16.gmra.mxu2 %v1730_v30 }
  0x94   :  { %1097 = vmatmul.bf16.gmra.mxu3 %v1734_v31  ;;  %v1586_v31 = vor.u32 %v2030_v21, %v1585_v20 }
  0x9e   :  { %v916_v42 = vpop.f32.mrf.mxu0 }
  0x9f   :  { %v965_v43 = vpop.f32.mrf.mxu1 }
  0xa0   :  { %v966_v46 = vadd.f32 %v965_v43, %v916_v42  ;;  %v1609_v42 = vld [vmem:[%s2964_s0 + $0xd0] sm:$0xf] }
  0xa1   :  { %1111 = vmatmul.bf16.vlgmr.msrb.gmra.mxu0 %v1514_v40  ;;  %v2037_v43 = vld [vmem:[%s2964_s0 + $0xec] sm:$0xf0] }
  0xa2   :  { %1160 = vmatmul.bf16.vlgmr.msrb.gmra.mxu1 %v1518_v41 }
  0xa3   :  { %1209 = vmatmul.bf16.vlgmr.msrb.gmra.mxu2 %v1522_v44  ;;  %v2033_v44 = vld [vmem:[%s2964_s0 + $0xd4] sm:$0xf] }
  0xa4   :  { %1258 = vmatmul.bf16.vlgmr.msrb.gmra.mxu3 %v1526_v45  ;;  %v1611_v45 = vld [vmem:[%s2964_s0 + $0xf0] sm:$0xf0] }
  0xa5   :  { %v1614_v54 = vor.u32 %v2033_v44, %v1611_v45 }
  0xa6   :  { %v1014_v47 = vpop.f32.mrf.mxu2  ;;  %v918_v50 = vpop.f32.mrf.mxu0 }
  0xa7   :  { %v1063_v48 = vpop.f32.mrf.mxu3  ;;  %v1015_v49 = vadd.f32 %v1014_v47, %v966_v46  ;;  %v967_v51 = vpop.f32.mrf.mxu1  ;;  %v1617_v46 = vld [vmem:[%s2964_s0 + $0xd8] sm:$0xf] }
  0xa8   :  { %v968_v52 = vadd.f32 %v967_v51, %v918_v50  ;;  %v2038_v47 = vld [vmem:[%s2964_s0 + $0xf4] sm:$0xf0] }
  0xa9   :  { %v2611_v53 = vadd.f32 %v1063_v48, %v1015_v49  ;;  %v2034_v48 = vld [vmem:[%s2964_s0 + $0xdc] sm:$0xf]  ;;  %v1618_v58 = vor.u32 %v2038_v47, %v1617_v46 }
  0xaa   :  { %v1619_v49 = vld [vmem:[%s2964_s0 + $0xf8] sm:$0xf0] }
  0xab   :  { %v1622_v59 = vor.u32 %v2034_v48, %v1619_v49 }
  0xae   :  { %v1016_v62 = vpop.f32.mrf.mxu2  ;;  %v921_v3 = vpop.f32.mrf.mxu0 }
  0xaf   :  { %v1065_v63 = vpop.f32.mrf.mxu3  ;;  %v1017_v2 = vadd.f32 %v1016_v62, %v968_v52  ;;  %v970_v4 = vpop.f32.mrf.mxu1  ;;  %v1610_v52 = vor.u32 %v2037_v43, %v1609_v42  ;;  %v1683_v42 = vld [vmem:[%s2964_s0 + $0x178] sm:$0xf0] }
  0xb0   :  { %v971_v7 = vadd.f32 %v970_v4, %v921_v3 }
  0xb1   :  { %v2637_v8 = vadd.f32 %v1065_v63, %v1017_v2  ;;  %1116 = vmatmul.bf16.gmra.mxu0 %v1546_v0 }
  0xb2   :  { %1165 = vmatmul.bf16.gmra.mxu1 %v1550_v1 }
  0xb3   :  { %1214 = vmatmul.bf16.gmra.mxu2 %v1554_v5  ;;  %v1641_v5 = vld [vmem:[%s2964_s0 + $0x110] sm:$0xf] }
  0xb4   :  { %1263 = vmatmul.bf16.gmra.mxu3 %v1558_v6  ;;  %v2045_v6 = vld [vmem:[%s2964_s0 + $0x12c] sm:$0xf0] }
  0xb5   :  { %v1642_v17 = vor.u32 %v2045_v6, %v1641_v5  ;;  %v2062_v5 = vld [vmem:[%s2964_s0 + $0x1b4] sm:$0xf0]  ;;  %v2058_v6 = vld [vmem:[%s2964_s0 + $0x19c] sm:$0xf] }
  0xb6   :  { %v1019_v9 = vpop.f32.mrf.mxu2  ;;  %v923_v12 = vpop.f32.mrf.mxu0 }
  0xb7   :  { %v1068_v10 = vpop.f32.mrf.mxu3  ;;  %v1020_v11 = vadd.f32 %v1019_v9, %v971_v7  ;;  %v972_v13 = vpop.f32.mrf.mxu1  ;;  %v2041_v7 = vld [vmem:[%s2964_s0 + $0x114] sm:$0xf] }
  0xb8   :  { %v973_v14 = vadd.f32 %v972_v13, %v923_v12  ;;  %v1643_v9 = vld [vmem:[%s2964_s0 + $0x130] sm:$0xf0]  ;;  %v2042_v12 = vld [vmem:[%s2964_s0 + $0x11c] sm:$0xf] }
  0xb9   :  { %v2639_v15 = vadd.f32 %v1068_v10, %v1020_v11  ;;  %v1649_v10 = vld [vmem:[%s2964_s0 + $0x118] sm:$0xf]  ;;  %v1651_v13 = vld [vmem:[%s2964_s0 + $0x138] sm:$0xf0]  ;;  %v1646_v18 = vor.u32 %v2041_v7, %v1643_v9 }
  0xba   :  { %v2046_v11 = vld [vmem:[%s2964_s0 + $0x134] sm:$0xf0]  ;;  %v1654_v23 = vor.u32 %v2042_v12, %v1651_v13  ;;  %v1715_v7 = vld [vmem:[%s2964_s0 + $0x1b8] sm:$0xf0] }
  0xbb   :  { %v1650_v22 = vor.u32 %v2046_v11, %v1649_v10 }
  0xbe   :  { %v1021_v24 = vpop.f32.mrf.mxu2  ;;  %v926_v29 = vpop.f32.mrf.mxu0 }
  0xbf   :  { %v1070_v25 = vpop.f32.mrf.mxu3  ;;  %v1022_v28 = vadd.f32 %v1021_v24, %v973_v14  ;;  %v975_v30 = vpop.f32.mrf.mxu1 }
  0xc0   :  { %v976_v33 = vadd.f32 %v975_v30, %v926_v29 }
  0xc1   :  { %v2665_v34 = vadd.f32 %v1070_v25, %v1022_v28  ;;  %1121 = vmatmul.bf16.gmra.mxu0 %v1578_v26 }
  0xc2   :  { %1170 = vmatmul.bf16.gmra.mxu1 %v1582_v27 }
  0xc3   :  { %1219 = vmatmul.bf16.gmra.mxu2 %v1586_v31 }
  0xc4   :  { %1268 = vmatmul.bf16.gmra.mxu3 %v1590_v32 }
  0xc6   :  { %v1024_v35 = vpop.f32.mrf.mxu2  ;;  %v928_v38 = vpop.f32.mrf.mxu0 }
  0xc7   :  { %v1073_v36 = vpop.f32.mrf.mxu3  ;;  %v1025_v37 = vadd.f32 %v1024_v35, %v976_v33  ;;  %v977_v39 = vpop.f32.mrf.mxu1  ;;  %v1673_v33 = vld [vmem:[%s2964_s0 + $0x150] sm:$0xf] }
  0xc8   :  { %v978_v40 = vadd.f32 %v977_v39, %v928_v38  ;;  %v2053_v35 = vld [vmem:[%s2964_s0 + $0x16c] sm:$0xf0]  ;;  %v1681_v38 = vld [vmem:[%s2964_s0 + $0x158] sm:$0xf] }
  0xc9   :  { %v2667_v41 = vadd.f32 %v1073_v36, %v1025_v37  ;;  %v2049_v36 = vld [vmem:[%s2964_s0 + $0x154] sm:$0xf]  ;;  %v2054_v39 = vld [vmem:[%s2964_s0 + $0x174] sm:$0xf0]  ;;  %v1674_v45 = vor.u32 %v2053_v35, %v1673_v33 }
  0xca   :  { %v1675_v37 = vld [vmem:[%s2964_s0 + $0x170] sm:$0xf0]  ;;  %v1745_v35 = vld [vmem:[%s2964_s0 + $0x1d8] sm:$0xf] }
  0xcb   :  { %v1678_v46 = vor.u32 %v2049_v36, %v1675_v37  ;;  %v1739_v33 = vld [vmem:[%s2964_s0 + $0x1f0] sm:$0xf0]  ;;  %v2070_v36 = vld [vmem:[%s2964_s0 + $0x1f4] sm:$0xf0]  ;;  %v2066_v37 = vld [vmem:[%s2964_s0 + $0x1dc] sm:$0xf] }
  0xce   :  { %v1026_v50 = vpop.f32.mrf.mxu2  ;;  %v931_v56 = vpop.f32.mrf.mxu0 }
  0xcf   :  { %v1075_v51 = vpop.f32.mrf.mxu3  ;;  %v1027_v55 = vadd.f32 %v1026_v50, %v978_v40  ;;  %v980_v57 = vpop.f32.mrf.mxu1  ;;  %v2050_v40 = vld [vmem:[%s2964_s0 + $0x15c] sm:$0xf]  ;;  %v1682_v50 = vor.u32 %v2054_v39, %v1681_v38 }
  0xd0   :  { %v981_v60 = vadd.f32 %v980_v57, %v931_v56  ;;  %v1747_v38 = vld [vmem:[%s2964_s0 + $0x1f8] sm:$0xf0] }
  0xd1   :  { %v2693_v61 = vadd.f32 %v1075_v51, %v1027_v55  ;;  %1126 = vmatmul.bf16.gmra.mxu0 %v1610_v52  ;;  %v1686_v51 = vor.u32 %v2050_v40, %v1683_v42 }
  0xd2   :  { %1175 = vmatmul.bf16.gmra.mxu1 %v1614_v54 }
  0xd3   :  { %1224 = vmatmul.bf16.gmra.mxu2 %v1618_v58 }
  0xd4   :  { %1273 = vmatmul.bf16.gmra.mxu3 %v1622_v59 }
  0xd6   :  { %v1029_v62 = vpop.f32.mrf.mxu2  ;;  %v933_v1 = vpop.f32.mrf.mxu0 }
  0xd7   :  { %v1078_v63 = vpop.f32.mrf.mxu3  ;;  %v1030_v0 = vadd.f32 %v1029_v62, %v981_v60  ;;  %v982_v2 = vpop.f32.mrf.mxu1 }
  0xd8   :  { %v983_v3 = vadd.f32 %v982_v2, %v933_v1  ;;  %v2057_v1 = vld [vmem:[%s2964_s0 + $0x194] sm:$0xf] }
  0xd9   :  { %v2695_v4 = vadd.f32 %v1078_v63, %v1030_v0  ;;  %v1705_v63 = vld [vmem:[%s2964_s0 + $0x190] sm:$0xf]  ;;  %v1707_v2 = vld [vmem:[%s2964_s0 + $0x1b0] sm:$0xf0] }
  0xda   :  { %v2061_v0 = vld [vmem:[%s2964_s0 + $0x1ac] sm:$0xf0]  ;;  %v1710_v12 = vor.u32 %v2057_v1, %v1707_v2 }
  0xdb   :  { %v1706_v11 = vor.u32 %v2061_v0, %v1705_v63 }
  0xde   :  { %v1031_v14 = vpop.f32.mrf.mxu2  ;;  %v936_v20 = vpop.f32.mrf.mxu0 }
  0xdf   :  { %v1080_v16 = vpop.f32.mrf.mxu3  ;;  %v1032_v19 = vadd.f32 %v1031_v14, %v983_v3  ;;  %v985_v21 = vpop.f32.mrf.mxu1  ;;  %v1713_v3 = vld [vmem:[%s2964_s0 + $0x198] sm:$0xf] }
  0xe0   :  { %v986_v24 = vadd.f32 %v985_v21, %v936_v20 }
  0xe1   :  { %v2721_v25 = vadd.f32 %v1080_v16, %v1032_v19  ;;  %1131 = vmatmul.bf16.gmra.mxu0 %v1642_v17  ;;  %v1714_v17 = vor.u32 %v2062_v5, %v1713_v3 }
  0xe2   :  { %1180 = vmatmul.bf16.gmra.mxu1 %v1646_v18  ;;  %v1718_v18 = vor.u32 %v2058_v6, %v1715_v7 }
  0xe3   :  { %1229 = vmatmul.bf16.gmra.mxu2 %v1650_v22 }
  0xe4   :  { %1278 = vmatmul.bf16.gmra.mxu3 %v1654_v23 }
  0xe6   :  { %v1034_v26 = vpop.f32.mrf.mxu2  ;;  %v938_v29 = vpop.f32.mrf.mxu0 }
  0xe7   :  { %v1083_v27 = vpop.f32.mrf.mxu3  ;;  %v1035_v28 = vadd.f32 %v1034_v26, %v986_v24  ;;  %v987_v30 = vpop.f32.mrf.mxu1 }
  0xe8   :  { %v988_v31 = vadd.f32 %v987_v30, %v938_v29  ;;  %v1737_v29 = vld [vmem:[%s2964_s0 + $0x1d0] sm:$0xf] }
  0xe9   :  { %v2723_v32 = vadd.f32 %v1083_v27, %v1035_v28  ;;  %v2069_v30 = vld [vmem:[%s2964_s0 + $0x1ec] sm:$0xf0] }
  0xea   :  { %v1738_v42 = vor.u32 %v2069_v30, %v1737_v29 }
  0xee   :  { %v1036_v43 = vpop.f32.mrf.mxu2  ;;  %v941_v48 = vpop.f32.mrf.mxu0 }
  0xef   :  { %v1085_v44 = vpop.f32.mrf.mxu3  ;;  %v1037_v47 = vadd.f32 %v1036_v43, %v988_v31  ;;  %v990_v49 = vpop.f32.mrf.mxu1  ;;  %v2065_v31 = vld [vmem:[%s2964_s0 + $0x1d4] sm:$0xf] }
  0xf0   :  { %v991_v52 = vadd.f32 %v990_v49, %v941_v48  ;;  %v1742_v43 = vor.u32 %v2065_v31, %v1739_v33  ;;  %v1750_v48 = vor.u32 %v2066_v37, %v1747_v38 }
  0xf1   :  { %v2749_v54 = vadd.f32 %v1085_v44, %v1037_v47  ;;  %1136 = vmatmul.bf16.gmra.mxu0 %v1674_v45  ;;  %v1746_v47 = vor.u32 %v2070_v36, %v1745_v35 }
  0xf2   :  { %1185 = vmatmul.bf16.gmra.mxu1 %v1678_v46 }
  0xf3   :  { %1234 = vmatmul.bf16.gmra.mxu2 %v1682_v50 }
  0xf4   :  { %1283 = vmatmul.bf16.gmra.mxu3 %v1686_v51 }
  0xf6   :  { %v1039_v55 = vpop.f32.mrf.mxu2  ;;  %v943_v58 = vpop.f32.mrf.mxu0 }
  0xf7   :  { %v1088_v56 = vpop.f32.mrf.mxu3  ;;  %v1040_v57 = vadd.f32 %v1039_v55, %v991_v52  ;;  %v992_v59 = vpop.f32.mrf.mxu1 }
  0xf8   :  { %v993_v60 = vadd.f32 %v992_v59, %v943_v58 }
  0xf9   :  { %v2751_v62 = vadd.f32 %v1088_v56, %v1040_v57 }
  0xfe   :  { %v1041_v9 = vpop.f32.mrf.mxu2  ;;  %v946_v14 = vpop.f32.mrf.mxu0 }
  0xff   :  { %v1090_v10 = vpop.f32.mrf.mxu3  ;;  %v1042_v13 = vadd.f32 %v1041_v9, %v993_v60  ;;  %v995_v16 = vpop.f32.mrf.mxu1 }
 0x100   :  { %v996_v19 = vadd.f32 %v995_v16, %v946_v14 }
 0x101   :  { %v2777_v20 = vadd.f32 %v1090_v10, %v1042_v13  ;;  %1141 = vmatmul.bf16.gmra.mxu0 %v1706_v11 }
 0x102   :  { %1190 = vmatmul.bf16.gmra.mxu1 %v1710_v12 }
 0x103   :  { %1239 = vmatmul.bf16.gmra.mxu2 %v1714_v17 }
 0x104   :  { %1288 = vmatmul.bf16.gmra.mxu3 %v1718_v18 }
 0x106   :  { %v1044_v21 = vpop.f32.mrf.mxu2  ;;  %v948_v24 = vpop.f32.mrf.mxu0 }
 0x107   :  { %v1093_v22 = vpop.f32.mrf.mxu3  ;;  %v1045_v23 = vadd.f32 %v1044_v21, %v996_v19  ;;  %v997_v26 = vpop.f32.mrf.mxu1 }
 0x108   :  { %v998_v27 = vadd.f32 %v997_v26, %v948_v24 }
 0x109   :  { %v2779_v28 = vadd.f32 %v1093_v22, %v1045_v23 }
 0x10e   :  { %v1046_v39 = vpop.f32.mrf.mxu2  ;;  %v951_v45 = vpop.f32.mrf.mxu0 }
 0x10f   :  { %v1095_v40 = vpop.f32.mrf.mxu3  ;;  %v1047_v44 = vadd.f32 %v1046_v39, %v998_v27  ;;  %v1000_v46 = vpop.f32.mrf.mxu1 }
 0x110   :  { %v1001_v49 = vadd.f32 %v1000_v46, %v951_v45 }
 0x111   :  { %v2805_v50 = vadd.f32 %v1095_v40, %v1047_v44  ;;  %1146 = vmatmul.bf16.gmra.mxu0 %v1738_v42 }
 0x112   :  { %1195 = vmatmul.bf16.gmra.mxu1 %v1742_v43 }
 0x113   :  { %1244 = vmatmul.bf16.gmra.mxu2 %v1746_v47 }
 0x114   :  { %1293 = vmatmul.bf16.gmra.mxu3 %v1750_v48 }
 0x116   :  { %v1049_v51 = vpop.f32.mrf.mxu2  ;;  %v953_v56 = vpop.f32.mrf.mxu0 }
 0x117   :  { %v1098_v52 = vpop.f32.mrf.mxu3  ;;  %v1050_v55 = vadd.f32 %v1049_v51, %v1001_v49  ;;  %v1002_v57 = vpop.f32.mrf.mxu1 }
 0x118   :  { %v1003_v58 = vadd.f32 %v1002_v57, %v953_v56 }
 0x119   :  { %v2807_v59 = vadd.f32 %v1098_v52, %v1050_v55 }
 0x11e   :  { %v1051_v60 = vpop.f32.mrf.mxu2  ;;  %v1112_v1 = vpop.f32.mrf.mxu0 }
 0x11f   :  { %v1100_v63 = vpop.f32.mrf.mxu3  ;;  %v1052_v0 = vadd.f32 %v1051_v60, %v1003_v58  ;;  %v1161_v2 = vpop.f32.mrf.mxu1  ;;  %v1113_v3 = vadd.f32 %v1112_v1, %v2611_v53 }
 0x121   :  { %v2810_v5 = vadd.f32 %v1100_v63, %v1052_v0  ;;  %v1162_v6 = vadd.f32 %v1161_v2, %v1113_v3 }
 0x126   :  { %v1210_v7 = vpop.f32.mrf.mxu2  ;;  %v1114_v11 = vpop.f32.mrf.mxu0 }
 0x127   :  { %v1259_v9 = vpop.f32.mrf.mxu3  ;;  %v1211_v10 = vadd.f32 %v1210_v7, %v1162_v6  ;;  %v1163_v12 = vpop.f32.mrf.mxu1  ;;  %v1115_v13 = vadd.f32 %v1114_v11, %v2637_v8 }
 0x129   :  { %v2813_v14 = vadd.f32 %v1259_v9, %v1211_v10  ;;  %v1164_v16 = vadd.f32 %v1163_v12, %v1115_v13 }
 0x12b   :  { %v1328_v45 = vmul.f32 %v2813_v14, %v2813_v14 }
 0x12e   :  { %v1212_v17 = vpop.f32.mrf.mxu2  ;;  %v1117_v21 = vpop.f32.mrf.mxu0 }
 0x12f   :  { %v1261_v18 = vpop.f32.mrf.mxu3  ;;  %v1213_v19 = vadd.f32 %v1212_v17, %v1164_v16  ;;  %v1166_v22 = vpop.f32.mrf.mxu1  ;;  %v1118_v53 = vadd.f32 %v1117_v21, %v2639_v15 }
 0x131   :  { %v2816_v23 = vadd.f32 %v1261_v18, %v1213_v19  ;;  %v1167_v24 = vadd.f32 %v1166_v22, %v1118_v53 }
 0x133   :  { %v1329_v44 = vmul.f32 %v2816_v23, %v2816_v23 }
 0x135   :  { %v1344_v49 = vadd.f32 %v1329_v44, %v1328_v45 }
 0x136   :  { %v1215_v26 = vpop.f32.mrf.mxu2  ;;  %v1119_v30 = vpop.f32.mrf.mxu0 }
 0x137   :  { %v1264_v27 = vpop.f32.mrf.mxu3  ;;  %v1216_v29 = vadd.f32 %v1215_v26, %v1167_v24  ;;  %v1168_v31 = vpop.f32.mrf.mxu1  ;;  %v1120_v8 = vadd.f32 %v1119_v30, %v2665_v34  ;;  %v1299_v34 = vadd.f32 %v2816_v23, %v2813_v14 }
 0x139   :  { %v2819_v33 = vadd.f32 %v1264_v27, %v1216_v29  ;;  %v1169_v35 = vadd.f32 %v1168_v31, %v1120_v8 }
 0x13b   :  { %v1330_v46 = vmul.f32 %v2819_v33, %v2819_v33 }
 0x13d   :  { %v1345_v57 = vadd.f32 %v1344_v49, %v1330_v46 }
 0x13e   :  { %v1217_v36 = vpop.f32.mrf.mxu2  ;;  %v1122_v39 = vpop.f32.mrf.mxu0 }
 0x13f   :  { %v1266_v37 = vpop.f32.mrf.mxu3  ;;  %v1218_v38 = vadd.f32 %v1217_v36, %v1169_v35  ;;  %v1171_v40 = vpop.f32.mrf.mxu1  ;;  %v1123_v15 = vadd.f32 %v1122_v39, %v2667_v41  ;;  %v1300_v41 = vadd.f32 %v1299_v34, %v2819_v33 }
 0x141   :  { %v2822_v42 = vadd.f32 %v1266_v37, %v1218_v38  ;;  %v1172_v43 = vadd.f32 %v1171_v40, %v1123_v15 }
 0x143   :  { %v1331_v51 = vmul.f32 %v2822_v42, %v2822_v42  ;;  %v1301_v58 = vadd.f32 %v1300_v41, %v2822_v42 }
 0x145   :  { %v1346_v0 = vadd.f32 %v1345_v57, %v1331_v51 }
 0x146   :  { %v1220_v47 = vpop.f32.mrf.mxu2  ;;  %v1124_v55 = vpop.f32.mrf.mxu0 }
 0x147   :  { %v1269_v48 = vpop.f32.mrf.mxu3  ;;  %v1221_v52 = vadd.f32 %v1220_v47, %v1172_v43  ;;  %v1173_v56 = vpop.f32.mrf.mxu1  ;;  %v1125_v63 = vadd.f32 %v1124_v55, %v2693_v61 }
 0x149   :  { %v2836_v60 = vadd.f32 %v1269_v48, %v1221_v52  ;;  %v1174_v6 = vadd.f32 %v1173_v56, %v1125_v63 }
 0x14b   :  { %v1302_v1 = vadd.f32 %v1301_v58, %v2836_v60  ;;  %v1332_v2 = vmul.f32 %v2836_v60, %v2836_v60 }
 0x14d   :  { %v1347_v3 = vadd.f32 %v1346_v0, %v1332_v2 }
 0x14e   :  { %v1222_v7 = vpop.f32.mrf.mxu2  ;;  %v1127_v11 = vpop.f32.mrf.mxu0 }
 0x14f   :  { %v1271_v9 = vpop.f32.mrf.mxu3  ;;  %v1223_v10 = vadd.f32 %v1222_v7, %v1174_v6  ;;  %v1176_v12 = vpop.f32.mrf.mxu1  ;;  %v1128_v16 = vadd.f32 %v1127_v11, %v2695_v4 }
 0x151   :  { %v2842_v13 = vadd.f32 %v1271_v9, %v1223_v10  ;;  %v1177_v19 = vadd.f32 %v1176_v12, %v1128_v16 }
 0x153   :  { %v1303_v17 = vadd.f32 %v1302_v1, %v2842_v13  ;;  %v1333_v61 = vmul.f32 %v2842_v13, %v2842_v13 }
 0x155   :  { %v1348_v18 = vadd.f32 %v1347_v3, %v1333_v61 }
 0x156   :  { %v1225_v21 = vpop.f32.mrf.mxu2  ;;  %v1129_v24 = vpop.f32.mrf.mxu0 }
 0x157   :  { %v1274_v22 = vpop.f32.mrf.mxu3  ;;  %v1226_v53 = vadd.f32 %v1225_v21, %v1177_v19  ;;  %v1178_v26 = vpop.f32.mrf.mxu1  ;;  %v1130_v29 = vadd.f32 %v1129_v24, %v2721_v25 }
 0x159   :  { %v2848_v27 = vadd.f32 %v1274_v22, %v1226_v53  ;;  %v1179_v8 = vadd.f32 %v1178_v26, %v1130_v29 }
 0x15b   :  { %v1304_v30 = vadd.f32 %v1303_v17, %v2848_v27  ;;  %v1334_v4 = vmul.f32 %v2848_v27, %v2848_v27 }
 0x15d   :  { %v1349_v31 = vadd.f32 %v1348_v18, %v1334_v4 }
 0x15e   :  { %v1227_v35 = vpop.f32.mrf.mxu2  ;;  %v1132_v38 = vpop.f32.mrf.mxu0 }
 0x15f   :  { %v1276_v36 = vpop.f32.mrf.mxu3  ;;  %v1228_v37 = vadd.f32 %v1227_v35, %v1179_v8  ;;  %v1181_v39 = vpop.f32.mrf.mxu1  ;;  %v1133_v15 = vadd.f32 %v1132_v38, %v2723_v32 }
 0x161   :  { %v2854_v40 = vadd.f32 %v1276_v36, %v1228_v37  ;;  %v1182_v45 = vadd.f32 %v1181_v39, %v1133_v15 }
 0x163   :  { %v1305_v43 = vadd.f32 %v1304_v30, %v2854_v40  ;;  %v1335_v25 = vmul.f32 %v2854_v40, %v2854_v40 }
 0x165   :  { %v1350_v44 = vadd.f32 %v1349_v31, %v1335_v25 }
 0x166   :  { %v1230_v34 = vpop.f32.mrf.mxu2  ;;  %v1134_v48 = vpop.f32.mrf.mxu0 }
 0x167   :  { %v1279_v46 = vpop.f32.mrf.mxu3  ;;  %v1231_v47 = vadd.f32 %v1230_v34, %v1182_v45  ;;  %v1183_v49 = vpop.f32.mrf.mxu1  ;;  %v1135_v51 = vadd.f32 %v1134_v48, %v2749_v54 }
 0x169   :  { %v2860_v41 = vadd.f32 %v1279_v46, %v1231_v47  ;;  %v1184_v56 = vadd.f32 %v1183_v49, %v1135_v51 }
 0x16b   :  { %v1306_v52 = vadd.f32 %v1305_v43, %v2860_v41  ;;  %v1336_v32 = vmul.f32 %v2860_v41, %v2860_v41 }
 0x16d   :  { %v1351_v55 = vadd.f32 %v1350_v44, %v1336_v32 }
 0x16e   :  { %v1232_v57 = vpop.f32.mrf.mxu2  ;;  %v1137_v0 = vpop.f32.mrf.mxu0 }
 0x16f   :  { %v1281_v58 = vpop.f32.mrf.mxu3  ;;  %v1233_v63 = vadd.f32 %v1232_v57, %v1184_v56  ;;  %v1186_v1 = vpop.f32.mrf.mxu1  ;;  %v1138_v3 = vadd.f32 %v1137_v0, %v2751_v62 }
 0x171   :  { %v2866_v2 = vadd.f32 %v1281_v58, %v1233_v63  ;;  %v1187_v9 = vadd.f32 %v1186_v1, %v1138_v3  ;;  %v2187_v63 = vmov 128.0  }
 0x172   :  { %2183 = vrcp.f32 %v2187_v63 }
 0x173   :  { %v1307_v6 = vadd.f32 %v1306_v52, %v2866_v2  ;;  %v1337_v54 = vmul.f32 %v2866_v2, %v2866_v2 }
 0x175   :  { %v1352_v7 = vadd.f32 %v1351_v55, %v1337_v54 }
 0x176   :  { %v1235_v10 = vpop.f32.mrf.mxu2  ;;  %v1139_v16 = vpop.f32.mrf.mxu0 }
 0x177   :  { %v1284_v11 = vpop.f32.mrf.mxu3  ;;  %v1236_v12 = vadd.f32 %v1235_v10, %v1187_v9  ;;  %v1188_v17 = vpop.f32.mrf.mxu1  ;;  %v1140_v18 = vadd.f32 %v1139_v16, %v2777_v20 }
 0x178   :  { %v2184_v9 = vpop.eup %2183 }
 0x179   :  { %v2872_v61 = vadd.f32 %v1284_v11, %v1236_v12  ;;  %v1189_v22 = vadd.f32 %v1188_v17, %v1140_v18  ;;  %v1321_v18 = vmul.f32 128.0, %v2184_v9  ;;  %vm1325_vm0 = vweird.f32 %v2184_v9 }
 0x17b   :  { %v1308_v19 = vadd.f32 %v1307_v6, %v2872_v61  ;;  %v1338_v62 = vmul.f32 %v2872_v61, %v2872_v61 }
 0x17d   :  { %v1353_v21 = vadd.f32 %v1352_v7, %v1338_v62 }
 0x17e   :  { %v1237_v53 = vpop.f32.mrf.mxu2  ;;  %v1142_v29 = vpop.f32.mrf.mxu0 }
 0x17f   :  { %v1286_v24 = vpop.f32.mrf.mxu3  ;;  %v1238_v26 = vadd.f32 %v1237_v53, %v1189_v22  ;;  %v1191_v30 = vpop.f32.mrf.mxu1  ;;  %v1143_v31 = vadd.f32 %v1142_v29, %v2779_v28  ;;  %v1322_v22 = vsub.f32 1.0, %v1321_v18 }
 0x181   :  { %v2878_v4 = vadd.f32 %v1286_v24, %v1238_v26  ;;  %v1192_v36 = vadd.f32 %v1191_v30, %v1143_v31  ;;  %v1323_v29 = vmul.f32 %v2184_v9, %v1322_v22 }
 0x183   :  { %v1309_v8 = vadd.f32 %v1308_v19, %v2878_v4  ;;  %v1339_v20 = vmul.f32 %v2878_v4, %v2878_v4 }
 0x185   :  { %v1354_v35 = vadd.f32 %v1353_v21, %v1339_v20 }
 0x186   :  { %v1240_v37 = vpop.f32.mrf.mxu2  ;;  %v1144_v15 = vpop.f32.mrf.mxu0 }
 0x187   :  { %v1289_v38 = vpop.f32.mrf.mxu3  ;;  %v1241_v39 = vadd.f32 %v1240_v37, %v1192_v36  ;;  %v1193_v43 = vpop.f32.mrf.mxu1  ;;  %v1145_v44 = vadd.f32 %v1144_v15, %v2805_v50 }
 0x189   :  { %v2884_v25 = vadd.f32 %v1289_v38, %v1241_v39  ;;  %v1194_v46 = vadd.f32 %v1193_v43, %v1145_v44 }
 0x18b   :  { %v1310_v45 = vadd.f32 %v1309_v8, %v2884_v25  ;;  %v1340_v28 = vmul.f32 %v2884_v25, %v2884_v25 }
 0x18d   :  { %v1355_v34 = vadd.f32 %v1354_v35, %v1340_v28  ;;  %v1324_v35 = vadd.f32 %v2184_v9, %v1323_v29 }
 0x18e   :  { %v1242_v47 = vpop.f32.mrf.mxu2  ;;  %v1147_v51 = vpop.f32.mrf.mxu0 }
 0x18f   :  { %v1291_v48 = vpop.f32.mrf.mxu3  ;;  %v1243_v49 = vadd.f32 %v1242_v47, %v1194_v46  ;;  %v1148_v32 = vadd.f32 %v1147_v51, %v2807_v59  ;;  %v1196_v55 = vpop.f32.mrf.mxu1  ;;  %v1326_v15 = vsel %vm1325_vm0, %v2184_v9, %v1324_v35 }
 0x191   :  { %v2890_v52 = vadd.f32 %v1291_v48, %v1243_v49  ;;  %v1197_v58 = vadd.f32 %v1196_v55, %v1148_v32 }
 0x193   :  { %v1311_v56 = vadd.f32 %v1310_v45, %v2890_v52  ;;  %v1341_v50 = vmul.f32 %v2890_v52, %v2890_v52 }
 0x195   :  { %v1356_v57 = vadd.f32 %v1355_v34, %v1341_v50 }
 0x196   :  { %v1245_v0 = vpop.f32.mrf.mxu2  ;;  %v1149_v6 = vpop.f32.mrf.mxu0 }
 0x197   :  { %v1294_v1 = vpop.f32.mrf.mxu3  ;;  %v1246_v3 = vadd.f32 %v1245_v0, %v1197_v58  ;;  %v1150_v7 = vadd.f32 %v1149_v6, %v2810_v5  ;;  %v1198_v11 = vpop.f32.mrf.mxu1 }
 0x199   :  { %v2896_v54 = vadd.f32 %v1294_v1, %v1246_v3  ;;  %v1199_v16 = vadd.f32 %v1198_v11, %v1150_v7 }
 0x19b   :  { %v1312_v59 = vadd.f32 %v1311_v56, %v2896_v54  ;;  %v1342_v10 = vmul.f32 %v2896_v54, %v2896_v54 }
 0x19d   :  { %v1357_v12 = vadd.f32 %v1356_v57, %v1342_v10 }
 0x19e   :  { %v1247_v17 = vpop.f32.mrf.mxu2 }
 0x19f   :  { %v1248_v19 = vadd.f32 %v1247_v17, %v1199_v16  ;;  %v1296_v62 = vpop.f32.mrf.mxu3 }
 0x1a1   :  { %v2902_v21 = vadd.f32 %v1296_v62, %v1248_v19 }
 0x1a3   :  { %v1313_v53 = vadd.f32 %v1312_v59, %v2902_v21  ;;  %v1343_v5 = vmul.f32 %v2902_v21, %v2902_v21 }
 0x1a5   :  { %v1314_v24 = vrot.slane %v1313_v53, 4  ;;  %v1358_v26 = vadd.f32 %v1357_v12, %v1343_v5 }
 0x1a7   :  { %v1315_v30 = vadd.f32 %v1314_v24, %v1313_v53  ;;  %v1359_v31 = vrot.slane %v1358_v26, 4 }
 0x1a9   :  { %v1316_v8 = vrot.slane %v1315_v30, 2  ;;  %v1360_v20 = vadd.f32 %v1359_v31, %v1358_v26 }
 0x1ab   :  { %v1317_v36 = vadd.f32 %v1316_v8, %v1315_v30  ;;  %v1361_v37 = vrot.slane %v1360_v20, 2 }
 0x1ad   :  { %v1318_v38 = vrot.slane %v1317_v36, 1  ;;  %v1362_v39 = vadd.f32 %v1361_v37, %v1360_v20 }
 0x1af   :  { %v1319_v43 = vadd.f32 %v1318_v38, %v1317_v36  ;;  %v1363_v44 = vrot.slane %v1362_v39, 1 }
 0x1b1   :  { %v1327_v45 = vmul.f32 %v1326_v15, %v1319_v43  ;;  %v1364_v28 = vadd.f32 %v1363_v44, %v1362_v39 }
 0x1b3   :  { %v1365_v34 = vmul.f32 %v1364_v28, %v1326_v15  ;;  %v1366_v46 = vmul.f32 %v1327_v45, %v1327_v45  ;;  %v1371_v47 = vsub.f32 %v2822_v42, %v1327_v45  ;;  %v1372_v48 = vsub.f32 %v2836_v60, %v1327_v45 }
 0x1b4   :  { %v1373_v49 = vsub.f32 %v2842_v13, %v1327_v45  ;;  %v1374_v32 = vsub.f32 %v2848_v27, %v1327_v45  ;;  %v1375_v55 = vsub.f32 %v2854_v40, %v1327_v45  ;;  %v1376_v56 = vsub.f32 %v2860_v41, %v1327_v45 }
 0x1b5   :  { %v1367_v51 = vsub.f32 %v1365_v34, %v1366_v46  ;;  %v1377_v50 = vsub.f32 %v2866_v2, %v1327_v45  ;;  %v1378_v57 = vsub.f32 %v2872_v61, %v1327_v45  ;;  %v1379_v58 = vsub.f32 %v2878_v4, %v1327_v45 }
 0x1b6   :  { %v1380_v63 = vsub.f32 %v2884_v25, %v1327_v45  ;;  %v1381_v42 = vsub.f32 %v2890_v52, %v1327_v45  ;;  %v1382_v60 = vsub.f32 %v2896_v54, %v1327_v45  ;;  %v1383_v13 = vsub.f32 %v2902_v21, %v1327_v45 }
 0x1b7   :  { %v1384_v0 = vadd.f32 1e-05, %v1367_v51  ;;  %v1368_v61 = vsub.f32 %v2813_v14, %v1327_v45  ;;  %v1369_v4 = vsub.f32 %v2816_v23, %v1327_v45  ;;  %v1370_v25 = vsub.f32 %v2819_v33, %v1327_v45 }
 0x1b9   :  { %2185 = vrsqrt.f32 %v1384_v0  ;;  %vm1391_vm2 = vweird.f32 %v1384_v0 }
 0x1bf   :  { %v2186_v27 = vpop.eup %2185 }
 0x1c0   :  { %v1386_v40 = vmul.f32 %v2186_v27, %v1384_v0  ;;  %vm1392_vm1 = vweird.f32 %v2186_v27 }
 0x1c1   :  { %vm1393_vm3 = vmor %vm1391_vm2, %vm1392_vm1 }
 0x1c2   :  { %v1387_v1 = vmul.f32 %v2186_v27, %v1386_v40 }
 0x1c4   :  { %v1388_v41 = vmul.f32 0.5, %v1387_v1 }
 0x1c6   :  { %v1389_v3 = vsub.f32 1.5, %v1388_v41 }
 0x1c8   :  { %v1390_v2 = vmul.f32 %v2186_v27, %v1389_v3 }
 0x1ca   :  { %v1394_v52 = vsel %vm1393_vm3, %v2186_v27, %v1390_v2 }
 0x1cb   :  { %v1395_v6 = vmul.f32 %v1394_v52, %v1368_v61  ;;  %v1396_v54 = vmul.f32 %v1394_v52, %v1369_v4  ;;  %v1397_v7 = vmul.f32 %v1394_v52, %v1370_v25  ;;  %v1398_v9 = vmul.f32 %v1394_v52, %v1371_v47 }
 0x1cc   :  { %v1399_v59 = vmul.f32 %v1394_v52, %v1372_v48  ;;  %v1400_v10 = vmul.f32 %v1394_v52, %v1373_v49  ;;  %v1401_v11 = vmul.f32 %v1394_v52, %v1374_v32  ;;  %v1402_v12 = vmul.f32 %v1394_v52, %v1375_v55 }
 0x1cd   :  { %v1403_v16 = vmul.f32 %v1394_v52, %v1376_v56  ;;  %v1404_v17 = vmul.f32 %v1394_v52, %v1377_v50  ;;  %v1405_v18 = vmul.f32 %v1394_v52, %v1378_v57  ;;  %v1406_v19 = vmul.f32 %v1394_v52, %v1379_v58 }
 0x1ce   :  { %v1407_v62 = vmul.f32 %v1394_v52, %v1380_v63  ;;  %v1408_v14 = vmul.f32 %v1394_v52, %v1381_v42  ;;  %v1409_v21 = vmul.f32 %v1394_v52, %v1382_v60  ;;  %v1410_v23 = vmul.f32 %v1394_v52, %v1383_v13 }
 0x1cf   :  { %vm1411_vm4 = vcmp.ge.f32.partialorder %v1395_v6, 0.0  ;;  %vm1412_vm5 = vcmp.ge.f32.partialorder %v1396_v54, 0.0  ;;  %vm1413_vm6 = vcmp.ge.f32.partialorder %v1397_v7, 0.0  ;;  %vm1414_vm7 = vcmp.ge.f32.partialorder %v1398_v9, 0.0 }
 0x1d0   :  { %vm1415_vm8 = vcmp.ge.f32.partialorder %v1399_v59, 0.0  ;;  %vm1416_vm9 = vcmp.ge.f32.partialorder %v1400_v10, 0.0  ;;  %vm1417_vm10 = vcmp.ge.f32.partialorder %v1401_v11, 0.0  ;;  %vm1418_vm11 = vcmp.ge.f32.partialorder %v1402_v12, 0.0 }
 0x1d1   :  { %vm1419_vm12 = vcmp.ge.f32.partialorder %v1403_v16, 0.0  ;;  %vm1420_vm13 = vcmp.ge.f32.partialorder %v1404_v17, 0.0  ;;  %vm1421_vm14 = vcmp.ge.f32.partialorder %v1405_v18, 0.0  ;;  %vm1422_vm15 = vcmp.ge.f32.partialorder %v1406_v19, 0.0 }
 0x1d2   :  { %vm1423_vm0 = vcmp.ge.f32.partialorder %v1407_v62, 0.0  ;;  %vm1424_vm1 = vcmp.ge.f32.partialorder %v1408_v14, 0.0  ;;  %vm1425_vm2 = vcmp.ge.f32.partialorder %v1409_v21, 0.0  ;;  %vm1426_vm3 = vcmp.ge.f32.partialorder %v1410_v23, 0.0 }
 0x1d3   :  { %v1427_v33 = vmul.f32 0.2, %v1395_v6  ;;  %v1428_v22 = vmul.f32 0.2, %v1396_v54  ;;  %v1429_v53 = vmul.f32 0.2, %v1397_v7 }
 0x1d4   :  { %v1430_v5 = vmul.f32 0.2, %v1398_v9  ;;  %v1431_v24 = vmul.f32 0.2, %v1399_v59  ;;  %v1432_v26 = vmul.f32 0.2, %v1400_v10 }
 0x1d5   :  { %v1433_v29 = vmul.f32 0.2, %v1401_v11  ;;  %v1434_v30 = vmul.f32 0.2, %v1402_v12  ;;  %v1435_v31 = vmul.f32 0.2, %v1403_v16  ;;  %v1443_v8 = vsel %vm1411_vm4, %v1395_v6, %v1427_v33 }
 0x1d6   :  { %v1436_v20 = vmul.f32 0.2, %v1404_v17  ;;  %v1437_v35 = vmul.f32 0.2, %v1405_v18  ;;  %v1438_v36 = vmul.f32 0.2, %v1406_v19  ;;  %v1444_v37 = vsel %vm1412_vm5, %v1396_v54, %v1428_v22 }
 0x1d7   :  { %v1439_v38 = vmul.f32 0.2, %v1407_v62  ;;  %v1440_v39 = vmul.f32 0.2, %v1408_v14  ;;  %v1441_v15 = vmul.f32 0.2, %v1409_v21  ;;  %v1445_v43 = vsel %vm1413_vm6, %v1397_v7, %v1429_v53 }
 0x1d8   :  { %v1442_v44 = vmul.f32 0.2, %v1410_v23  ;;  %v1446_v45 = vsel %vm1414_vm7, %v1398_v9, %v1430_v5  ;;  %v1447_v28 = vsel %vm1415_vm8, %v1399_v59, %v1431_v24  ;;  %v1448_v34 = vsel %vm1416_vm9, %v1400_v10, %v1432_v26 }
 0x1d9   :  { %v1449_v46 = vsel %vm1417_vm10, %v1401_v11, %v1433_v29  ;;  %v1450_v47 = vsel %vm1418_vm11, %v1402_v12, %v1434_v30  ;;  %v1451_v48 = vsel %vm1419_vm12, %v1403_v16, %v1435_v31  ;;  %v1452_v49 = vsel %vm1420_vm13, %v1404_v17, %v1436_v20 }
 0x1da   :  { %v1453_v51 = vsel %vm1421_vm14, %v1405_v18, %v1437_v35  ;;  %v1454_v32 = vsel %vm1422_vm15, %v1406_v19, %v1438_v36  ;;  %v1455_v55 = vsel %vm1423_vm0, %v1407_v62, %v1439_v38  ;;  %v1456_v56 = vsel %vm1424_vm1, %v1408_v14, %v1440_v39 }
 0x1db   :  { %v1457_v50 = vsel %vm1425_vm2, %v1409_v21, %v1441_v15  ;;  %v1458_v57 = vsel %vm1426_vm3, %v1410_v23, %v1442_v44  ;;  %v2138_v58 = vpack.c.bf16 %v1444_v37, %v1443_v8  ;;  %v2143_v63 = vpack.c.bf16 %v1446_v45, %v1445_v43 }
 0x1dc   :  { %v2148_v42 = vpack.c.bf16 %v1448_v34, %v1447_v28  ;;  %v2153_v60 = vpack.c.bf16 %v1450_v47, %v1449_v46  ;;  %v2158_v13 = vpack.c.bf16 %v1452_v49, %v1451_v48  ;;  %v2163_v0 = vpack.c.bf16 %v1454_v32, %v1453_v51 }
 0x1dd   :  { %2139 = vst [vmem:[%s2965_s2] sm:$0xff] %v2138_v58   ;;  %v2168_v27 = vpack.c.bf16 %v1456_v56, %v1455_v55  ;;  %v2173_v40 = vpack.c.bf16 %v1458_v57, %v1457_v50 }
 0x1de   :  { %2175 = vst [vmem:[%s2965_s2 + $0x8] sm:$0xff] %v2143_v63  }
 0x1df   :  { %2176 = vst [vmem:[%s2965_s2 + $0x10] sm:$0xff] %v2148_v42  }
 0x1e0   :  { %2177 = vst [vmem:[%s2965_s2 + $0x18] sm:$0xff] %v2153_v60  }
 0x1e1   :  { %2178 = vst [vmem:[%s2965_s2 + $0x20] sm:$0xff] %v2158_v13  }
 0x1e2   :  { %2179 = vst [vmem:[%s2965_s2 + $0x28] sm:$0xff] %v2163_v0  }
 0x1e3   :  { %2180 = vst [vmem:[%s2965_s2 + $0x30] sm:$0xff] %v2168_v27  }
 0x1e4   :  { %2181 = vst [vmem:[%s2965_s2 + $0x38] sm:$0xff] %v2173_v40  }

// kernel: discriminator_forward.6
= control target key start
LH: loop header
LB: loop body
LE: loop exit
PB: predicated region body
PF: predicated region fallthrough
CT: control target
= control target key end

     0   :  { %s4862_s9 = smov 0   ;;  %s4864_s10 = smov 0   ;;  %s5776_s0 = inlined_call_operand.vmem [shape: bf16[32,2048], index: 0, kind: input, shape index: {}]   ;;  %s5777_s1 = inlined_call_operand.vmem [shape: bf16[2048,256], index: 1, kind: input, shape index: {}]   ;;  %s5778_s2 = inlined_call_operand.vmem [shape: bf16[32,256], index: 2, kind: output, shape index: {}]  }
   0x1   :  { %s4866_s11 = smov 0  }
   0x2 LB: > { %s3969_s12 = sadd.s32 4294967295, %s4844_s11   ;;  %s4879_s13 = sadd.s32 1, %s4844_s11   ;;  %s4844_s11 = sphi %s4866_s11, %s5782_s11   ;;  %s4840_s10 = sphi %s4864_s10, %s5781_s10   ;;  %s4836_s9 = sphi %s4862_s9, %s5780_s9  }
   0x3   : > { %s37_s14 = ssub.s32 %s4844_s11, %s4879_s13  ;;  %s40_s15 = sadd.s32 1, %s4840_s10 }
   0x4   : > { %p38_p0 = scmp.eq.s32.totalorder %s37_s14, 0  ;;  %p47_p1 = scmp.ne.s32.totalorder %s4840_s10, %s4836_s9 }
   0x5   : > { %p48_p2 = scmp.eq.s32.totalorder %s4844_s11, 0  ;;  %p77_p3 = scmp.eq.s32.totalorder %s3969_s12, 1 }
   0x6   : > { %s4890_s16 = scalar_select %p38_p0, %s4840_s10, %s40_s15  }
   0x7   : > { %p49_p4 = por %p48_p2, %p47_p1  ;;  %p4892_p5 = por %p77_p3, %p47_p1 }
   0x8   : > { %p3972_p6 = scmp.ge.s32.totalorder %s4844_s11, 2 }
   0xa   : > { %102 = sbr.rel (%p3972_p6) target bundleno = 275 (0x113), region = 20 }
   0xf   : > { %105 = sbr.rel (!%p49_p4) target bundleno = 275 (0x113), region = 24  ;;  %s107_s18 = sand.u32 (%p49_p4), 1, %s4840_s10  }
  0x10   : > { %s3974_s19 = sshll.u32 (%p49_p4), %s4844_s11, 2  ;;  %s3973_s20 = sshll.u32 (%p49_p4), %s107_s18, 10 }
  0x11   : > { %s4902_s23 = scalar_lea.vmem (%p49_p4), %s5777_s1, %s3974_s19  ;;  %s4906_s24 = scalar_lea.vmem (%p49_p4), [#allocation2], %s3973_s20 }
  0x12   : > { %v128_v0 = vld [vmem:[%s4902_s23] sm:$0xf] (%p49_p4)  ;;  %v130_v1 = vld [vmem:[%s4902_s23 + $0x8] sm:$0xf] (%p49_p4)  ;;  %v132_v2 = vld [vmem:[%s4902_s23 + $0x10] sm:$0xf] (%p49_p4) }
  0x13   : > { %129 = vst [vmem:[%s4906_s24] sm:$0xf] (%p49_p4), %v128_v0  ;;  %v134_v3 = vld [vmem:[%s4902_s23 + $0x18] sm:$0xf] (%p49_p4)  ;;  %v136_v4 = vld [vmem:[%s4902_s23 + $0x20] sm:$0xf] (%p49_p4) }
  0x14   : > { %131 = vst [vmem:[%s4906_s24 + $0x4] sm:$0xf] %v130_v1  ;;  %v138_v5 = vld [vmem:[%s4902_s23 + $0x28] sm:$0xf]  ;;  %v140_v6 = vld [vmem:[%s4902_s23 + $0x30] sm:$0xf] }
  0x15   : > { %133 = vst [vmem:[%s4906_s24 + $0x8] sm:$0xf] %v132_v2  ;;  %v142_v7 = vld [vmem:[%s4902_s23 + $0x38] sm:$0xf]  ;;  %v144_v8 = vld [vmem:[%s4902_s23 + $0x40] sm:$0xf] }
  0x16   : > { %135 = vst [vmem:[%s4906_s24 + $0xc] sm:$0xf] %v134_v3  ;;  %v146_v9 = vld [vmem:[%s4902_s23 + $0x48] sm:$0xf]  ;;  %v148_v10 = vld [vmem:[%s4902_s23 + $0x50] sm:$0xf] }
  0x17   : > { %137 = vst [vmem:[%s4906_s24 + $0x10] sm:$0xf] %v136_v4  ;;  %v150_v11 = vld [vmem:[%s4902_s23 + $0x58] sm:$0xf]  ;;  %v152_v12 = vld [vmem:[%s4902_s23 + $0x60] sm:$0xf] }
  0x18   : > { %139 = vst [vmem:[%s4906_s24 + $0x14] sm:$0xf] %v138_v5  ;;  %v154_v13 = vld [vmem:[%s4902_s23 + $0x68] sm:$0xf]  ;;  %v156_v14 = vld [vmem:[%s4902_s23 + $0x70] sm:$0xf] }
  0x19   : > { %141 = vst [vmem:[%s4906_s24 + $0x18] sm:$0xf] %v140_v6  ;;  %v158_v15 = vld [vmem:[%s4902_s23 + $0x78] sm:$0xf]  ;;  %v160_v16 = vld [vmem:[%s4902_s23 + $0x80] sm:$0xf] }
  0x1a   : > { %143 = vst [vmem:[%s4906_s24 + $0x1c] sm:$0xf] %v142_v7  ;;  %v162_v17 = vld [vmem:[%s4902_s23 + $0x88] sm:$0xf]  ;;  %v164_v18 = vld [vmem:[%s4902_s23 + $0x90] sm:$0xf] }
  0x1b   : > { %145 = vst [vmem:[%s4906_s24 + $0x20] sm:$0xf] %v144_v8  ;;  %v166_v19 = vld [vmem:[%s4902_s23 + $0x98] sm:$0xf]  ;;  %v168_v20 = vld [vmem:[%s4902_s23 + $0xa0] sm:$0xf] }
  0x1c   : > { %147 = vst [vmem:[%s4906_s24 + $0x24] sm:$0xf] %v146_v9  ;;  %v170_v21 = vld [vmem:[%s4902_s23 + $0xa8] sm:$0xf]  ;;  %v172_v22 = vld [vmem:[%s4902_s23 + $0xb0] sm:$0xf] }
  0x1d   : > { %149 = vst [vmem:[%s4906_s24 + $0x28] sm:$0xf] %v148_v10  ;;  %v174_v23 = vld [vmem:[%s4902_s23 + $0xb8] sm:$0xf]  ;;  %v176_v24 = vld [vmem:[%s4902_s23 + $0xc0] sm:$0xf] }
  0x1e   : > { %151 = vst [vmem:[%s4906_s24 + $0x2c] sm:$0xf] %v150_v11  ;;  %v178_v25 = vld [vmem:[%s4902_s23 + $0xc8] sm:$0xf]  ;;  %v180_v26 = vld [vmem:[%s4902_s23 + $0xd0] sm:$0xf] }
  0x1f   : > { %153 = vst [vmem:[%s4906_s24 + $0x30] sm:$0xf] %v152_v12  ;;  %v182_v27 = vld [vmem:[%s4902_s23 + $0xd8] sm:$0xf]  ;;  %v184_v28 = vld [vmem:[%s4902_s23 + $0xe0] sm:$0xf] }
  0x20   : > { %155 = vst [vmem:[%s4906_s24 + $0x34] sm:$0xf] %v154_v13  ;;  %v186_v29 = vld [vmem:[%s4902_s23 + $0xe8] sm:$0xf]  ;;  %v188_v30 = vld [vmem:[%s4902_s23 + $0xf0] sm:$0xf] }
  0x21   : > { %157 = vst [vmem:[%s4906_s24 + $0x38] sm:$0xf] %v156_v14  ;;  %v190_v31 = vld [vmem:[%s4902_s23 + $0xf8] sm:$0xf]  ;;  %v192_v32 = vld [vmem:[%s4902_s23 + $0x100] sm:$0xf] }
  0x22   : > { %159 = vst [vmem:[%s4906_s24 + $0x3c] sm:$0xf] %v158_v15  ;;  %v194_v33 = vld [vmem:[%s4902_s23 + $0x108] sm:$0xf]  ;;  %v196_v34 = vld [vmem:[%s4902_s23 + $0x110] sm:$0xf] }
  0x23   : > { %161 = vst [vmem:[%s4906_s24 + $0x40] sm:$0xf] %v160_v16  ;;  %v198_v35 = vld [vmem:[%s4902_s23 + $0x118] sm:$0xf]  ;;  %v200_v36 = vld [vmem:[%s4902_s23 + $0x120] sm:$0xf] }
  0x24   : > { %163 = vst [vmem:[%s4906_s24 + $0x44] sm:$0xf] %v162_v17  ;;  %v202_v37 = vld [vmem:[%s4902_s23 + $0x128] sm:$0xf]  ;;  %v204_v38 = vld [vmem:[%s4902_s23 + $0x130] sm:$0xf] }
  0x25   : > { %165 = vst [vmem:[%s4906_s24 + $0x48] sm:$0xf] %v164_v18  ;;  %v206_v39 = vld [vmem:[%s4902_s23 + $0x138] sm:$0xf]  ;;  %v208_v40 = vld [vmem:[%s4902_s23 + $0x140] sm:$0xf] }
  0x26   : > { %167 = vst [vmem:[%s4906_s24 + $0x4c] sm:$0xf] %v166_v19  ;;  %v210_v41 = vld [vmem:[%s4902_s23 + $0x148] sm:$0xf]  ;;  %v212_v42 = vld [vmem:[%s4902_s23 + $0x150] sm:$0xf] }
  0x27   : > { %169 = vst [vmem:[%s4906_s24 + $0x50] sm:$0xf] %v168_v20  ;;  %v214_v43 = vld [vmem:[%s4902_s23 + $0x158] sm:$0xf]  ;;  %v216_v44 = vld [vmem:[%s4902_s23 + $0x160] sm:$0xf] }
  0x28   : > { %171 = vst [vmem:[%s4906_s24 + $0x54] sm:$0xf] %v170_v21  ;;  %v218_v45 = vld [vmem:[%s4902_s23 + $0x168] sm:$0xf]  ;;  %v220_v46 = vld [vmem:[%s4902_s23 + $0x170] sm:$0xf] }
  0x29   : > { %173 = vst [vmem:[%s4906_s24 + $0x58] sm:$0xf] %v172_v22  ;;  %v222_v47 = vld [vmem:[%s4902_s23 + $0x178] sm:$0xf]  ;;  %v224_v48 = vld [vmem:[%s4902_s23 + $0x180] sm:$0xf] }
  0x2a   : > { %175 = vst [vmem:[%s4906_s24 + $0x5c] sm:$0xf] %v174_v23  ;;  %v226_v49 = vld [vmem:[%s4902_s23 + $0x188] sm:$0xf]  ;;  %v228_v50 = vld [vmem:[%s4902_s23 + $0x190] sm:$0xf] }
  0x2b   : > { %177 = vst [vmem:[%s4906_s24 + $0x60] sm:$0xf] %v176_v24  ;;  %v230_v51 = vld [vmem:[%s4902_s23 + $0x198] sm:$0xf]  ;;  %v232_v52 = vld [vmem:[%s4902_s23 + $0x1a0] sm:$0xf] }
  0x2c   : > { %179 = vst [vmem:[%s4906_s24 + $0x64] sm:$0xf] %v178_v25  ;;  %v234_v53 = vld [vmem:[%s4902_s23 + $0x1a8] sm:$0xf]  ;;  %v236_v54 = vld [vmem:[%s4902_s23 + $0x1b0] sm:$0xf] }
  0x2d   : > { %181 = vst [vmem:[%s4906_s24 + $0x68] sm:$0xf] %v180_v26  ;;  %v238_v55 = vld [vmem:[%s4902_s23 + $0x1b8] sm:$0xf]  ;;  %v240_v56 = vld [vmem:[%s4902_s23 + $0x1c0] sm:$0xf] }
  0x2e   : > { %183 = vst [vmem:[%s4906_s24 + $0x6c] sm:$0xf] %v182_v27  ;;  %v242_v57 = vld [vmem:[%s4902_s23 + $0x1c8] sm:$0xf]  ;;  %v244_v58 = vld [vmem:[%s4902_s23 + $0x1d0] sm:$0xf] }
  0x2f   : > { %185 = vst [vmem:[%s4906_s24 + $0x70] sm:$0xf] %v184_v28  ;;  %v246_v59 = vld [vmem:[%s4902_s23 + $0x1d8] sm:$0xf]  ;;  %v248_v60 = vld [vmem:[%s4902_s23 + $0x1e0] sm:$0xf] }
  0x30   : > { %187 = vst [vmem:[%s4906_s24 + $0x74] sm:$0xf] %v186_v29  ;;  %v250_v61 = vld [vmem:[%s4902_s23 + $0x1e8] sm:$0xf]  ;;  %v252_v62 = vld [vmem:[%s4902_s23 + $0x1f0] sm:$0xf] }
  0x31   : > { %189 = vst [vmem:[%s4906_s24 + $0x78] sm:$0xf] %v188_v30  ;;  %v254_v63 = vld [vmem:[%s4902_s23 + $0x1f8] sm:$0xf]  ;;  %v256_v0 = vld [vmem:[%s4902_s23 + $0x200] sm:$0xf] }
  0x32   : > { %191 = vst [vmem:[%s4906_s24 + $0x7c] sm:$0xf] %v190_v31  ;;  %v258_v1 = vld [vmem:[%s4902_s23 + $0x208] sm:$0xf]  ;;  %v260_v2 = vld [vmem:[%s4902_s23 + $0x210] sm:$0xf] }
  0x33   : > { %193 = vst [vmem:[%s4906_s24 + $0x80] sm:$0xf] %v192_v32  ;;  %v262_v3 = vld [vmem:[%s4902_s23 + $0x218] sm:$0xf]  ;;  %v264_v4 = vld [vmem:[%s4902_s23 + $0x220] sm:$0xf] }
  0x34   : > { %195 = vst [vmem:[%s4906_s24 + $0x84] sm:$0xf] %v194_v33  ;;  %v266_v5 = vld [vmem:[%s4902_s23 + $0x228] sm:$0xf]  ;;  %v268_v6 = vld [vmem:[%s4902_s23 + $0x230] sm:$0xf] }
  0x35   : > { %197 = vst [vmem:[%s4906_s24 + $0x88] sm:$0xf] %v196_v34  ;;  %v270_v7 = vld [vmem:[%s4902_s23 + $0x238] sm:$0xf]  ;;  %v272_v8 = vld [vmem:[%s4902_s23 + $0x240] sm:$0xf] }
  0x36   : > { %199 = vst [vmem:[%s4906_s24 + $0x8c] sm:$0xf] %v198_v35  ;;  %v274_v9 = vld [vmem:[%s4902_s23 + $0x248] sm:$0xf]  ;;  %v276_v10 = vld [vmem:[%s4902_s23 + $0x250] sm:$0xf] }
  0x37   : > { %201 = vst [vmem:[%s4906_s24 + $0x90] sm:$0xf] %v200_v36  ;;  %v278_v11 = vld [vmem:[%s4902_s23 + $0x258] sm:$0xf]  ;;  %v280_v12 = vld [vmem:[%s4902_s23 + $0x260] sm:$0xf] }
  0x38   : > { %203 = vst [vmem:[%s4906_s24 + $0x94] sm:$0xf] %v202_v37  ;;  %v282_v13 = vld [vmem:[%s4902_s23 + $0x268] sm:$0xf]  ;;  %v284_v14 = vld [vmem:[%s4902_s23 + $0x270] sm:$0xf] }
  0x39   : > { %205 = vst [vmem:[%s4906_s24 + $0x98] sm:$0xf] %v204_v38  ;;  %v286_v15 = vld [vmem:[%s4902_s23 + $0x278] sm:$0xf]  ;;  %v288_v16 = vld [vmem:[%s4902_s23 + $0x280] sm:$0xf] }
  0x3a   : > { %207 = vst [vmem:[%s4906_s24 + $0x9c] sm:$0xf] %v206_v39  ;;  %v290_v17 = vld [vmem:[%s4902_s23 + $0x288] sm:$0xf]  ;;  %v292_v18 = vld [vmem:[%s4902_s23 + $0x290] sm:$0xf] }
  0x3b   : > { %209 = vst [vmem:[%s4906_s24 + $0xa0] sm:$0xf] %v208_v40  ;;  %v294_v19 = vld [vmem:[%s4902_s23 + $0x298] sm:$0xf]  ;;  %v296_v20 = vld [vmem:[%s4902_s23 + $0x2a0] sm:$0xf] }
  0x3c   : > { %211 = vst [vmem:[%s4906_s24 + $0xa4] sm:$0xf] %v210_v41  ;;  %v298_v21 = vld [vmem:[%s4902_s23 + $0x2a8] sm:$0xf]  ;;  %v300_v22 = vld [vmem:[%s4902_s23 + $0x2b0] sm:$0xf] }
  0x3d   : > { %213 = vst [vmem:[%s4906_s24 + $0xa8] sm:$0xf] %v212_v42  ;;  %v302_v23 = vld [vmem:[%s4902_s23 + $0x2b8] sm:$0xf]  ;;  %v304_v24 = vld [vmem:[%s4902_s23 + $0x2c0] sm:$0xf] }
  0x3e   : > { %215 = vst [vmem:[%s4906_s24 + $0xac] sm:$0xf] %v214_v43  ;;  %v306_v25 = vld [vmem:[%s4902_s23 + $0x2c8] sm:$0xf]  ;;  %v308_v26 = vld [vmem:[%s4902_s23 + $0x2d0] sm:$0xf] }
  0x3f   : > { %217 = vst [vmem:[%s4906_s24 + $0xb0] sm:$0xf] %v216_v44  ;;  %v310_v27 = vld [vmem:[%s4902_s23 + $0x2d8] sm:$0xf]  ;;  %v312_v28 = vld [vmem:[%s4902_s23 + $0x2e0] sm:$0xf] }
  0x40   : > { %219 = vst [vmem:[%s4906_s24 + $0xb4] sm:$0xf] %v218_v45  ;;  %v314_v29 = vld [vmem:[%s4902_s23 + $0x2e8] sm:$0xf]  ;;  %v316_v30 = vld [vmem:[%s4902_s23 + $0x2f0] sm:$0xf] }
  0x41   : > { %221 = vst [vmem:[%s4906_s24 + $0xb8] sm:$0xf] %v220_v46  ;;  %v318_v31 = vld [vmem:[%s4902_s23 + $0x2f8] sm:$0xf]  ;;  %v320_v32 = vld [vmem:[%s4902_s23 + $0x300] sm:$0xf] }
  0x42   : > { %223 = vst [vmem:[%s4906_s24 + $0xbc] sm:$0xf] %v222_v47  ;;  %v322_v33 = vld [vmem:[%s4902_s23 + $0x308] sm:$0xf]  ;;  %v324_v34 = vld [vmem:[%s4902_s23 + $0x310] sm:$0xf] }
  0x43   : > { %225 = vst [vmem:[%s4906_s24 + $0xc0] sm:$0xf] %v224_v48  ;;  %v326_v35 = vld [vmem:[%s4902_s23 + $0x318] sm:$0xf]  ;;  %v328_v36 = vld [vmem:[%s4902_s23 + $0x320] sm:$0xf] }
  0x44   : > { %227 = vst [vmem:[%s4906_s24 + $0xc4] sm:$0xf] %v226_v49  ;;  %v330_v37 = vld [vmem:[%s4902_s23 + $0x328] sm:$0xf]  ;;  %v332_v38 = vld [vmem:[%s4902_s23 + $0x330] sm:$0xf] }
  0x45   : > { %229 = vst [vmem:[%s4906_s24 + $0xc8] sm:$0xf] %v228_v50  ;;  %v334_v39 = vld [vmem:[%s4902_s23 + $0x338] sm:$0xf]  ;;  %v336_v40 = vld [vmem:[%s4902_s23 + $0x340] sm:$0xf] }
  0x46   : > { %231 = vst [vmem:[%s4906_s24 + $0xcc] sm:$0xf] %v230_v51  ;;  %v338_v41 = vld [vmem:[%s4902_s23 + $0x348] sm:$0xf]  ;;  %v340_v42 = vld [vmem:[%s4902_s23 + $0x350] sm:$0xf] }
  0x47   : > { %233 = vst [vmem:[%s4906_s24 + $0xd0] sm:$0xf] %v232_v52  ;;  %v342_v43 = vld [vmem:[%s4902_s23 + $0x358] sm:$0xf]  ;;  %v344_v44 = vld [vmem:[%s4902_s23 + $0x360] sm:$0xf] }
  0x48   : > { %235 = vst [vmem:[%s4906_s24 + $0xd4] sm:$0xf] %v234_v53  ;;  %v346_v45 = vld [vmem:[%s4902_s23 + $0x368] sm:$0xf]  ;;  %v348_v46 = vld [vmem:[%s4902_s23 + $0x370] sm:$0xf] }
  0x49   : > { %237 = vst [vmem:[%s4906_s24 + $0xd8] sm:$0xf] %v236_v54  ;;  %v350_v47 = vld [vmem:[%s4902_s23 + $0x378] sm:$0xf]  ;;  %v352_v48 = vld [vmem:[%s4902_s23 + $0x380] sm:$0xf] }
  0x4a   : > { %239 = vst [vmem:[%s4906_s24 + $0xdc] sm:$0xf] %v238_v55  ;;  %v354_v49 = vld [vmem:[%s4902_s23 + $0x388] sm:$0xf]  ;;  %v356_v50 = vld [vmem:[%s4902_s23 + $0x390] sm:$0xf] }
  0x4b   : > { %241 = vst [vmem:[%s4906_s24 + $0xe0] sm:$0xf] %v240_v56  ;;  %v358_v51 = vld [vmem:[%s4902_s23 + $0x398] sm:$0xf]  ;;  %v360_v52 = vld [vmem:[%s4902_s23 + $0x3a0] sm:$0xf] }
  0x4c   : > { %243 = vst [vmem:[%s4906_s24 + $0xe4] sm:$0xf] %v242_v57  ;;  %v362_v53 = vld [vmem:[%s4902_s23 + $0x3a8] sm:$0xf]  ;;  %v364_v54 = vld [vmem:[%s4902_s23 + $0x3b0] sm:$0xf] }
  0x4d   : > { %245 = vst [vmem:[%s4906_s24 + $0xe8] sm:$0xf] %v244_v58  ;;  %v366_v55 = vld [vmem:[%s4902_s23 + $0x3b8] sm:$0xf]  ;;  %v368_v56 = vld [vmem:[%s4902_s23 + $0x3c0] sm:$0xf] }
  0x4e   : > { %247 = vst [vmem:[%s4906_s24 + $0xec] sm:$0xf] %v246_v59  ;;  %v370_v57 = vld [vmem:[%s4902_s23 + $0x3c8] sm:$0xf]  ;;  %v372_v58 = vld [vmem:[%s4902_s23 + $0x3d0] sm:$0xf] }
  0x4f   : > { %249 = vst [vmem:[%s4906_s24 + $0xf0] sm:$0xf] %v248_v60  ;;  %v374_v59 = vld [vmem:[%s4902_s23 + $0x3d8] sm:$0xf]  ;;  %v376_v60 = vld [vmem:[%s4902_s23 + $0x3e0] sm:$0xf] }
  0x50   : > { %251 = vst [vmem:[%s4906_s24 + $0xf4] sm:$0xf] %v250_v61  ;;  %v378_v61 = vld [vmem:[%s4902_s23 + $0x3e8] sm:$0xf] }
  0x51   : > { %253 = vst [vmem:[%s4906_s24 + $0xf8] sm:$0xf] %v252_v62  ;;  %v380_v62 = vld [vmem:[%s4902_s23 + $0x3f0] sm:$0xf] }
  0x52   : > { %255 = vst [vmem:[%s4906_s24 + $0xfc] sm:$0xf] %v254_v63  ;;  %v382_v63 = vld [vmem:[%s4902_s23 + $0x3f8] sm:$0xf] }
  0x53   : > { %257 = vst [vmem:[%s4906_s24 + $0x100] sm:$0xf] %v256_v0  ;;  %v384_v0 = vld [vmem:[%s4902_s23 + $0x400] sm:$0xf] }
  0x54   : > { %259 = vst [vmem:[%s4906_s24 + $0x104] sm:$0xf] %v258_v1  ;;  %v386_v1 = vld [vmem:[%s4902_s23 + $0x408] sm:$0xf] }
  0x55   : > { %261 = vst [vmem:[%s4906_s24 + $0x108] sm:$0xf] %v260_v2  ;;  %v388_v2 = vld [vmem:[%s4902_s23 + $0x410] sm:$0xf] }
  0x56   : > { %263 = vst [vmem:[%s4906_s24 + $0x10c] sm:$0xf] %v262_v3  ;;  %v390_v3 = vld [vmem:[%s4902_s23 + $0x418] sm:$0xf] }
  0x57   : > { %265 = vst [vmem:[%s4906_s24 + $0x110] sm:$0xf] %v264_v4  ;;  %v392_v4 = vld [vmem:[%s4902_s23 + $0x420] sm:$0xf] }
  0x58   : > { %267 = vst [vmem:[%s4906_s24 + $0x114] sm:$0xf] %v266_v5  ;;  %v394_v5 = vld [vmem:[%s4902_s23 + $0x428] sm:$0xf] }
  0x59   : > { %269 = vst [vmem:[%s4906_s24 + $0x118] sm:$0xf] %v268_v6  ;;  %v396_v6 = vld [vmem:[%s4902_s23 + $0x430] sm:$0xf] }
  0x5a   : > { %271 = vst [vmem:[%s4906_s24 + $0x11c] sm:$0xf] %v270_v7  ;;  %v398_v7 = vld [vmem:[%s4902_s23 + $0x438] sm:$0xf] }
  0x5b   : > { %273 = vst [vmem:[%s4906_s24 + $0x120] sm:$0xf] %v272_v8  ;;  %v400_v8 = vld [vmem:[%s4902_s23 + $0x440] sm:$0xf] }
  0x5c   : > { %275 = vst [vmem:[%s4906_s24 + $0x124] sm:$0xf] %v274_v9  ;;  %v402_v9 = vld [vmem:[%s4902_s23 + $0x448] sm:$0xf] }
  0x5d   : > { %277 = vst [vmem:[%s4906_s24 + $0x128] sm:$0xf] %v276_v10  ;;  %v404_v10 = vld [vmem:[%s4902_s23 + $0x450] sm:$0xf] }
  0x5e   : > { %279 = vst [vmem:[%s4906_s24 + $0x12c] sm:$0xf] %v278_v11  ;;  %v406_v11 = vld [vmem:[%s4902_s23 + $0x458] sm:$0xf] }
  0x5f   : > { %281 = vst [vmem:[%s4906_s24 + $0x130] sm:$0xf] %v280_v12  ;;  %v408_v12 = vld [vmem:[%s4902_s23 + $0x460] sm:$0xf] }
  0x60   : > { %283 = vst [vmem:[%s4906_s24 + $0x134] sm:$0xf] %v282_v13  ;;  %v410_v13 = vld [vmem:[%s4902_s23 + $0x468] sm:$0xf] }
  0x61   : > { %285 = vst [vmem:[%s4906_s24 + $0x138] sm:$0xf] %v284_v14  ;;  %v412_v14 = vld [vmem:[%s4902_s23 + $0x470] sm:$0xf] }
  0x62   : > { %287 = vst [vmem:[%s4906_s24 + $0x13c] sm:$0xf] %v286_v15  ;;  %v414_v15 = vld [vmem:[%s4902_s23 + $0x478] sm:$0xf] }
  0x63   : > { %289 = vst [vmem:[%s4906_s24 + $0x140] sm:$0xf] %v288_v16  ;;  %v416_v16 = vld [vmem:[%s4902_s23 + $0x480] sm:$0xf] }
  0x64   : > { %291 = vst [vmem:[%s4906_s24 + $0x144] sm:$0xf] %v290_v17  ;;  %v418_v17 = vld [vmem:[%s4902_s23 + $0x488] sm:$0xf] }
  0x65   : > { %293 = vst [vmem:[%s4906_s24 + $0x148] sm:$0xf] %v292_v18  ;;  %v420_v18 = vld [vmem:[%s4902_s23 + $0x490] sm:$0xf] }
  0x66   : > { %295 = vst [vmem:[%s4906_s24 + $0x14c] sm:$0xf] %v294_v19  ;;  %v422_v19 = vld [vmem:[%s4902_s23 + $0x498] sm:$0xf] }
  0x67   : > { %297 = vst [vmem:[%s4906_s24 + $0x150] sm:$0xf] %v296_v20  ;;  %v424_v20 = vld [vmem:[%s4902_s23 + $0x4a0] sm:$0xf] }
  0x68   : > { %299 = vst [vmem:[%s4906_s24 + $0x154] sm:$0xf] %v298_v21  ;;  %v426_v21 = vld [vmem:[%s4902_s23 + $0x4a8] sm:$0xf] }
  0x69   : > { %301 = vst [vmem:[%s4906_s24 + $0x158] sm:$0xf] %v300_v22  ;;  %v428_v22 = vld [vmem:[%s4902_s23 + $0x4b0] sm:$0xf] }
  0x6a   : > { %303 = vst [vmem:[%s4906_s24 + $0x15c] sm:$0xf] %v302_v23  ;;  %v430_v23 = vld [vmem:[%s4902_s23 + $0x4b8] sm:$0xf] }
  0x6b   : > { %305 = vst [vmem:[%s4906_s24 + $0x160] sm:$0xf] %v304_v24  ;;  %v432_v24 = vld [vmem:[%s4902_s23 + $0x4c0] sm:$0xf] }
  0x6c   : > { %307 = vst [vmem:[%s4906_s24 + $0x164] sm:$0xf] %v306_v25  ;;  %v434_v25 = vld [vmem:[%s4902_s23 + $0x4c8] sm:$0xf] }
  0x6d   : > { %309 = vst [vmem:[%s4906_s24 + $0x168] sm:$0xf] %v308_v26  ;;  %v436_v26 = vld [vmem:[%s4902_s23 + $0x4d0] sm:$0xf] }
  0x6e   : > { %311 = vst [vmem:[%s4906_s24 + $0x16c] sm:$0xf] %v310_v27  ;;  %v438_v27 = vld [vmem:[%s4902_s23 + $0x4d8] sm:$0xf] }
  0x6f   : > { %313 = vst [vmem:[%s4906_s24 + $0x170] sm:$0xf] %v312_v28  ;;  %v440_v28 = vld [vmem:[%s4902_s23 + $0x4e0] sm:$0xf] }
  0x70   : > { %315 = vst [vmem:[%s4906_s24 + $0x174] sm:$0xf] %v314_v29  ;;  %v442_v29 = vld [vmem:[%s4902_s23 + $0x4e8] sm:$0xf] }
  0x71   : > { %317 = vst [vmem:[%s4906_s24 + $0x178] sm:$0xf] %v316_v30  ;;  %v444_v30 = vld [vmem:[%s4902_s23 + $0x4f0] sm:$0xf] }
  0x72   : > { %319 = vst [vmem:[%s4906_s24 + $0x17c] sm:$0xf] %v318_v31  ;;  %v446_v31 = vld [vmem:[%s4902_s23 + $0x4f8] sm:$0xf] }
  0x73   : > { %321 = vst [vmem:[%s4906_s24 + $0x180] sm:$0xf] %v320_v32  ;;  %v448_v32 = vld [vmem:[%s4902_s23 + $0x500] sm:$0xf] }
  0x74   : > { %323 = vst [vmem:[%s4906_s24 + $0x184] sm:$0xf] %v322_v33  ;;  %v450_v33 = vld [vmem:[%s4902_s23 + $0x508] sm:$0xf] }
  0x75   : > { %325 = vst [vmem:[%s4906_s24 + $0x188] sm:$0xf] %v324_v34  ;;  %v452_v34 = vld [vmem:[%s4902_s23 + $0x510] sm:$0xf] }
  0x76   : > { %327 = vst [vmem:[%s4906_s24 + $0x18c] sm:$0xf] %v326_v35  ;;  %v454_v35 = vld [vmem:[%s4902_s23 + $0x518] sm:$0xf] }
  0x77   : > { %329 = vst [vmem:[%s4906_s24 + $0x190] sm:$0xf] %v328_v36  ;;  %v456_v36 = vld [vmem:[%s4902_s23 + $0x520] sm:$0xf] }
  0x78   : > { %331 = vst [vmem:[%s4906_s24 + $0x194] sm:$0xf] %v330_v37  ;;  %v458_v37 = vld [vmem:[%s4902_s23 + $0x528] sm:$0xf] }
  0x79   : > { %333 = vst [vmem:[%s4906_s24 + $0x198] sm:$0xf] %v332_v38  ;;  %v460_v38 = vld [vmem:[%s4902_s23 + $0x530] sm:$0xf] }
  0x7a   : > { %335 = vst [vmem:[%s4906_s24 + $0x19c] sm:$0xf] %v334_v39  ;;  %v462_v39 = vld [vmem:[%s4902_s23 + $0x538] sm:$0xf] }
  0x7b   : > { %337 = vst [vmem:[%s4906_s24 + $0x1a0] sm:$0xf] %v336_v40  ;;  %v464_v40 = vld [vmem:[%s4902_s23 + $0x540] sm:$0xf] }
  0x7c   : > { %339 = vst [vmem:[%s4906_s24 + $0x1a4] sm:$0xf] %v338_v41  ;;  %v466_v41 = vld [vmem:[%s4902_s23 + $0x548] sm:$0xf] }
  0x7d   : > { %341 = vst [vmem:[%s4906_s24 + $0x1a8] sm:$0xf] %v340_v42  ;;  %v468_v42 = vld [vmem:[%s4902_s23 + $0x550] sm:$0xf] }
  0x7e   : > { %343 = vst [vmem:[%s4906_s24 + $0x1ac] sm:$0xf] %v342_v43  ;;  %v470_v43 = vld [vmem:[%s4902_s23 + $0x558] sm:$0xf] }
  0x7f   : > { %345 = vst [vmem:[%s4906_s24 + $0x1b0] sm:$0xf] %v344_v44  ;;  %v472_v44 = vld [vmem:[%s4902_s23 + $0x560] sm:$0xf] }
  0x80   : > { %347 = vst [vmem:[%s4906_s24 + $0x1b4] sm:$0xf] %v346_v45  ;;  %v474_v45 = vld [vmem:[%s4902_s23 + $0x568] sm:$0xf] }
  0x81   : > { %349 = vst [vmem:[%s4906_s24 + $0x1b8] sm:$0xf] %v348_v46  ;;  %v476_v46 = vld [vmem:[%s4902_s23 + $0x570] sm:$0xf] }
  0x82   : > { %351 = vst [vmem:[%s4906_s24 + $0x1bc] sm:$0xf] %v350_v47  ;;  %v478_v47 = vld [vmem:[%s4902_s23 + $0x578] sm:$0xf] }
  0x83   : > { %353 = vst [vmem:[%s4906_s24 + $0x1c0] sm:$0xf] %v352_v48  ;;  %v480_v48 = vld [vmem:[%s4902_s23 + $0x580] sm:$0xf] }
  0x84   : > { %355 = vst [vmem:[%s4906_s24 + $0x1c4] sm:$0xf] %v354_v49  ;;  %v482_v49 = vld [vmem:[%s4902_s23 + $0x588] sm:$0xf] }
  0x85   : > { %357 = vst [vmem:[%s4906_s24 + $0x1c8] sm:$0xf] %v356_v50  ;;  %v484_v50 = vld [vmem:[%s4902_s23 + $0x590] sm:$0xf] }
  0x86   : > { %359 = vst [vmem:[%s4906_s24 + $0x1cc] sm:$0xf] %v358_v51  ;;  %v486_v51 = vld [vmem:[%s4902_s23 + $0x598] sm:$0xf] }
  0x87   : > { %361 = vst [vmem:[%s4906_s24 + $0x1d0] sm:$0xf] %v360_v52  ;;  %v488_v52 = vld [vmem:[%s4902_s23 + $0x5a0] sm:$0xf] }
  0x88   : > { %363 = vst [vmem:[%s4906_s24 + $0x1d4] sm:$0xf] %v362_v53  ;;  %v490_v53 = vld [vmem:[%s4902_s23 + $0x5a8] sm:$0xf] }
  0x89   : > { %365 = vst [vmem:[%s4906_s24 + $0x1d8] sm:$0xf] %v364_v54  ;;  %v492_v54 = vld [vmem:[%s4902_s23 + $0x5b0] sm:$0xf] }
  0x8a   : > { %367 = vst [vmem:[%s4906_s24 + $0x1dc] sm:$0xf] %v366_v55  ;;  %v494_v55 = vld [vmem:[%s4902_s23 + $0x5b8] sm:$0xf] }
  0x8b   : > { %369 = vst [vmem:[%s4906_s24 + $0x1e0] sm:$0xf] %v368_v56  ;;  %v496_v56 = vld [vmem:[%s4902_s23 + $0x5c0] sm:$0xf] }
  0x8c   : > { %371 = vst [vmem:[%s4906_s24 + $0x1e4] sm:$0xf] %v370_v57  ;;  %v498_v57 = vld [vmem:[%s4902_s23 + $0x5c8] sm:$0xf] }
  0x8d   : > { %373 = vst [vmem:[%s4906_s24 + $0x1e8] sm:$0xf] %v372_v58  ;;  %v500_v58 = vld [vmem:[%s4902_s23 + $0x5d0] sm:$0xf] }
  0x8e   : > { %375 = vst [vmem:[%s4906_s24 + $0x1ec] sm:$0xf] %v374_v59  ;;  %v502_v59 = vld [vmem:[%s4902_s23 + $0x5d8] sm:$0xf] }
  0x8f   : > { %377 = vst [vmem:[%s4906_s24 + $0x1f0] sm:$0xf] %v376_v60  ;;  %v504_v60 = vld [vmem:[%s4902_s23 + $0x5e0] sm:$0xf] }
  0x90   : > { %379 = vst [vmem:[%s4906_s24 + $0x1f4] sm:$0xf] %v378_v61  ;;  %v506_v61 = vld [vmem:[%s4902_s23 + $0x5e8] sm:$0xf] }
  0x91   : > { %381 = vst [vmem:[%s4906_s24 + $0x1f8] sm:$0xf] %v380_v62  ;;  %v508_v62 = vld [vmem:[%s4902_s23 + $0x5f0] sm:$0xf] }
  0x92   : > { %383 = vst [vmem:[%s4906_s24 + $0x1fc] sm:$0xf] %v382_v63  ;;  %v510_v63 = vld [vmem:[%s4902_s23 + $0x5f8] sm:$0xf] }
  0x93   : > { %385 = vst [vmem:[%s4906_s24 + $0x200] sm:$0xf] %v384_v0  ;;  %v512_v0 = vld [vmem:[%s4902_s23 + $0x600] sm:$0xf] }
  0x94   : > { %387 = vst [vmem:[%s4906_s24 + $0x204] sm:$0xf] %v386_v1  ;;  %v514_v1 = vld [vmem:[%s4902_s23 + $0x608] sm:$0xf] }
  0x95   : > { %389 = vst [vmem:[%s4906_s24 + $0x208] sm:$0xf] %v388_v2  ;;  %v516_v2 = vld [vmem:[%s4902_s23 + $0x610] sm:$0xf] }
  0x96   : > { %391 = vst [vmem:[%s4906_s24 + $0x20c] sm:$0xf] %v390_v3  ;;  %v518_v3 = vld [vmem:[%s4902_s23 + $0x618] sm:$0xf] }
  0x97   : > { %393 = vst [vmem:[%s4906_s24 + $0x210] sm:$0xf] %v392_v4  ;;  %v520_v4 = vld [vmem:[%s4902_s23 + $0x620] sm:$0xf] }
  0x98   : > { %395 = vst [vmem:[%s4906_s24 + $0x214] sm:$0xf] %v394_v5  ;;  %v522_v5 = vld [vmem:[%s4902_s23 + $0x628] sm:$0xf] }
  0x99   : > { %397 = vst [vmem:[%s4906_s24 + $0x218] sm:$0xf] %v396_v6  ;;  %v524_v6 = vld [vmem:[%s4902_s23 + $0x630] sm:$0xf] }
  0x9a   : > { %399 = vst [vmem:[%s4906_s24 + $0x21c] sm:$0xf] %v398_v7  ;;  %v526_v7 = vld [vmem:[%s4902_s23 + $0x638] sm:$0xf] }
  0x9b   : > { %401 = vst [vmem:[%s4906_s24 + $0x220] sm:$0xf] %v400_v8  ;;  %v528_v8 = vld [vmem:[%s4902_s23 + $0x640] sm:$0xf] }
  0x9c   : > { %403 = vst [vmem:[%s4906_s24 + $0x224] sm:$0xf] %v402_v9  ;;  %v530_v9 = vld [vmem:[%s4902_s23 + $0x648] sm:$0xf] }
  0x9d   : > { %405 = vst [vmem:[%s4906_s24 + $0x228] sm:$0xf] %v404_v10  ;;  %v532_v10 = vld [vmem:[%s4902_s23 + $0x650] sm:$0xf] }
  0x9e   : > { %407 = vst [vmem:[%s4906_s24 + $0x22c] sm:$0xf] %v406_v11  ;;  %v534_v11 = vld [vmem:[%s4902_s23 + $0x658] sm:$0xf] }
  0x9f   : > { %409 = vst [vmem:[%s4906_s24 + $0x230] sm:$0xf] %v408_v12  ;;  %v536_v12 = vld [vmem:[%s4902_s23 + $0x660] sm:$0xf] }
  0xa0   : > { %411 = vst [vmem:[%s4906_s24 + $0x234] sm:$0xf] %v410_v13  ;;  %v538_v13 = vld [vmem:[%s4902_s23 + $0x668] sm:$0xf] }
  0xa1   : > { %413 = vst [vmem:[%s4906_s24 + $0x238] sm:$0xf] %v412_v14  ;;  %v540_v14 = vld [vmem:[%s4902_s23 + $0x670] sm:$0xf] }
  0xa2   : > { %415 = vst [vmem:[%s4906_s24 + $0x23c] sm:$0xf] %v414_v15  ;;  %v542_v15 = vld [vmem:[%s4902_s23 + $0x678] sm:$0xf] }
  0xa3   : > { %417 = vst [vmem:[%s4906_s24 + $0x240] sm:$0xf] %v416_v16  ;;  %v544_v16 = vld [vmem:[%s4902_s23 + $0x680] sm:$0xf] }
  0xa4   : > { %419 = vst [vmem:[%s4906_s24 + $0x244] sm:$0xf] %v418_v17  ;;  %v546_v17 = vld [vmem:[%s4902_s23 + $0x688] sm:$0xf] }
  0xa5   : > { %421 = vst [vmem:[%s4906_s24 + $0x248] sm:$0xf] %v420_v18  ;;  %v548_v18 = vld [vmem:[%s4902_s23 + $0x690] sm:$0xf] }
  0xa6   : > { %423 = vst [vmem:[%s4906_s24 + $0x24c] sm:$0xf] %v422_v19  ;;  %v550_v19 = vld [vmem:[%s4902_s23 + $0x698] sm:$0xf] }
  0xa7   : > { %425 = vst [vmem:[%s4906_s24 + $0x250] sm:$0xf] %v424_v20  ;;  %v552_v20 = vld [vmem:[%s4902_s23 + $0x6a0] sm:$0xf] }
  0xa8   : > { %427 = vst [vmem:[%s4906_s24 + $0x254] sm:$0xf] %v426_v21  ;;  %v554_v21 = vld [vmem:[%s4902_s23 + $0x6a8] sm:$0xf] }
  0xa9   : > { %429 = vst [vmem:[%s4906_s24 + $0x258] sm:$0xf] %v428_v22  ;;  %v556_v22 = vld [vmem:[%s4902_s23 + $0x6b0] sm:$0xf] }
  0xaa   : > { %431 = vst [vmem:[%s4906_s24 + $0x25c] sm:$0xf] %v430_v23  ;;  %v558_v23 = vld [vmem:[%s4902_s23 + $0x6b8] sm:$0xf] }
  0xab   : > { %433 = vst [vmem:[%s4906_s24 + $0x260] sm:$0xf] %v432_v24  ;;  %v560_v24 = vld [vmem:[%s4902_s23 + $0x6c0] sm:$0xf] }
  0xac   : > { %435 = vst [vmem:[%s4906_s24 + $0x264] sm:$0xf] %v434_v25  ;;  %v562_v25 = vld [vmem:[%s4902_s23 + $0x6c8] sm:$0xf] }
  0xad   : > { %437 = vst [vmem:[%s4906_s24 + $0x268] sm:$0xf] %v436_v26  ;;  %v564_v26 = vld [vmem:[%s4902_s23 + $0x6d0] sm:$0xf] }
  0xae   : > { %439 = vst [vmem:[%s4906_s24 + $0x26c] sm:$0xf] %v438_v27  ;;  %v566_v27 = vld [vmem:[%s4902_s23 + $0x6d8] sm:$0xf] }
  0xaf   : > { %441 = vst [vmem:[%s4906_s24 + $0x270] sm:$0xf] %v440_v28  ;;  %v568_v28 = vld [vmem:[%s4902_s23 + $0x6e0] sm:$0xf] }
  0xb0   : > { %443 = vst [vmem:[%s4906_s24 + $0x274] sm:$0xf] %v442_v29  ;;  %v570_v29 = vld [vmem:[%s4902_s23 + $0x6e8] sm:$0xf] }
  0xb1   : > { %445 = vst [vmem:[%s4906_s24 + $0x278] sm:$0xf] %v444_v30  ;;  %v572_v30 = vld [vmem:[%s4902_s23 + $0x6f0] sm:$0xf] }
  0xb2   : > { %447 = vst [vmem:[%s4906_s24 + $0x27c] sm:$0xf] %v446_v31  ;;  %v574_v31 = vld [vmem:[%s4902_s23 + $0x6f8] sm:$0xf] }
  0xb3   : > { %449 = vst [vmem:[%s4906_s24 + $0x280] sm:$0xf] %v448_v32  ;;  %v576_v32 = vld [vmem:[%s4902_s23 + $0x700] sm:$0xf] }
  0xb4   : > { %451 = vst [vmem:[%s4906_s24 + $0x284] sm:$0xf] %v450_v33  ;;  %v578_v33 = vld [vmem:[%s4902_s23 + $0x708] sm:$0xf] }
  0xb5   : > { %453 = vst [vmem:[%s4906_s24 + $0x288] sm:$0xf] %v452_v34  ;;  %v580_v34 = vld [vmem:[%s4902_s23 + $0x710] sm:$0xf] }
  0xb6   : > { %455 = vst [vmem:[%s4906_s24 + $0x28c] sm:$0xf] %v454_v35  ;;  %v582_v35 = vld [vmem:[%s4902_s23 + $0x718] sm:$0xf] }
  0xb7   : > { %457 = vst [vmem:[%s4906_s24 + $0x290] sm:$0xf] %v456_v36  ;;  %v584_v36 = vld [vmem:[%s4902_s23 + $0x720] sm:$0xf] }
  0xb8   : > { %459 = vst [vmem:[%s4906_s24 + $0x294] sm:$0xf] %v458_v37  ;;  %v586_v37 = vld [vmem:[%s4902_s23 + $0x728] sm:$0xf] }
  0xb9   : > { %461 = vst [vmem:[%s4906_s24 + $0x298] sm:$0xf] %v460_v38  ;;  %v588_v38 = vld [vmem:[%s4902_s23 + $0x730] sm:$0xf] }
  0xba   : > { %463 = vst [vmem:[%s4906_s24 + $0x29c] sm:$0xf] %v462_v39  ;;  %v590_v39 = vld [vmem:[%s4902_s23 + $0x738] sm:$0xf] }
  0xbb   : > { %465 = vst [vmem:[%s4906_s24 + $0x2a0] sm:$0xf] %v464_v40  ;;  %v592_v40 = vld [vmem:[%s4902_s23 + $0x740] sm:$0xf] }
  0xbc   : > { %467 = vst [vmem:[%s4906_s24 + $0x2a4] sm:$0xf] %v466_v41  ;;  %v594_v41 = vld [vmem:[%s4902_s23 + $0x748] sm:$0xf] }
  0xbd   : > { %469 = vst [vmem:[%s4906_s24 + $0x2a8] sm:$0xf] %v468_v42  ;;  %v596_v42 = vld [vmem:[%s4902_s23 + $0x750] sm:$0xf] }
  0xbe   : > { %471 = vst [vmem:[%s4906_s24 + $0x2ac] sm:$0xf] %v470_v43  ;;  %v598_v43 = vld [vmem:[%s4902_s23 + $0x758] sm:$0xf] }
  0xbf   : > { %473 = vst [vmem:[%s4906_s24 + $0x2b0] sm:$0xf] %v472_v44  ;;  %v600_v44 = vld [vmem:[%s4902_s23 + $0x760] sm:$0xf] }
  0xc0   : > { %475 = vst [vmem:[%s4906_s24 + $0x2b4] sm:$0xf] %v474_v45  ;;  %v602_v45 = vld [vmem:[%s4902_s23 + $0x768] sm:$0xf] }
  0xc1   : > { %477 = vst [vmem:[%s4906_s24 + $0x2b8] sm:$0xf] %v476_v46  ;;  %v604_v46 = vld [vmem:[%s4902_s23 + $0x770] sm:$0xf] }
  0xc2   : > { %479 = vst [vmem:[%s4906_s24 + $0x2bc] sm:$0xf] %v478_v47  ;;  %v606_v47 = vld [vmem:[%s4902_s23 + $0x778] sm:$0xf] }
  0xc3   : > { %481 = vst [vmem:[%s4906_s24 + $0x2c0] sm:$0xf] %v480_v48  ;;  %v608_v48 = vld [vmem:[%s4902_s23 + $0x780] sm:$0xf] }
  0xc4   : > { %483 = vst [vmem:[%s4906_s24 + $0x2c4] sm:$0xf] %v482_v49  ;;  %v610_v49 = vld [vmem:[%s4902_s23 + $0x788] sm:$0xf] }
  0xc5   : > { %485 = vst [vmem:[%s4906_s24 + $0x2c8] sm:$0xf] %v484_v50  ;;  %v612_v50 = vld [vmem:[%s4902_s23 + $0x790] sm:$0xf] }
  0xc6   : > { %487 = vst [vmem:[%s4906_s24 + $0x2cc] sm:$0xf] %v486_v51  ;;  %v614_v51 = vld [vmem:[%s4902_s23 + $0x798] sm:$0xf] }
  0xc7   : > { %489 = vst [vmem:[%s4906_s24 + $0x2d0] sm:$0xf] %v488_v52  ;;  %v616_v52 = vld [vmem:[%s4902_s23 + $0x7a0] sm:$0xf] }
  0xc8   : > { %491 = vst [vmem:[%s4906_s24 + $0x2d4] sm:$0xf] %v490_v53  ;;  %v618_v53 = vld [vmem:[%s4902_s23 + $0x7a8] sm:$0xf] }
  0xc9   : > { %493 = vst [vmem:[%s4906_s24 + $0x2d8] sm:$0xf] %v492_v54  ;;  %v620_v54 = vld [vmem:[%s4902_s23 + $0x7b0] sm:$0xf] }
  0xca   : > { %495 = vst [vmem:[%s4906_s24 + $0x2dc] sm:$0xf] %v494_v55  ;;  %v622_v55 = vld [vmem:[%s4902_s23 + $0x7b8] sm:$0xf] }
  0xcb   : > { %497 = vst [vmem:[%s4906_s24 + $0x2e0] sm:$0xf] %v496_v56  ;;  %v624_v56 = vld [vmem:[%s4902_s23 + $0x7c0] sm:$0xf] }
  0xcc   : > { %499 = vst [vmem:[%s4906_s24 + $0x2e4] sm:$0xf] %v498_v57  ;;  %v626_v57 = vld [vmem:[%s4902_s23 + $0x7c8] sm:$0xf] }
  0xcd   : > { %501 = vst [vmem:[%s4906_s24 + $0x2e8] sm:$0xf] %v500_v58  ;;  %v628_v58 = vld [vmem:[%s4902_s23 + $0x7d0] sm:$0xf] }
  0xce   : > { %503 = vst [vmem:[%s4906_s24 + $0x2ec] sm:$0xf] %v502_v59  ;;  %v630_v59 = vld [vmem:[%s4902_s23 + $0x7d8] sm:$0xf] }
  0xcf   : > { %505 = vst [vmem:[%s4906_s24 + $0x2f0] sm:$0xf] %v504_v60  ;;  %v632_v60 = vld [vmem:[%s4902_s23 + $0x7e0] sm:$0xf] }
  0xd0   : > { %507 = vst [vmem:[%s4906_s24 + $0x2f4] sm:$0xf] %v506_v61  ;;  %v634_v61 = vld [vmem:[%s4902_s23 + $0x7e8] sm:$0xf] }
  0xd1   : > { %509 = vst [vmem:[%s4906_s24 + $0x2f8] sm:$0xf] %v508_v62  ;;  %v636_v62 = vld [vmem:[%s4902_s23 + $0x7f0] sm:$0xf] }
  0xd2   : > { %511 = vst [vmem:[%s4906_s24 + $0x2fc] sm:$0xf] %v510_v63  ;;  %v638_v63 = vld [vmem:[%s4902_s23 + $0x7f8] sm:$0xf] }
  0xd3   : > { %513 = vst [vmem:[%s4906_s24 + $0x300] sm:$0xf] %v512_v0 }
  0xd4   : > { %515 = vst [vmem:[%s4906_s24 + $0x304] sm:$0xf] %v514_v1 }
  0xd5   : > { %517 = vst [vmem:[%s4906_s24 + $0x308] sm:$0xf] %v516_v2 }
  0xd6   : > { %519 = vst [vmem:[%s4906_s24 + $0x30c] sm:$0xf] %v518_v3 }
  0xd7   : > { %521 = vst [vmem:[%s4906_s24 + $0x310] sm:$0xf] %v520_v4 }
  0xd8   : > { %523 = vst [vmem:[%s4906_s24 + $0x314] sm:$0xf] %v522_v5 }
  0xd9   : > { %525 = vst [vmem:[%s4906_s24 + $0x318] sm:$0xf] %v524_v6 }
  0xda   : > { %527 = vst [vmem:[%s4906_s24 + $0x31c] sm:$0xf] %v526_v7 }
  0xdb   : > { %529 = vst [vmem:[%s4906_s24 + $0x320] sm:$0xf] %v528_v8 }
  0xdc   : > { %531 = vst [vmem:[%s4906_s24 + $0x324] sm:$0xf] %v530_v9 }
  0xdd   : > { %533 = vst [vmem:[%s4906_s24 + $0x328] sm:$0xf] %v532_v10 }
  0xde   : > { %535 = vst [vmem:[%s4906_s24 + $0x32c] sm:$0xf] %v534_v11 }
  0xdf   : > { %537 = vst [vmem:[%s4906_s24 + $0x330] sm:$0xf] %v536_v12 }
  0xe0   : > { %539 = vst [vmem:[%s4906_s24 + $0x334] sm:$0xf] %v538_v13 }
  0xe1   : > { %541 = vst [vmem:[%s4906_s24 + $0x338] sm:$0xf] %v540_v14 }
  0xe2   : > { %543 = vst [vmem:[%s4906_s24 + $0x33c] sm:$0xf] %v542_v15 }
  0xe3   : > { %545 = vst [vmem:[%s4906_s24 + $0x340] sm:$0xf] %v544_v16 }
  0xe4   : > { %547 = vst [vmem:[%s4906_s24 + $0x344] sm:$0xf] %v546_v17 }
  0xe5   : > { %549 = vst [vmem:[%s4906_s24 + $0x348] sm:$0xf] %v548_v18 }
  0xe6   : > { %551 = vst [vmem:[%s4906_s24 + $0x34c] sm:$0xf] %v550_v19 }
  0xe7   : > { %553 = vst [vmem:[%s4906_s24 + $0x350] sm:$0xf] %v552_v20 }
  0xe8   : > { %555 = vst [vmem:[%s4906_s24 + $0x354] sm:$0xf] %v554_v21 }
  0xe9   : > { %557 = vst [vmem:[%s4906_s24 + $0x358] sm:$0xf] %v556_v22 }
  0xea   : > { %559 = vst [vmem:[%s4906_s24 + $0x35c] sm:$0xf] %v558_v23 }
  0xeb   : > { %561 = vst [vmem:[%s4906_s24 + $0x360] sm:$0xf] %v560_v24 }
  0xec   : > { %563 = vst [vmem:[%s4906_s24 + $0x364] sm:$0xf] %v562_v25 }
  0xed   : > { %565 = vst [vmem:[%s4906_s24 + $0x368] sm:$0xf] %v564_v26 }
  0xee   : > { %567 = vst [vmem:[%s4906_s24 + $0x36c] sm:$0xf] %v566_v27 }
  0xef   : > { %569 = vst [vmem:[%s4906_s24 + $0x370] sm:$0xf] %v568_v28 }
  0xf0   : > { %571 = vst [vmem:[%s4906_s24 + $0x374] sm:$0xf] %v570_v29 }
  0xf1   : > { %573 = vst [vmem:[%s4906_s24 + $0x378] sm:$0xf] %v572_v30 }
  0xf2   : > { %575 = vst [vmem:[%s4906_s24 + $0x37c] sm:$0xf] %v574_v31 }
  0xf3   : > { %577 = vst [vmem:[%s4906_s24 + $0x380] sm:$0xf] %v576_v32 }
  0xf4   : > { %579 = vst [vmem:[%s4906_s24 + $0x384] sm:$0xf] %v578_v33 }
  0xf5   : > { %581 = vst [vmem:[%s4906_s24 + $0x388] sm:$0xf] %v580_v34 }
  0xf6   : > { %583 = vst [vmem:[%s4906_s24 + $0x38c] sm:$0xf] %v582_v35 }
  0xf7   : > { %585 = vst [vmem:[%s4906_s24 + $0x390] sm:$0xf] %v584_v36 }
  0xf8   : > { %587 = vst [vmem:[%s4906_s24 + $0x394] sm:$0xf] %v586_v37 }
  0xf9   : > { %589 = vst [vmem:[%s4906_s24 + $0x398] sm:$0xf] %v588_v38 }
  0xfa   : > { %591 = vst [vmem:[%s4906_s24 + $0x39c] sm:$0xf] %v590_v39 }
  0xfb   : > { %593 = vst [vmem:[%s4906_s24 + $0x3a0] sm:$0xf] %v592_v40 }
  0xfc   : > { %595 = vst [vmem:[%s4906_s24 + $0x3a4] sm:$0xf] %v594_v41 }
  0xfd   : > { %597 = vst [vmem:[%s4906_s24 + $0x3a8] sm:$0xf] %v596_v42 }
  0xfe   : > { %599 = vst [vmem:[%s4906_s24 + $0x3ac] sm:$0xf] %v598_v43 }
  0xff   : > { %601 = vst [vmem:[%s4906_s24 + $0x3b0] sm:$0xf] %v600_v44 }
 0x100   : > { %603 = vst [vmem:[%s4906_s24 + $0x3b4] sm:$0xf] %v602_v45 }
 0x101   : > { %605 = vst [vmem:[%s4906_s24 + $0x3b8] sm:$0xf] %v604_v46 }
 0x102   : > { %607 = vst [vmem:[%s4906_s24 + $0x3bc] sm:$0xf] %v606_v47 }
 0x103   : > { %609 = vst [vmem:[%s4906_s24 + $0x3c0] sm:$0xf] %v608_v48 }
 0x104   : > { %611 = vst [vmem:[%s4906_s24 + $0x3c4] sm:$0xf] %v610_v49 }
 0x105   : > { %613 = vst [vmem:[%s4906_s24 + $0x3c8] sm:$0xf] %v612_v50 }
 0x106   : > { %615 = vst [vmem:[%s4906_s24 + $0x3cc] sm:$0xf] %v614_v51 }
 0x107   : > { %617 = vst [vmem:[%s4906_s24 + $0x3d0] sm:$0xf] %v616_v52 }
 0x108   : > { %619 = vst [vmem:[%s4906_s24 + $0x3d4] sm:$0xf] %v618_v53 }
 0x109   : > { %621 = vst [vmem:[%s4906_s24 + $0x3d8] sm:$0xf] %v620_v54 }
 0x10a   : > { %623 = vst [vmem:[%s4906_s24 + $0x3dc] sm:$0xf] %v622_v55 }
 0x10b   : > { %625 = vst [vmem:[%s4906_s24 + $0x3e0] sm:$0xf] %v624_v56 }
 0x10c   : > { %627 = vst [vmem:[%s4906_s24 + $0x3e4] sm:$0xf] %v626_v57 }
 0x10d   : > { %629 = vst [vmem:[%s4906_s24 + $0x3e8] sm:$0xf] %v628_v58 }
 0x10e   : > { %631 = vst [vmem:[%s4906_s24 + $0x3ec] sm:$0xf] %v630_v59 }
 0x10f   : > { %633 = vst [vmem:[%s4906_s24 + $0x3f0] sm:$0xf] %v632_v60 }
 0x110   : > { %635 = vst [vmem:[%s4906_s24 + $0x3f4] sm:$0xf] %v634_v61 }
 0x111   : > { %637 = vst [vmem:[%s4906_s24 + $0x3f8] sm:$0xf] %v636_v62 }
 0x112   : > { %639 = vst [vmem:[%s4906_s24 + $0x3fc] sm:$0xf] %v638_v63 }
 0x113 PF: > { %p3975_p7 = scmp.ge.s32.totalorder %s4844_s11, 1  ;;  %p2224_p8 = scmp.lt.s32.totalorder %s4844_s11, 3 }
 0x115   : > { %p2225_p9 = pnand %p3975_p7, %p2224_p8 }
 0x116   : > { %s2231_s25 = sand.u32 (!%p2225_p9), 1, %s4836_s9  }
 0x117   : > { %2228 = sbr.rel (%p2225_p9) target bundleno = 634 (0x27a), region = 76  ;;  %s3976_s26 = sshll.u32 (!%p2225_p9), %s2231_s25, 10 }
 0x118   : > { %s5423_s27 = scalar_lea.vmem (!%p2225_p9), [#allocation2], %s3976_s26  ;;  %s3977_s19 = sshll.u32 (!%p2225_p9), %s2231_s25, 4 }
 0x119   : > { %s2250_s20 = scalar_lea.vmem (!%p2225_p9), [#allocation3], %s3977_s19 }
 0x11c   : > { %v4661_v0 = vld [vmem:[%s5423_s27 + $0x38] sm:$0xff]  ;;  %v4660_v4 = vld [vmem:[%s5423_s27 + $0x30] sm:$0xff]  ;;  %v4659_v8 = vld [vmem:[%s5423_s27 + $0x28] sm:$0xff]  ;;  %s4619_s9 = sshll.u32 (%p4892_p5), %s3969_s12, 2 }
 0x11d   : > { %v4669_v1 = vld [vmem:[%s5423_s27 + $0x78] sm:$0xff]  ;;  %3467 = vmatpush.bf16.msra.mxu0 %v4661_v0  ;;  %v4668_v5 = vld [vmem:[%s5423_s27 + $0x70] sm:$0xff]  ;;  %v4667_v9 = vld [vmem:[%s5423_s27 + $0x68] sm:$0xff]  ;;  %s3851_s22 = scalar_lea.vmem (%p4892_p5), %s5778_s2, %s4619_s9 }
 0x11e   : > { %v4677_v2 = vld [vmem:[%s5423_s27 + $0xb8] sm:$0xff]  ;;  %3486 = vmatpush.bf16.msra.mxu1 %v4669_v1  ;;  %v4676_v6 = vld [vmem:[%s5423_s27 + $0xb0] sm:$0xff]  ;;  %v4675_v10 = vld [vmem:[%s5423_s27 + $0xa8] sm:$0xff] }
 0x11f   : > { %v4685_v3 = vld [vmem:[%s5423_s27 + $0xf8] sm:$0xff]  ;;  %3505 = vmatpush.bf16.msra.mxu2 %v4677_v2  ;;  %v4684_v7 = vld [vmem:[%s5423_s27 + $0xf0] sm:$0xff]  ;;  %v4683_v11 = vld [vmem:[%s5423_s27 + $0xe8] sm:$0xff] }
 0x120   : > { %3524 = vmatpush.bf16.msra.mxu3 %v4685_v3  ;;  %v4658_v12 = vld [vmem:[%s5423_s27 + $0x20] sm:$0xff]  ;;  %v4657_v16 = vld [vmem:[%s5423_s27 + $0x18] sm:$0xff]  ;;  %v4656_v20 = vld [vmem:[%s5423_s27 + $0x10] sm:$0xff] }
 0x121   : > { %3468 = vmatpush.bf16.msra.mxu0 %v4660_v4  ;;  %v4666_v13 = vld [vmem:[%s5423_s27 + $0x60] sm:$0xff]  ;;  %v4665_v17 = vld [vmem:[%s5423_s27 + $0x58] sm:$0xff]  ;;  %v4664_v21 = vld [vmem:[%s5423_s27 + $0x50] sm:$0xff] }
 0x122   : > { %3487 = vmatpush.bf16.msra.mxu1 %v4668_v5  ;;  %v4674_v14 = vld [vmem:[%s5423_s27 + $0xa0] sm:$0xff]  ;;  %v4673_v18 = vld [vmem:[%s5423_s27 + $0x98] sm:$0xff]  ;;  %v4672_v22 = vld [vmem:[%s5423_s27 + $0x90] sm:$0xff] }
 0x123   : > { %3506 = vmatpush.bf16.msra.mxu2 %v4676_v6  ;;  %v4682_v15 = vld [vmem:[%s5423_s27 + $0xe0] sm:$0xff]  ;;  %v4681_v19 = vld [vmem:[%s5423_s27 + $0xd8] sm:$0xff]  ;;  %v4680_v23 = vld [vmem:[%s5423_s27 + $0xd0] sm:$0xff] }
 0x124   : > { %3525 = vmatpush.bf16.msra.mxu3 %v4684_v7  ;;  %v4655_v24 = vld [vmem:[%s5423_s27 + $0x8] sm:$0xff]  ;;  %v4654_v28 = vld [vmem:[%s5423_s27] sm:$0xff]  ;;  %v4709_v40 = vld [vmem:[%s5423_s27 + $0x1b8] sm:$0xff] }
 0x125   : > { %3469 = vmatpush.bf16.msra.mxu0 %v4659_v8  ;;  %v4663_v25 = vld [vmem:[%s5423_s27 + $0x48] sm:$0xff]  ;;  %v3980_v29 = vld [vmem:[%s5776_s0] sm:$0xf]  ;;  %v4622_v34 = vld [vmem:[%s5776_s0 + $0x4] sm:$0xf] }
 0x126   : > { %3488 = vmatpush.bf16.msra.mxu1 %v4667_v9  ;;  %v4671_v26 = vld [vmem:[%s5423_s27 + $0x88] sm:$0xff]  ;;  %v4630_v30 = vld [vmem:[%s5776_s0 + $0x3c] sm:$0xf0]  ;;  %v3982_v35 = vld [vmem:[%s5776_s0 + $0x40] sm:$0xf0] }
 0x127   : > { %3507 = vmatpush.bf16.msra.mxu2 %v4675_v10  ;;  %v4679_v27 = vld [vmem:[%s5423_s27 + $0xc8] sm:$0xff]  ;;  %v4662_v31 = vld [vmem:[%s5423_s27 + $0x40] sm:$0xff]  ;;  %v4693_v41 = vld [vmem:[%s5423_s27 + $0x138] sm:$0xff]  ;;  %v3981_v42 = vor.u32 %v4630_v30, %v3980_v29  ;;  %v3985_v43 = vor.u32 %v4622_v34, %v3982_v35 }
 0x128   : > { %3526 = vmatpush.bf16.msra.mxu3 %v4683_v11  ;;  %v4670_v32 = vld [vmem:[%s5423_s27 + $0x80] sm:$0xff]  ;;  %v3988_v36 = vld [vmem:[%s5776_s0 + $0x8] sm:$0xf]  ;;  %v4623_v38 = vld [vmem:[%s5776_s0 + $0xc] sm:$0xf] }
 0x129   : > { %3470 = vmatpush.bf16.msra.mxu0 %v4658_v12  ;;  %v4678_v33 = vld [vmem:[%s5423_s27 + $0xc0] sm:$0xff]  ;;  %v4631_v37 = vld [vmem:[%s5776_s0 + $0x44] sm:$0xf0]  ;;  %v3990_v39 = vld [vmem:[%s5776_s0 + $0x48] sm:$0xf0] }
 0x12a   : > { %3489 = vmatpush.bf16.msra.mxu1 %v4666_v13  ;;  %v3989_v44 = vor.u32 %v4631_v37, %v3988_v36  ;;  %v3993_v45 = vor.u32 %v4623_v38, %v3990_v39  ;;  %v4701_v46 = vld [vmem:[%s5423_s27 + $0x178] sm:$0xff]  ;;  %v4708_v48 = vld [vmem:[%s5423_s27 + $0x1b0] sm:$0xff]  ;;  %v4707_v52 = vld [vmem:[%s5423_s27 + $0x1a8] sm:$0xff] }
 0x12b   : > { %3508 = vmatpush.bf16.msra.mxu2 %v4674_v14  ;;  %v4717_v47 = vld [vmem:[%s5423_s27 + $0x1f8] sm:$0xff]  ;;  %v4692_v49 = vld [vmem:[%s5423_s27 + $0x130] sm:$0xff]  ;;  %v4691_v53 = vld [vmem:[%s5423_s27 + $0x128] sm:$0xff] }
 0x12c   : > { %3527 = vmatpush.bf16.msra.mxu3 %v4682_v15  ;;  %v4700_v50 = vld [vmem:[%s5423_s27 + $0x170] sm:$0xff]  ;;  %v4699_v54 = vld [vmem:[%s5423_s27 + $0x168] sm:$0xff]  ;;  %v4706_v56 = vld [vmem:[%s5423_s27 + $0x1a0] sm:$0xff] }
 0x12d   : > { %3471 = vmatpush.bf16.msra.mxu0 %v4657_v16  ;;  %v4716_v51 = vld [vmem:[%s5423_s27 + $0x1f0] sm:$0xff]  ;;  %v4715_v55 = vld [vmem:[%s5423_s27 + $0x1e8] sm:$0xff]  ;;  %v4690_v57 = vld [vmem:[%s5423_s27 + $0x120] sm:$0xff] }
 0x12e   : > { %3490 = vmatpush.bf16.msra.mxu1 %v4665_v17  ;;  %v4698_v58 = vld [vmem:[%s5423_s27 + $0x160] sm:$0xff]  ;;  %v4052_v0 = vld [vmem:[%s5776_s0 + $0x88] sm:$0xf]  ;;  %v4639_v2 = vld [vmem:[%s5776_s0 + $0x8c] sm:$0xf] }
 0x12f   : > { %3509 = vmatpush.bf16.msra.mxu2 %v4673_v18  ;;  %v4714_v59 = vld [vmem:[%s5423_s27 + $0x1e0] sm:$0xff]  ;;  %v4647_v1 = vld [vmem:[%s5776_s0 + $0xc4] sm:$0xf0]  ;;  %v4054_v3 = vld [vmem:[%s5776_s0 + $0xc8] sm:$0xf0] }
 0x130   : > { %3528 = vmatpush.bf16.msra.mxu3 %v4681_v19  ;;  %v4044_v60 = vld [vmem:[%s5776_s0 + $0x80] sm:$0xf]  ;;  %v4638_v62 = vld [vmem:[%s5776_s0 + $0x84] sm:$0xf]  ;;  %v4705_v4 = vld [vmem:[%s5423_s27 + $0x198] sm:$0xff]  ;;  %v4053_v8 = vor.u32 %v4647_v1, %v4052_v0  ;;  %v4057_v9 = vor.u32 %v4639_v2, %v4054_v3 }
 0x131   : > { %3472 = vmatpush.bf16.msra.mxu0 %v4656_v20  ;;  %v4646_v61 = vld [vmem:[%s5776_s0 + $0xbc] sm:$0xf0]  ;;  %v4046_v63 = vld [vmem:[%s5776_s0 + $0xc0] sm:$0xf0]  ;;  %v4689_v5 = vld [vmem:[%s5423_s27 + $0x118] sm:$0xff] }
 0x132   : > { %3491 = vmatpush.bf16.msra.mxu1 %v4664_v21  ;;  %v4045_v6 = vor.u32 %v4646_v61, %v4044_v60  ;;  %v4049_v7 = vor.u32 %v4638_v62, %v4046_v63  ;;  %v4697_v10 = vld [vmem:[%s5423_s27 + $0x158] sm:$0xff]  ;;  %v4704_v12 = vld [vmem:[%s5423_s27 + $0x190] sm:$0xff]  ;;  %v4703_v16 = vld [vmem:[%s5423_s27 + $0x188] sm:$0xff] }
 0x133   : > { %3510 = vmatpush.bf16.msra.mxu2 %v4672_v22  ;;  %v4713_v11 = vld [vmem:[%s5423_s27 + $0x1d8] sm:$0xff]  ;;  %v4688_v13 = vld [vmem:[%s5423_s27 + $0x110] sm:$0xff]  ;;  %v4687_v17 = vld [vmem:[%s5423_s27 + $0x108] sm:$0xff] }
 0x134   : > { %3529 = vmatpush.bf16.msra.mxu3 %v4680_v23  ;;  %v4696_v14 = vld [vmem:[%s5423_s27 + $0x150] sm:$0xff]  ;;  %v4695_v18 = vld [vmem:[%s5423_s27 + $0x148] sm:$0xff]  ;;  %v4702_v20 = vld [vmem:[%s5423_s27 + $0x180] sm:$0xff] }
 0x135   : > { %3473 = vmatpush.bf16.msra.mxu0 %v4655_v24  ;;  %v4712_v15 = vld [vmem:[%s5423_s27 + $0x1d0] sm:$0xff]  ;;  %v4711_v19 = vld [vmem:[%s5423_s27 + $0x1c8] sm:$0xff]  ;;  %v4686_v21 = vld [vmem:[%s5423_s27 + $0x100] sm:$0xff] }
 0x136   : > { %3492 = vmatpush.bf16.msra.mxu1 %v4663_v25  ;;  %v4694_v22 = vld [vmem:[%s5423_s27 + $0x140] sm:$0xff]  ;;  %v3996_v24 = vld [vmem:[%s5776_s0 + $0x10] sm:$0xf]  ;;  %v4741_v25 = vld [vmem:[%s5423_s27 + $0x2b8] sm:$0xff] }
 0x137   : > { %3511 = vmatpush.bf16.msra.mxu2 %v4671_v26  ;;  %v4710_v23 = vld [vmem:[%s5423_s27 + $0x1c0] sm:$0xff]  ;;  %v4725_v26 = vld [vmem:[%s5423_s27 + $0x238] sm:$0xff]  ;;  %v3998_v29 = vld [vmem:[%s5776_s0 + $0x50] sm:$0xf0] }
 0x138   : > { %3530 = vmatpush.bf16.msra.mxu3 %v4679_v27  ;;  %v4632_v27 = vld [vmem:[%s5776_s0 + $0x4c] sm:$0xf0]  ;;  %v4004_v30 = vld [vmem:[%s5776_s0 + $0x18] sm:$0xf]  ;;  %v4070_v61 = vld [vmem:[%s5776_s0 + $0xd8] sm:$0xf0] }
 0x139   : > { %3474 = vmatpush.bf16.msra.mxu0 %v4654_v28  ;;  %v4624_v28 = vld [vmem:[%s5776_s0 + $0x14] sm:$0xf]  ;;  %v4733_v34 = vld [vmem:[%s5423_s27 + $0x278] sm:$0xff]  ;;  %v3997_v36 = vor.u32 %v4632_v27, %v3996_v24  ;;  %v4014_v24 = vld [vmem:[%s5776_s0 + $0x60] sm:$0xf0] }
 0x13a   : > { %3493 = vmatpush.bf16.msra.mxu1 %v4662_v31  ;;  %v4633_v31 = vld [vmem:[%s5776_s0 + $0x54] sm:$0xf0]  ;;  %v4740_v37 = vld [vmem:[%s5423_s27 + $0x2b0] sm:$0xff]  ;;  %v4001_v38 = vor.u32 %v4624_v28, %v3998_v29  ;;  %v4627_v27 = vld [vmem:[%s5776_s0 + $0x2c] sm:$0xf] }
 0x13b   : > { %3512 = vmatpush.bf16.msra.mxu2 %v4670_v32  ;;  %v4625_v32 = vld [vmem:[%s5776_s0 + $0x1c] sm:$0xf]  ;;  %v4005_v39 = vor.u32 %v4633_v31, %v4004_v30  ;;  %v4736_v1 = vld [vmem:[%s5423_s27 + $0x290] sm:$0xff]  ;;  %v4022_v28 = vld [vmem:[%s5776_s0 + $0x68] sm:$0xf0] }
 0x13c   : > { %3531 = vmatpush.bf16.msra.mxu3 %v4678_v33  ;;  %3475 = vmatmul.bf16.vlgmr.msra.gmra.mxu0 %v3981_v42  ;;  %v4006_v33 = vld [vmem:[%s5776_s0 + $0x58] sm:$0xf0]  ;;  %v4732_v42 = vld [vmem:[%s5423_s27 + $0x270] sm:$0xff] }
 0x13d   : > { %3543 = vmatpush.bf16.msrb.mxu0 %v4693_v41  ;;  %3494 = vmatmul.bf16.vlgmr.msra.gmra.mxu1 %v3985_v43  ;;  %v4749_v35 = vld [vmem:[%s5423_s27 + $0x2f8] sm:$0xff]  ;;  %v4724_v41 = vld [vmem:[%s5423_s27 + $0x230] sm:$0xff] }
 0x13e   : > { %3513 = vmatmul.bf16.vlgmr.msra.gmra.mxu2 %v3989_v44  ;;  %3562 = vmatpush.bf16.msrb.mxu1 %v4701_v46  ;;  %v4748_v43 = vld [vmem:[%s5423_s27 + $0x2f0] sm:$0xff]  ;;  %v4739_v44 = vld [vmem:[%s5423_s27 + $0x2a8] sm:$0xff]  ;;  %v4721_v60 = vld [vmem:[%s5423_s27 + $0x218] sm:$0xff] }
 0x13f   : > { %3581 = vmatpush.bf16.msrb.mxu2 %v4709_v40  ;;  %3532 = vmatmul.bf16.vlgmr.msra.gmra.mxu3 %v3993_v45  ;;  %v4009_v40 = vor.u32 %v4625_v32, %v4006_v33  ;;  %v4723_v45 = vld [vmem:[%s5423_s27 + $0x228] sm:$0xff]  ;;  %v4729_v62 = vld [vmem:[%s5423_s27 + $0x258] sm:$0xff]  ;;  %v4764_v30 = vld [vmem:[%s5423_s27 + $0x370] sm:$0xff]  ;;  %v4025_v33 = vor.u32 %v4627_v27, %v4022_v28 }
 0x140   : > { %3600 = vmatpush.bf16.msrb.mxu3 %v4717_v47  ;;  %v4731_v46 = vld [vmem:[%s5423_s27 + $0x268] sm:$0xff]  ;;  %v4745_v63 = vld [vmem:[%s5423_s27 + $0x2d8] sm:$0xff] }
 0x141   : > { %3544 = vmatpush.bf16.msrb.mxu0 %v4692_v49  ;;  %v4747_v47 = vld [vmem:[%s5423_s27 + $0x2e8] sm:$0xff]  ;;  %v4722_v49 = vld [vmem:[%s5423_s27 + $0x220] sm:$0xff]  ;;  %v4102_v27 = vld [vmem:[%s5776_s0 + $0xf8] sm:$0xf0] }
 0x142   : > { %3563 = vmatpush.bf16.msrb.mxu1 %v4700_v50  ;;  %v4730_v50 = vld [vmem:[%s5423_s27 + $0x260] sm:$0xff] }
 0x143   : > { %3582 = vmatpush.bf16.msrb.mxu2 %v4708_v48  ;;  %v4738_v48 = vld [vmem:[%s5423_s27 + $0x2a0] sm:$0xff] }
 0x144   : > { %3601 = vmatpush.bf16.msrb.mxu3 %v4716_v51  ;;  %v4746_v51 = vld [vmem:[%s5423_s27 + $0x2e0] sm:$0xff] }
 0x145   : > { %3545 = vmatpush.bf16.msrb.mxu0 %v4691_v53  ;;  %v4648_v53 = vld [vmem:[%s5776_s0 + $0xcc] sm:$0xf0] }
 0x146   : > { %3564 = vmatpush.bf16.msrb.mxu1 %v4699_v54  ;;  %v4737_v54 = vld [vmem:[%s5423_s27 + $0x298] sm:$0xff] }
 0x147   : > { %3583 = vmatpush.bf16.msrb.mxu2 %v4707_v52  ;;  %v4060_v52 = vld [vmem:[%s5776_s0 + $0x90] sm:$0xf] }
 0x148   : > { %3602 = vmatpush.bf16.msrb.mxu3 %v4715_v55  ;;  %v4640_v55 = vld [vmem:[%s5776_s0 + $0x94] sm:$0xf]  ;;  %v4061_v0 = vor.u32 %v4648_v53, %v4060_v52  ;;  %v4643_v52 = vld [vmem:[%s5776_s0 + $0xac] sm:$0xf]  ;;  %v4753_v53 = vld [vmem:[%s5423_s27 + $0x318] sm:$0xff] }
 0x149   : > { %3546 = vmatpush.bf16.msrb.mxu0 %v4690_v57  ;;  %v4068_v57 = vld [vmem:[%s5776_s0 + $0x98] sm:$0xf] }
 0x14a   : > { %3565 = vmatpush.bf16.msrb.mxu1 %v4698_v58  ;;  %v4649_v58 = vld [vmem:[%s5776_s0 + $0xd4] sm:$0xf0] }
 0x14b   : > { %3584 = vmatpush.bf16.msrb.mxu2 %v4706_v56  ;;  %v4062_v56 = vld [vmem:[%s5776_s0 + $0xd0] sm:$0xf0]  ;;  %v4069_v3 = vor.u32 %v4649_v58, %v4068_v57 }
 0x14c   : > { %3603 = vmatpush.bf16.msrb.mxu3 %v4714_v59  ;;  %3480 = vmatmul.bf16.gmra.mxu0 %v4045_v6  ;;  %v4641_v59 = vld [vmem:[%s5776_s0 + $0x9c] sm:$0xf]  ;;  %v4065_v2 = vor.u32 %v4640_v55, %v4062_v56  ;;  %v4728_v6 = vld [vmem:[%s5423_s27 + $0x250] sm:$0xff] }
 0x14d   : > { %3547 = vmatpush.bf16.msrb.mxu0 %v4689_v5  ;;  %3499 = vmatmul.bf16.gmra.mxu1 %v4049_v7  ;;  %v4720_v5 = vld [vmem:[%s5423_s27 + $0x210] sm:$0xff]  ;;  %v4777_v55 = vld [vmem:[%s5423_s27 + $0x3d8] sm:$0xff] }
 0x14e   : > { %3518 = vmatmul.bf16.gmra.mxu2 %v4053_v8  ;;  %3566 = vmatpush.bf16.msrb.mxu1 %v4697_v10  ;;  %v4744_v7 = vld [vmem:[%s5423_s27 + $0x2d0] sm:$0xff]  ;;  %v4735_v8 = vld [vmem:[%s5423_s27 + $0x288] sm:$0xff] }
 0x14f   : > { %3585 = vmatpush.bf16.msrb.mxu2 %v4705_v4  ;;  %3537 = vmatmul.bf16.gmra.mxu3 %v4057_v9  ;;  %v4073_v4 = vor.u32 %v4641_v59, %v4070_v61  ;;  %v4719_v9 = vld [vmem:[%s5423_s27 + $0x208] sm:$0xff]  ;;  %v4768_v56 = vld [vmem:[%s5423_s27 + $0x390] sm:$0xff] }
 0x150   : > { %3604 = vmatpush.bf16.msrb.mxu3 %v4713_v11  ;;  %v4727_v10 = vld [vmem:[%s5423_s27 + $0x248] sm:$0xff]  ;;  %v4760_v58 = vld [vmem:[%s5423_s27 + $0x350] sm:$0xff] }
 0x151   : > { %3548 = vmatpush.bf16.msrb.mxu0 %v4688_v13  ;;  %v4743_v11 = vld [vmem:[%s5423_s27 + $0x2c8] sm:$0xff]  ;;  %v4773_v13 = vld [vmem:[%s5423_s27 + $0x3b8] sm:$0xff] }
 0x152   : > { %3567 = vmatpush.bf16.msrb.mxu1 %v4696_v14  ;;  %v4718_v14 = vld [vmem:[%s5423_s27 + $0x200] sm:$0xff] }
 0x153   : > { %3586 = vmatpush.bf16.msrb.mxu2 %v4704_v12  ;;  %v4734_v12 = vld [vmem:[%s5423_s27 + $0x280] sm:$0xff] }
 0x154   : > { %3605 = vmatpush.bf16.msrb.mxu3 %v4712_v15  ;;  %v4726_v15 = vld [vmem:[%s5423_s27 + $0x240] sm:$0xff] }
 0x155   : > { %3549 = vmatpush.bf16.msrb.mxu0 %v4687_v17  ;;  %v4012_v17 = vld [vmem:[%s5776_s0 + $0x20] sm:$0xf] }
 0x156   : > { %3568 = vmatpush.bf16.msrb.mxu1 %v4695_v18  ;;  %v4634_v18 = vld [vmem:[%s5776_s0 + $0x5c] sm:$0xf0] }
 0x157   : > { %3587 = vmatpush.bf16.msrb.mxu2 %v4703_v16  ;;  %v4742_v16 = vld [vmem:[%s5423_s27 + $0x2c0] sm:$0xff]  ;;  %v4013_v29 = vor.u32 %v4634_v18, %v4012_v17 }
 0x158   : > { %3606 = vmatpush.bf16.msrb.mxu3 %v4711_v19  ;;  %v4757_v19 = vld [vmem:[%s5423_s27 + $0x338] sm:$0xff] }
 0x159   : > { %3550 = vmatpush.bf16.msrb.mxu0 %v4686_v21  ;;  %v4626_v21 = vld [vmem:[%s5776_s0 + $0x24] sm:$0xf] }
 0x15a   : > { %3569 = vmatpush.bf16.msrb.mxu1 %v4694_v22  ;;  %v4781_v22 = vld [vmem:[%s5423_s27 + $0x3f8] sm:$0xff]  ;;  %v4017_v31 = vor.u32 %v4626_v21, %v4014_v24  ;;  %v4652_v21 = vld [vmem:[%s5776_s0 + $0xec] sm:$0xf0] }
 0x15b   : > { %3588 = vmatpush.bf16.msrb.mxu2 %v4702_v20  ;;  %v4765_v20 = vld [vmem:[%s5423_s27 + $0x378] sm:$0xff] }
 0x15c   : > { %3607 = vmatpush.bf16.msrb.mxu3 %v4710_v23  ;;  %3551 = vmatmul.bf16.vlgmr.msrb.gmra.mxu0 %v3997_v36  ;;  %v4772_v23 = vld [vmem:[%s5423_s27 + $0x3b0] sm:$0xff]  ;;  %v4771_v36 = vld [vmem:[%s5423_s27 + $0x3a8] sm:$0xff]  ;;  %v4100_v24 = vld [vmem:[%s5776_s0 + $0xb8] sm:$0xf] }
 0x15d   : > { %3619 = vmatpush.bf16.msra.mxu0 %v4725_v26  ;;  %3570 = vmatmul.bf16.vlgmr.msrb.gmra.mxu1 %v4001_v38  ;;  %v4635_v26 = vld [vmem:[%s5776_s0 + $0x64] sm:$0xf0] }
 0x15e   : > { %3638 = vmatpush.bf16.msra.mxu1 %v4733_v34  ;;  %3589 = vmatmul.bf16.vlgmr.msrb.gmra.mxu2 %v4005_v39  ;;  %v4756_v34 = vld [vmem:[%s5423_s27 + $0x330] sm:$0xff]  ;;  %v4755_v38 = vld [vmem:[%s5423_s27 + $0x328] sm:$0xff] }
 0x15f   : > { %3657 = vmatpush.bf16.msra.mxu2 %v4741_v25  ;;  %3608 = vmatmul.bf16.vlgmr.msrb.gmra.mxu3 %v4009_v40  ;;  %v4020_v25 = vld [vmem:[%s5776_s0 + $0x28] sm:$0xf]  ;;  %v4770_v40 = vld [vmem:[%s5423_s27 + $0x3a0] sm:$0xff] }
 0x160   : > { %3676 = vmatpush.bf16.msra.mxu3 %v4749_v35  ;;  %v4021_v32 = vor.u32 %v4635_v26, %v4020_v25  ;;  %v4780_v35 = vld [vmem:[%s5423_s27 + $0x3f0] sm:$0xff]  ;;  %v4779_v39 = vld [vmem:[%s5423_s27 + $0x3e8] sm:$0xff]  ;;  %v4653_v25 = vld [vmem:[%s5776_s0 + $0xf4] sm:$0xf0] }
 0x161   : > { %3620 = vmatpush.bf16.msra.mxu0 %v4724_v41  ;;  %v4762_v41 = vld [vmem:[%s5423_s27 + $0x360] sm:$0xff]  ;;  %v4645_v26 = vld [vmem:[%s5776_s0 + $0xbc] sm:$0xf] }
 0x162   : > { %3639 = vmatpush.bf16.msra.mxu1 %v4732_v42  ;;  %v4754_v42 = vld [vmem:[%s5423_s27 + $0x320] sm:$0xff] }
 0x163   : > { %3658 = vmatpush.bf16.msra.mxu2 %v4740_v37  ;;  %v4763_v37 = vld [vmem:[%s5423_s27 + $0x368] sm:$0xff] }
 0x164   : > { %3677 = vmatpush.bf16.msra.mxu3 %v4748_v43  ;;  %v4778_v43 = vld [vmem:[%s5423_s27 + $0x3e0] sm:$0xff] }
 0x165   : > { %3621 = vmatpush.bf16.msra.mxu0 %v4723_v45  ;;  %v4076_v45 = vld [vmem:[%s5776_s0 + $0xa0] sm:$0xf] }
 0x166   : > { %3640 = vmatpush.bf16.msra.mxu1 %v4731_v46  ;;  %v4650_v46 = vld [vmem:[%s5776_s0 + $0xdc] sm:$0xf0] }
 0x167   : > { %3659 = vmatpush.bf16.msra.mxu2 %v4739_v44  ;;  %v4769_v44 = vld [vmem:[%s5423_s27 + $0x398] sm:$0xff]  ;;  %v4077_v57 = vor.u32 %v4650_v46, %v4076_v45 }
 0x168   : > { %3678 = vmatpush.bf16.msra.mxu3 %v4747_v47  ;;  %v4761_v47 = vld [vmem:[%s5423_s27 + $0x358] sm:$0xff] }
 0x169   : > { %3622 = vmatpush.bf16.msra.mxu0 %v4722_v49  ;;  %v4078_v49 = vld [vmem:[%s5776_s0 + $0xe0] sm:$0xf0] }
 0x16a   : > { %3641 = vmatpush.bf16.msra.mxu1 %v4730_v50  ;;  %v4084_v50 = vld [vmem:[%s5776_s0 + $0xa8] sm:$0xf] }
 0x16b   : > { %3660 = vmatpush.bf16.msra.mxu2 %v4738_v48  ;;  %v4642_v48 = vld [vmem:[%s5776_s0 + $0xa4] sm:$0xf] }
 0x16c   : > { %3679 = vmatpush.bf16.msra.mxu3 %v4746_v51  ;;  %3556 = vmatmul.bf16.gmra.mxu0 %v4061_v0  ;;  %v4651_v51 = vld [vmem:[%s5776_s0 + $0xe4] sm:$0xf0]  ;;  %v4081_v59 = vor.u32 %v4642_v48, %v4078_v49 }
 0x16d   : > { %3623 = vmatpush.bf16.msra.mxu0 %v4721_v60  ;;  %3575 = vmatmul.bf16.gmra.mxu1 %v4065_v2  ;;  %v4085_v60 = vor.u32 %v4651_v51, %v4084_v50  ;;  %v4767_v0 = vld [vmem:[%s5423_s27 + $0x388] sm:$0xff] }
 0x16e   : > { %3642 = vmatpush.bf16.msra.mxu1 %v4729_v62  ;;  %3594 = vmatmul.bf16.gmra.mxu2 %v4069_v3  ;;  %v4752_v62 = vld [vmem:[%s5423_s27 + $0x310] sm:$0xff]  ;;  %v4751_v2 = vld [vmem:[%s5423_s27 + $0x308] sm:$0xff] }
 0x16f   : > { %3661 = vmatpush.bf16.msra.mxu2 %v4737_v54  ;;  %3613 = vmatmul.bf16.gmra.mxu3 %v4073_v4  ;;  %v4086_v54 = vld [vmem:[%s5776_s0 + $0xe8] sm:$0xf0]  ;;  %v4766_v4 = vld [vmem:[%s5423_s27 + $0x380] sm:$0xff] }
 0x170   : > { %3680 = vmatpush.bf16.msra.mxu3 %v4745_v63  ;;  %v4089_v61 = vor.u32 %v4643_v52, %v4086_v54  ;;  %v4776_v63 = vld [vmem:[%s5423_s27 + $0x3d0] sm:$0xff]  ;;  %v4775_v3 = vld [vmem:[%s5423_s27 + $0x3c8] sm:$0xff] }
 0x171   : > { %3624 = vmatpush.bf16.msra.mxu0 %v4720_v5  ;;  %v4758_v5 = vld [vmem:[%s5423_s27 + $0x340] sm:$0xff] }
 0x172   : > { %3643 = vmatpush.bf16.msra.mxu1 %v4728_v6  ;;  %v4750_v6 = vld [vmem:[%s5423_s27 + $0x300] sm:$0xff] }
 0x173   : > { %3662 = vmatpush.bf16.msra.mxu2 %v4736_v1  ;;  %v4759_v1 = vld [vmem:[%s5423_s27 + $0x348] sm:$0xff] }
 0x174   : > { %3681 = vmatpush.bf16.msra.mxu3 %v4744_v7  ;;  %v4774_v7 = vld [vmem:[%s5423_s27 + $0x3c0] sm:$0xff] }
 0x175   : > { %3625 = vmatpush.bf16.msra.mxu0 %v4719_v9  ;;  %v4636_v9 = vld [vmem:[%s5776_s0 + $0x6c] sm:$0xf0] }
 0x176   : > { %3644 = vmatpush.bf16.msra.mxu1 %v4727_v10  ;;  %v4628_v10 = vld [vmem:[%s5776_s0 + $0x34] sm:$0xf] }
 0x177   : > { %3663 = vmatpush.bf16.msra.mxu2 %v4735_v8  ;;  %v4028_v8 = vld [vmem:[%s5776_s0 + $0x30] sm:$0xf] }
 0x178   : > { %3682 = vmatpush.bf16.msra.mxu3 %v4743_v11  ;;  %v4030_v11 = vld [vmem:[%s5776_s0 + $0x70] sm:$0xf0] }
 0x179   : > { %3626 = vmatpush.bf16.msra.mxu0 %v4718_v14  ;;  %v4629_v14 = vld [vmem:[%s5776_s0 + $0x3c] sm:$0xf]  ;;  %v4033_v17 = vor.u32 %v4628_v10, %v4030_v11 }
 0x17a   : > { %3645 = vmatpush.bf16.msra.mxu1 %v4726_v15  ;;  %v4038_v15 = vld [vmem:[%s5776_s0 + $0x78] sm:$0xf0] }
 0x17b   : > { %3664 = vmatpush.bf16.msra.mxu2 %v4734_v12  ;;  %v4036_v12 = vld [vmem:[%s5776_s0 + $0x38] sm:$0xf] }
 0x17c   : > { %3683 = vmatpush.bf16.msra.mxu3 %v4742_v16  ;;  %3627 = vmatmul.bf16.vlgmr.msra.gmra.mxu0 %v4013_v29  ;;  %v4029_v16 = vor.u32 %v4636_v9, %v4028_v8 }
 0x17d   : > { %3695 = vmatpush.bf16.msrb.mxu0 %v4757_v19  ;;  %3646 = vmatmul.bf16.vlgmr.msra.gmra.mxu1 %v4017_v31  ;;  %v4041_v19 = vor.u32 %v4629_v14, %v4038_v15  ;;  %v4105_v31 = vor.u32 %v4645_v26, %v4102_v27 }
 0x17e   : > { %3714 = vmatpush.bf16.msrb.mxu1 %v4765_v20  ;;  %3665 = vmatmul.bf16.vlgmr.msra.gmra.mxu2 %v4021_v32  ;;  %v4092_v20 = vld [vmem:[%s5776_s0 + $0xb0] sm:$0xf] }
 0x17f   : > { %3733 = vmatpush.bf16.msrb.mxu2 %v4773_v13  ;;  %3684 = vmatmul.bf16.vlgmr.msra.gmra.mxu3 %v4025_v33  ;;  %v4637_v13 = vld [vmem:[%s5776_s0 + $0x74] sm:$0xf0]  ;;  %v4093_v28 = vor.u32 %v4652_v21, %v4092_v20 }
 0x180   : > { %3752 = vmatpush.bf16.msrb.mxu3 %v4781_v22  ;;  %v4037_v18 = vor.u32 %v4637_v13, %v4036_v12  ;;  %v4644_v22 = vld [vmem:[%s5776_s0 + $0xb4] sm:$0xf] }
 0x181   : > { %3696 = vmatpush.bf16.msrb.mxu0 %v4756_v34 }
 0x182   : > { %3715 = vmatpush.bf16.msrb.mxu1 %v4764_v30  ;;  %v4101_v30 = vor.u32 %v4653_v25, %v4100_v24 }
 0x183   : > { %3734 = vmatpush.bf16.msrb.mxu2 %v4772_v23  ;;  %v4094_v23 = vld [vmem:[%s5776_s0 + $0xf0] sm:$0xf0] }
 0x184   : > { %3753 = vmatpush.bf16.msrb.mxu3 %v4780_v35  ;;  %v4097_v29 = vor.u32 %v4644_v22, %v4094_v23 }
 0x185   : > { %3697 = vmatpush.bf16.msrb.mxu0 %v4755_v38 }
 0x186   : > { %3716 = vmatpush.bf16.msrb.mxu1 %v4763_v37 }
 0x187   : > { %3735 = vmatpush.bf16.msrb.mxu2 %v4771_v36 }
 0x188   : > { %3754 = vmatpush.bf16.msrb.mxu3 %v4779_v39 }
 0x189   : > { %3698 = vmatpush.bf16.msrb.mxu0 %v4754_v42 }
 0x18a   : > { %3717 = vmatpush.bf16.msrb.mxu1 %v4762_v41 }
 0x18b   : > { %3736 = vmatpush.bf16.msrb.mxu2 %v4770_v40 }
 0x18c   : > { %3755 = vmatpush.bf16.msrb.mxu3 %v4778_v43  ;;  %3632 = vmatmul.bf16.gmra.mxu0 %v4077_v57 }
 0x18d   : > { %3699 = vmatpush.bf16.msrb.mxu0 %v4753_v53  ;;  %3651 = vmatmul.bf16.gmra.mxu1 %v4081_v59 }
 0x18e   : > { %3718 = vmatpush.bf16.msrb.mxu1 %v4761_v47  ;;  %3670 = vmatmul.bf16.gmra.mxu2 %v4085_v60 }
 0x18f   : > { %3737 = vmatpush.bf16.msrb.mxu2 %v4769_v44  ;;  %3689 = vmatmul.bf16.gmra.mxu3 %v4089_v61 }
 0x190   : > { %3756 = vmatpush.bf16.msrb.mxu3 %v4777_v55 }
 0x191   : > { %3700 = vmatpush.bf16.msrb.mxu0 %v4752_v62 }
 0x192   : > { %3719 = vmatpush.bf16.msrb.mxu1 %v4760_v58 }
 0x193   : > { %3738 = vmatpush.bf16.msrb.mxu2 %v4768_v56 }
 0x194   : > { %3757 = vmatpush.bf16.msrb.mxu3 %v4776_v63 }
 0x195   : > { %3701 = vmatpush.bf16.msrb.mxu0 %v4751_v2 }
 0x196   : > { %3720 = vmatpush.bf16.msrb.mxu1 %v4759_v1 }
 0x197   : > { %3739 = vmatpush.bf16.msrb.mxu2 %v4767_v0 }
 0x198   : > { %3758 = vmatpush.bf16.msrb.mxu3 %v4775_v3 }
 0x199   : > { %3702 = vmatpush.bf16.msrb.mxu0 %v4750_v6 }
 0x19a   : > { %3721 = vmatpush.bf16.msrb.mxu1 %v4758_v5 }
 0x19b   : > { %3740 = vmatpush.bf16.msrb.mxu2 %v4766_v4 }
 0x19c   : > { %3759 = vmatpush.bf16.msrb.mxu3 %v4774_v7  ;;  %3703 = vmatmul.bf16.vlgmr.msrb.gmra.mxu0 %v4029_v16 }
 0x19d   : > { %3722 = vmatmul.bf16.vlgmr.msrb.gmra.mxu1 %v4033_v17 }
 0x19e   : > { %3741 = vmatmul.bf16.vlgmr.msrb.gmra.mxu2 %v4037_v18 }
 0x19f   : > { %3760 = vmatmul.bf16.vlgmr.msrb.gmra.mxu3 %v4041_v19 }
 0x1ac   : > { %3708 = vmatmul.bf16.gmra.mxu0 %v4093_v28 }
 0x1ad   : > { %3727 = vmatmul.bf16.gmra.mxu1 %v4097_v29 }
 0x1ae   : > { %3746 = vmatmul.bf16.gmra.mxu2 %v4101_v30 }
 0x1af   : > { %3765 = vmatmul.bf16.gmra.mxu3 %v4105_v31 }
 0x1b9   : > { %v3476_v32 = vpop.f32.mrf.mxu0 }
 0x1ba   : > { %v3495_v33 = vpop.f32.mrf.mxu1 }
 0x1bb   : > { %v3496_v34 = vadd.f32 %v3495_v33, %v3476_v32 }
 0x1c1   : > { %v3514_v35 = vpop.f32.mrf.mxu2  ;;  %v3478_v38 = vpop.f32.mrf.mxu0 }
 0x1c2   : > { %v3533_v36 = vpop.f32.mrf.mxu3  ;;  %v3515_v37 = vadd.f32 %v3514_v35, %v3496_v34  ;;  %v3497_v39 = vpop.f32.mrf.mxu1 }
 0x1c3   : > { %v3498_v40 = vadd.f32 %v3497_v39, %v3478_v38 }
 0x1c4   : > { %v3534_v41 = vadd.f32 %v3533_v36, %v3515_v37 }
 0x1c9   : > { %v3516_v42 = vpop.f32.mrf.mxu2  ;;  %v3481_v45 = vpop.f32.mrf.mxu0 }
 0x1ca   : > { %v3535_v43 = vpop.f32.mrf.mxu3  ;;  %v3517_v44 = vadd.f32 %v3516_v42, %v3498_v40  ;;  %v3500_v46 = vpop.f32.mrf.mxu1 }
 0x1cb   : > { %v3501_v47 = vadd.f32 %v3500_v46, %v3481_v45 }
 0x1cc   : > { %v3536_v48 = vadd.f32 %v3535_v43, %v3517_v44 }
 0x1d1   : > { %v3519_v49 = vpop.f32.mrf.mxu2  ;;  %v3483_v52 = vpop.f32.mrf.mxu0 }
 0x1d2   : > { %v3538_v50 = vpop.f32.mrf.mxu3  ;;  %v3520_v51 = vadd.f32 %v3519_v49, %v3501_v47  ;;  %v3502_v53 = vpop.f32.mrf.mxu1 }
 0x1d3   : > { %v3503_v54 = vadd.f32 %v3502_v53, %v3483_v52 }
 0x1d4   : > { %v3539_v55 = vadd.f32 %v3538_v50, %v3520_v51 }
 0x1d9   : > { %v3521_v56 = vpop.f32.mrf.mxu2  ;;  %v3552_v59 = vpop.f32.mrf.mxu0 }
 0x1da   : > { %v3540_v57 = vpop.f32.mrf.mxu3  ;;  %v3522_v58 = vadd.f32 %v3521_v56, %v3503_v54  ;;  %v3553_v60 = vadd.f32 %v3552_v59, %v3534_v41  ;;  %v3571_v61 = vpop.f32.mrf.mxu1 }
 0x1dc   : > { %v3541_v62 = vadd.f32 %v3540_v57, %v3522_v58  ;;  %v3572_v63 = vadd.f32 %v3571_v61, %v3553_v60 }
 0x1e1   : > { %v3590_v0 = vpop.f32.mrf.mxu2  ;;  %v3554_v3 = vpop.f32.mrf.mxu0 }
 0x1e2   : > { %v3591_v1 = vadd.f32 %v3590_v0, %v3572_v63  ;;  %v3609_v2 = vpop.f32.mrf.mxu3  ;;  %v3573_v4 = vpop.f32.mrf.mxu1  ;;  %v3555_v26 = vadd.f32 %v3554_v3, %v3536_v48 }
 0x1e4   : > { %v3610_v5 = vadd.f32 %v3609_v2, %v3591_v1  ;;  %v3574_v27 = vadd.f32 %v3573_v4, %v3555_v26 }
 0x1e9   : > { %v3592_v6 = vpop.f32.mrf.mxu2  ;;  %v3557_v8 = vpop.f32.mrf.mxu0 }
 0x1ea   : > { %v3611_v7 = vpop.f32.mrf.mxu3  ;;  %v3576_v9 = vpop.f32.mrf.mxu1  ;;  %v3593_v29 = vadd.f32 %v3592_v6, %v3574_v27  ;;  %v3558_v33 = vadd.f32 %v3557_v8, %v3539_v55 }
 0x1ec   : > { %v3612_v35 = vadd.f32 %v3611_v7, %v3593_v29  ;;  %v3577_v36 = vadd.f32 %v3576_v9, %v3558_v33 }
 0x1f1   : > { %v3595_v10 = vpop.f32.mrf.mxu2  ;;  %v3559_v12 = vpop.f32.mrf.mxu0 }
 0x1f2   : > { %v3614_v11 = vpop.f32.mrf.mxu3  ;;  %v3578_v13 = vpop.f32.mrf.mxu1  ;;  %v3596_v40 = vadd.f32 %v3595_v10, %v3577_v36  ;;  %v3560_v45 = vadd.f32 %v3559_v12, %v3541_v62 }
 0x1f4   : > { %v3615_v47 = vadd.f32 %v3614_v11, %v3596_v40  ;;  %v3579_v50 = vadd.f32 %v3578_v13, %v3560_v45 }
 0x1f9   : > { %v3597_v14 = vpop.f32.mrf.mxu2  ;;  %v3628_v16 = vpop.f32.mrf.mxu0 }
 0x1fa   : > { %v3616_v15 = vpop.f32.mrf.mxu3  ;;  %v3647_v17 = vpop.f32.mrf.mxu1  ;;  %v3629_v34 = vadd.f32 %v3628_v16, %v3610_v5  ;;  %v3598_v54 = vadd.f32 %v3597_v14, %v3579_v50 }
 0x1fc   : > { %v3648_v37 = vadd.f32 %v3647_v17, %v3629_v34  ;;  %v3617_v63 = vadd.f32 %v3616_v15, %v3598_v54 }
 0x201   : > { %v3666_v18 = vpop.f32.mrf.mxu2  ;;  %v3630_v20 = vpop.f32.mrf.mxu0 }
 0x202   : > { %v3685_v19 = vpop.f32.mrf.mxu3  ;;  %v3649_v21 = vpop.f32.mrf.mxu1  ;;  %v3631_v38 = vadd.f32 %v3630_v20, %v3612_v35  ;;  %v3667_v41 = vadd.f32 %v3666_v18, %v3648_v37 }
 0x204   : > { %v3650_v46 = vadd.f32 %v3649_v21, %v3631_v38  ;;  %v3686_v48 = vadd.f32 %v3685_v19, %v3667_v41  ;;  %v4846_v19 = vmov 32.0  }
 0x205   : > { %4818 = vrcp.f32 %v4846_v19 }
 0x209   : > { %v3668_v22 = vpop.f32.mrf.mxu2  ;;  %v3633_v24 = vpop.f32.mrf.mxu0 }
 0x20a   : > { %v3687_v23 = vpop.f32.mrf.mxu3  ;;  %v3652_v25 = vpop.f32.mrf.mxu1  ;;  %v3669_v49 = vadd.f32 %v3668_v22, %v3650_v46  ;;  %v3634_v51 = vadd.f32 %v3633_v24, %v3615_v47 }
 0x20b   : > { %v4819_v27 = vpop.eup %4818 }
 0x20c   : > { %v3688_v55 = vadd.f32 %v3687_v23, %v3669_v49  ;;  %v3653_v59 = vadd.f32 %v3652_v25, %v3634_v51  ;;  %v3781_v34 = vmul.f32 32.0, %v4819_v27  ;;  %vm3785_vm0 = vweird.f32 %v4819_v27 }
 0x20e   : > { %v3782_v38 = vsub.f32 1.0, %v3781_v34 }
 0x211   : > { %v3671_v28 = vpop.f32.mrf.mxu2  ;;  %v3635_v31 = vpop.f32.mrf.mxu0 }
 0x212   : > { %v3690_v30 = vpop.f32.mrf.mxu3  ;;  %v3654_v32 = vpop.f32.mrf.mxu1  ;;  %v3672_v0 = vadd.f32 %v3671_v28, %v3653_v59  ;;  %v3636_v62 = vadd.f32 %v3635_v31, %v3617_v63 }
 0x214   : > { %v3691_v4 = vadd.f32 %v3690_v30, %v3672_v0  ;;  %v3655_v9 = vadd.f32 %v3654_v32, %v3636_v62 }
 0x219   : > { %v3673_v39 = vpop.f32.mrf.mxu2  ;;  %v3704_v43 = vpop.f32.mrf.mxu0 }
 0x21a   : > { %v3692_v42 = vpop.f32.mrf.mxu3  ;;  %v3723_v44 = vpop.f32.mrf.mxu1  ;;  %v3705_v52 = vadd.f32 %v3704_v43, %v3686_v48  ;;  %v3674_v13 = vadd.f32 %v3673_v39, %v3655_v9  ;;  %v3783_v43 = vmul.f32 %v4819_v27, %v3782_v38 }
 0x21c   : > { %v3724_v60 = vadd.f32 %v3723_v44, %v3705_v52  ;;  %v3693_v21 = vadd.f32 %v3692_v42, %v3674_v13  ;;  %v3784_v48 = vadd.f32 %v4819_v27, %v3783_v43 }
 0x221   : > { %v3742_v53 = vpop.f32.mrf.mxu2  ;;  %v3706_v57 = vpop.f32.mrf.mxu0 }
 0x222   : > { %v3761_v56 = vpop.f32.mrf.mxu3  ;;  %v3725_v58 = vpop.f32.mrf.mxu1  ;;  %v3707_v61 = vadd.f32 %v3706_v57, %v3688_v55  ;;  %v3743_v1 = vadd.f32 %v3742_v53, %v3724_v60  ;;  %v3786_v53 = vsel %vm3785_vm0, %v4819_v27, %v3784_v48 }
 0x224   : > { %v3726_v2 = vadd.f32 %v3725_v58, %v3707_v61  ;;  %v5745_v5 = vadd.f32 %v3761_v56, %v3743_v1 }
 0x226   : > { %v3788_v14 = vmul.f32 %v5745_v5, %v5745_v5 }
 0x229   : > { %v3744_v3 = vpop.f32.mrf.mxu2  ;;  %v3709_v8 = vpop.f32.mrf.mxu0 }
 0x22a   : > { %v3745_v6 = vadd.f32 %v3744_v3, %v3726_v2  ;;  %v3763_v7 = vpop.f32.mrf.mxu3  ;;  %v3710_v11 = vadd.f32 %v3709_v8, %v3691_v4  ;;  %v3728_v12 = vpop.f32.mrf.mxu1 }
 0x22c   : > { %v5747_v10 = vadd.f32 %v3763_v7, %v3745_v6  ;;  %v3729_v18 = vadd.f32 %v3728_v12, %v3710_v11 }
 0x22e   : > { %v3771_v15 = vadd.f32 %v5747_v10, %v5745_v5  ;;  %v3789_v16 = vmul.f32 %v5747_v10, %v5747_v10 }
 0x230   : > { %v3792_v17 = vadd.f32 %v3789_v16, %v3788_v14 }
 0x231   : > { %v3747_v20 = vpop.f32.mrf.mxu2  ;;  %v3711_v24 = vpop.f32.mrf.mxu0 }
 0x232   : > { %v3748_v22 = vadd.f32 %v3747_v20, %v3729_v18  ;;  %v3766_v23 = vpop.f32.mrf.mxu3  ;;  %v3712_v26 = vadd.f32 %v3711_v24, %v3693_v21  ;;  %v3730_v30 = vpop.f32.mrf.mxu1 }
 0x234   : > { %v3767_v25 = vadd.f32 %v3766_v23, %v3748_v22  ;;  %v3731_v32 = vadd.f32 %v3730_v30, %v3712_v26 }
 0x236   : > { %v3772_v28 = vadd.f32 %v3771_v15, %v3767_v25  ;;  %v3790_v29 = vmul.f32 %v3767_v25, %v3767_v25 }
 0x238   : > { %v3793_v31 = vadd.f32 %v3792_v17, %v3790_v29 }
 0x239   : > { %v3749_v33 = vpop.f32.mrf.mxu2 }
 0x23a   : > { %v3750_v35 = vadd.f32 %v3749_v33, %v3731_v32  ;;  %v3768_v36 = vpop.f32.mrf.mxu3 }
 0x23c   : > { %v3769_v37 = vadd.f32 %v3768_v36, %v3750_v35 }
 0x23e   : > { %v3773_v39 = vadd.f32 %v3772_v28, %v3769_v37  ;;  %v3791_v40 = vmul.f32 %v3769_v37, %v3769_v37 }
 0x240   : > { %v3774_v41 = vrot.slane %v3773_v39, 4  ;;  %v3794_v42 = vadd.f32 %v3793_v31, %v3791_v40 }
 0x242   : > { %v3775_v44 = vadd.f32 %v3774_v41, %v3773_v39  ;;  %v3795_v45 = vrot.slane %v3794_v42, 4 }
 0x244   : > { %v3776_v46 = vrot.slane %v3775_v44, 2  ;;  %v3796_v47 = vadd.f32 %v3795_v45, %v3794_v42 }
 0x246   : > { %v3777_v49 = vadd.f32 %v3776_v46, %v3775_v44  ;;  %v3797_v50 = vrot.slane %v3796_v47, 2 }
 0x248   : > { %v3778_v51 = vrot.slane %v3777_v49, 1  ;;  %v3798_v52 = vadd.f32 %v3797_v50, %v3796_v47 }
 0x24a   : > { %v3779_v54 = vadd.f32 %v3778_v51, %v3777_v49  ;;  %v3799_v55 = vrot.slane %v3798_v52, 1 }
 0x24c   : > { %v3787_v56 = vmul.f32 %v3786_v53, %v3779_v54  ;;  %v3800_v57 = vadd.f32 %v3799_v55, %v3798_v52 }
 0x24e   : > { %v3801_v58 = vmul.f32 %v3800_v57, %v3786_v53  ;;  %v3802_v59 = vmul.f32 %v3787_v56, %v3787_v56  ;;  %v3804_v60 = vsub.f32 %v5745_v5, %v3787_v56  ;;  %v3805_v61 = vsub.f32 %v5747_v10, %v3787_v56 }
 0x24f   : > { %v3806_v63 = vsub.f32 %v3767_v25, %v3787_v56  ;;  %v3807_v0 = vsub.f32 %v3769_v37, %v3787_v56 }
 0x250   : > { %v3803_v1 = vsub.f32 %v3801_v58, %v3802_v59 }
 0x252   : > { %v3808_v62 = vadd.f32 1e-05, %v3803_v1 }
 0x254   : > { %4820 = vrsqrt.f32 %v3808_v62  ;;  %vm3815_vm2 = vweird.f32 %v3808_v62 }
 0x25a   : > { %v4821_v2 = vpop.eup %4820 }
 0x25b   : > { %v3810_v3 = vmul.f32 %v4821_v2, %v3808_v62  ;;  %vm3816_vm1 = vweird.f32 %v4821_v2 }
 0x25c   : > { %vm3817_vm3 = vmor %vm3815_vm2, %vm3816_vm1 }
 0x25d   : > { %v3811_v4 = vmul.f32 %v4821_v2, %v3810_v3 }
 0x25f   : > { %v3812_v6 = vmul.f32 0.5, %v3811_v4 }
 0x261   : > { %v3813_v7 = vsub.f32 1.5, %v3812_v6 }
 0x263   : > { %v3814_v8 = vmul.f32 %v4821_v2, %v3813_v7 }
 0x265   : > { %v3818_v9 = vsel %vm3817_vm3, %v4821_v2, %v3814_v8 }
 0x266   : > { %v3819_v11 = vmul.f32 %v3818_v9, %v3804_v60  ;;  %v3820_v5 = vmul.f32 %v3818_v9, %v3805_v61  ;;  %v3821_v12 = vmul.f32 %v3818_v9, %v3806_v63  ;;  %v3822_v10 = vmul.f32 %v3818_v9, %v3807_v0 }
 0x268   : > { %vm3823_vm4 = vcmp.ge.f32.partialorder %v3819_v11, 0.0  ;;  %vm3824_vm5 = vcmp.ge.f32.partialorder %v3820_v5, 0.0  ;;  %vm3825_vm6 = vcmp.ge.f32.partialorder %v3821_v12, 0.0  ;;  %vm3826_vm7 = vcmp.ge.f32.partialorder %v3822_v10, 0.0 }
 0x269   : > { %v3827_v13 = vmul.f32 0.2, %v3819_v11  ;;  %v3828_v14 = vmul.f32 0.2, %v3820_v5  ;;  %v3829_v15 = vmul.f32 0.2, %v3821_v12 }
 0x26a   : > { %v3830_v16 = vmul.f32 0.2, %v3822_v10 }
 0x26b   : > { %v3831_v17 = vsel %vm3823_vm4, %v3819_v11, %v3827_v13  ;;  %v3832_v18 = vsel %vm3824_vm5, %v3820_v5, %v3828_v14  ;;  %v3833_v19 = vsel %vm3825_vm6, %v3821_v12, %v3829_v15  ;;  %3849 = sbr.rel (!%p4892_p5) target bundleno = 634 (0x27a), region = 84 }
 0x26c   : > { %v3834_v20 = vsel %vm3826_vm7, %v3822_v10, %v3830_v16  ;;  %v4785_v21 = vpack.c.bf16 %v3832_v18, %v3831_v17 }
 0x26d   : > { %v4790_v22 = vpack.c.bf16 %v3834_v20, %v3833_v19 }
 0x26e   : > { %4786 = vst [vmem:[%s2250_s20] sm:$0xff] %v4785_v21  }
 0x26f   : > { %4792 = vst [vmem:[%s2250_s20 + $0x8] sm:$0xff] %v4790_v22  }
 0x275   : > { %v3868_v23 = vld [vmem:[%s2250_s20] sm:$0xf]  ;;  %v3870_v24 = vld [vmem:[%s2250_s20 + $0x4] sm:$0xf] }
 0x276   : > { %v3872_v25 = vld [vmem:[%s2250_s20 + $0x8] sm:$0xf]  ;;  %3869 = vst [vmem:[%s3851_s22] sm:$0xf] %v3868_v23  ;;  %v3874_v26 = vld [vmem:[%s2250_s20 + $0xc] sm:$0xf] }
 0x277   : > { %3871 = vst [vmem:[%s3851_s22 + $0x8] sm:$0xf] %v3870_v24 }
 0x278   : > { %3873 = vst [vmem:[%s3851_s22 + $0x10] sm:$0xf] %v3872_v25 }
 0x279   : > { %3875 = vst [vmem:[%s3851_s22 + $0x18] sm:$0xf] %v3874_v26 }
 0x27a PF: > { %p9_p10 = scmp.ge.s32.totalorder %s4879_s13, 4   ;;  %s5780_s9 = smov %s4840_s10 }
 0x27b   : > { %s5781_s10 = smov %s4890_s16  ;;  %s5782_s11 = smov %s4879_s13 }
 0x27c   :  { %11 = sbr.rel (!%p9_p10) target bundleno = 2 (0x2), region = 160 }

// kernel: discriminator_forward.7
= control target key start
LH: loop header
LB: loop body
LE: loop exit
PB: predicated region body
PF: predicated region fallthrough
CT: control target
= control target key end

     0   :  { %vm2565_vm1 = vcmask 156672   ;;  %vm2592_vm5 = vcmask 1024   ;;  %s4722_s1 = inlined_call_operand.vmem [shape: bf16[4096,20], index: 1, kind: input, shape index: {}]   ;;  %s4723_s0 = inlined_call_operand.vmem [shape: bf16[2,4096], index: 0, kind: input, shape index: {}]   ;;  %s4724_s2 = inlined_call_operand.vmem [shape: f32[1,20], index: 2, kind: input, shape index: {}]   ;;  %s4725_s3 = inlined_call_operand.vmem [shape: f32[2,1], index: 3, kind: input, shape index: {}]   ;;  %s4726_s4 = inlined_call_operand.vmem [shape: f32[2,1], index: 4, kind: output, shape index: {}]  }
   0x1   :  { %v3630_v0 = vld [vmem:[%s4722_s1 + $0x38] sm:$0xff]  ;;  %v3629_v4 = vld [vmem:[%s4722_s1 + $0x30] sm:$0xff]  ;;  %v3628_v8 = vld [vmem:[%s4722_s1 + $0x28] sm:$0xff] }
   0x2   :  { %v3638_v1 = vld [vmem:[%s4722_s1 + $0x78] sm:$0xff]  ;;  %2141 = vmatpush.bf16.msra.mxu0 %v3630_v0  ;;  %v3637_v5 = vld [vmem:[%s4722_s1 + $0x70] sm:$0xff]  ;;  %v3636_v9 = vld [vmem:[%s4722_s1 + $0x68] sm:$0xff] }
   0x3   :  { %v3646_v2 = vld [vmem:[%s4722_s1 + $0xb8] sm:$0xff]  ;;  %2154 = vmatpush.bf16.msra.mxu1 %v3638_v1  ;;  %v3645_v6 = vld [vmem:[%s4722_s1 + $0xb0] sm:$0xff]  ;;  %v3644_v10 = vld [vmem:[%s4722_s1 + $0xa8] sm:$0xff] }
   0x4   :  { %v3654_v3 = vld [vmem:[%s4722_s1 + $0xf8] sm:$0xff]  ;;  %2167 = vmatpush.bf16.msra.mxu2 %v3646_v2  ;;  %v3653_v7 = vld [vmem:[%s4722_s1 + $0xf0] sm:$0xff]  ;;  %v3652_v11 = vld [vmem:[%s4722_s1 + $0xe8] sm:$0xff] }
   0x5   :  { %2180 = vmatpush.bf16.msra.mxu3 %v3654_v3  ;;  %v3627_v12 = vld [vmem:[%s4722_s1 + $0x20] sm:$0xff]  ;;  %v3626_v16 = vld [vmem:[%s4722_s1 + $0x18] sm:$0xff]  ;;  %v3625_v21 = vld [vmem:[%s4722_s1 + $0x10] sm:$0xff] }
   0x6   :  { %2142 = vmatpush.bf16.msra.mxu0 %v3629_v4  ;;  %v3635_v13 = vld [vmem:[%s4722_s1 + $0x60] sm:$0xff]  ;;  %v3634_v17 = vld [vmem:[%s4722_s1 + $0x58] sm:$0xff]  ;;  %v3633_v22 = vld [vmem:[%s4722_s1 + $0x50] sm:$0xff] }
   0x7   :  { %2155 = vmatpush.bf16.msra.mxu1 %v3637_v5  ;;  %v3643_v14 = vld [vmem:[%s4722_s1 + $0xa0] sm:$0xff]  ;;  %v3642_v18 = vld [vmem:[%s4722_s1 + $0x98] sm:$0xff]  ;;  %v3641_v23 = vld [vmem:[%s4722_s1 + $0x90] sm:$0xff] }
   0x8   :  { %2168 = vmatpush.bf16.msra.mxu2 %v3645_v6  ;;  %v3651_v15 = vld [vmem:[%s4722_s1 + $0xe0] sm:$0xff]  ;;  %v3650_v19 = vld [vmem:[%s4722_s1 + $0xd8] sm:$0xff]  ;;  %v3649_v24 = vld [vmem:[%s4722_s1 + $0xd0] sm:$0xff] }
   0x9   :  { %2181 = vmatpush.bf16.msra.mxu3 %v3653_v7  ;;  %v17_v20 = vld [vmem:[%s4723_s0] sm:$0xff]  ;;  %v3624_v25 = vld [vmem:[%s4722_s1 + $0x8] sm:$0xff]  ;;  %v3662_v33 = vld [vmem:[%s4722_s1 + $0x138] sm:$0xff] }
   0xa   :  { %2143 = vmatpush.bf16.msra.mxu0 %v3628_v8  ;;  %534 = vst [vmem:[#allocation1] ss:$9 sm:$0xff] %v17_v20  ;;  %v3632_v26 = vld [vmem:[%s4722_s1 + $0x48] sm:$0xff]  ;;  %v3623_v29 = vld [vmem:[%s4722_s1] sm:$0xff]  ;;  %v3670_v34 = vld [vmem:[%s4722_s1 + $0x178] sm:$0xff] }
   0xb   :  { %2156 = vmatpush.bf16.msra.mxu1 %v3636_v9  ;;  %v3640_v27 = vld [vmem:[%s4722_s1 + $0x88] sm:$0xff]  ;;  %v3631_v30 = vld [vmem:[%s4722_s1 + $0x40] sm:$0xff]  ;;  %v3678_v35 = vld [vmem:[%s4722_s1 + $0x1b8] sm:$0xff] }
   0xc   :  { %2169 = vmatpush.bf16.msra.mxu2 %v3644_v10  ;;  %v3648_v28 = vld [vmem:[%s4722_s1 + $0xc8] sm:$0xff]  ;;  %v3639_v31 = vld [vmem:[%s4722_s1 + $0x80] sm:$0xff]  ;;  %v3686_v36 = vld [vmem:[%s4722_s1 + $0x1f8] sm:$0xff] }
   0xd   :  { %2182 = vmatpush.bf16.msra.mxu3 %v3652_v11  ;;  %v3647_v32 = vld [vmem:[%s4722_s1 + $0xc0] sm:$0xff]  ;;  %v3661_v37 = vld [vmem:[%s4722_s1 + $0x130] sm:$0xff]  ;;  %v3660_v45 = vld [vmem:[%s4722_s1 + $0x128] sm:$0xff] }
   0xe   :  { %2144 = vmatpush.bf16.msra.mxu0 %v3627_v12  ;;  %v3669_v40 = vld [vmem:[%s4722_s1 + $0x170] sm:$0xff]  ;;  %v3668_v46 = vld [vmem:[%s4722_s1 + $0x168] sm:$0xff]  ;;  %v3659_v54 = vld [vmem:[%s4722_s1 + $0x120] sm:$0xff] }
   0xf   :  { %2157 = vmatpush.bf16.msra.mxu1 %v3635_v13  ;;  %v3677_v43 = vld [vmem:[%s4722_s1 + $0x1b0] sm:$0xff]  ;;  %v3676_v47 = vld [vmem:[%s4722_s1 + $0x1a8] sm:$0xff]  ;;  %v3667_v55 = vld [vmem:[%s4722_s1 + $0x160] sm:$0xff] }
  0x10   :  { %2170 = vmatpush.bf16.msra.mxu2 %v3643_v14  ;;  %v3685_v44 = vld [vmem:[%s4722_s1 + $0x1f0] sm:$0xff]  ;;  %v3684_v48 = vld [vmem:[%s4722_s1 + $0x1e8] sm:$0xff]  ;;  %v3675_v56 = vld [vmem:[%s4722_s1 + $0x1a0] sm:$0xff] }
  0x11   :  { %2183 = vmatpush.bf16.msra.mxu3 %v3651_v15  ;;  %v537_v38 = vld [vmem:[#allocation1 + $0x12] sm:$0xff]  ;;  %v535_v39 = vld [vmem:[#allocation1] sm:$0xff]  ;;  %v536_v42 = vld [vmem:[#allocation1 + $0x9] sm:$0xff] }
  0x12   :  { %2145 = vmatpush.bf16.msra.mxu0 %v3626_v16  ;;  %v538_v41 = vld [vmem:[#allocation1 + $0x1b] sm:$0xff]  ;;  %v18_v49 = vld [vmem:[%s4723_s0 + $0x8] sm:$0xff]  ;;  %v3657_v62 = vld [vmem:[%s4722_s1 + $0x110] sm:$0xff] }
  0x13   :  { %2158 = vmatpush.bf16.msra.mxu1 %v3634_v17  ;;  %v541_v50 = vld [vmem:[#allocation1 + $0x36] sm:$0xff]  ;;  %v539_v51 = vld [vmem:[#allocation1 + $0x24] sm:$0xff]  ;;  %v540_v53 = vld [vmem:[#allocation1 + $0x2d] sm:$0xff] }
  0x14   :  { %2171 = vmatpush.bf16.msra.mxu2 %v3642_v18  ;;  %v542_v52 = vld [vmem:[#allocation1 + $0x3f] sm:$0xff]  ;;  %v3665_v63 = vld [vmem:[%s4722_s1 + $0x150] sm:$0xff]  ;;  %v3656_v2 = vld [vmem:[%s4722_s1 + $0x108] sm:$0xff] }
  0x15   :  { %2184 = vmatpush.bf16.msra.mxu3 %v3650_v19  ;;  %544 = vst [vmem:[#allocation1] ss:$9 sm:$0xff] %v18_v49  ;;  %v3683_v57 = vld [vmem:[%s4722_s1 + $0x1e0] sm:$0xff]  ;;  %v3658_v58 = vld [vmem:[%s4722_s1 + $0x118] sm:$0xff]  ;;  %v3673_v0 = vld [vmem:[%s4722_s1 + $0x190] sm:$0xff] }
  0x16   :  { %2146 = vmatpush.bf16.msra.mxu0 %v3625_v21  ;;  %v3666_v59 = vld [vmem:[%s4722_s1 + $0x158] sm:$0xff]  ;;  %v3681_v1 = vld [vmem:[%s4722_s1 + $0x1d0] sm:$0xff]  ;;  %v3664_v3 = vld [vmem:[%s4722_s1 + $0x148] sm:$0xff] }
  0x17   :  { %2159 = vmatpush.bf16.msra.mxu1 %v3633_v22  ;;  %v3674_v60 = vld [vmem:[%s4722_s1 + $0x198] sm:$0xff]  ;;  %v3672_v4 = vld [vmem:[%s4722_s1 + $0x188] sm:$0xff]  ;;  %v3655_v6 = vld [vmem:[%s4722_s1 + $0x100] sm:$0xff] }
  0x18   :  { %2172 = vmatpush.bf16.msra.mxu2 %v3641_v23  ;;  %v3682_v61 = vld [vmem:[%s4722_s1 + $0x1d8] sm:$0xff]  ;;  %v3680_v5 = vld [vmem:[%s4722_s1 + $0x1c8] sm:$0xff]  ;;  %v3663_v7 = vld [vmem:[%s4722_s1 + $0x140] sm:$0xff] }
  0x19   :  { %2185 = vmatpush.bf16.msra.mxu3 %v3649_v24  ;;  %v3671_v8 = vld [vmem:[%s4722_s1 + $0x180] sm:$0xff]  ;;  %v3694_v10 = vld [vmem:[%s4722_s1 + $0x238] sm:$0xff]  ;;  %v3693_v14 = vld [vmem:[%s4722_s1 + $0x230] sm:$0xff] }
  0x1a   :  { %2147 = vmatpush.bf16.msra.mxu0 %v3624_v25  ;;  %v3679_v9 = vld [vmem:[%s4722_s1 + $0x1c0] sm:$0xff]  ;;  %v3702_v11 = vld [vmem:[%s4722_s1 + $0x278] sm:$0xff]  ;;  %v3701_v15 = vld [vmem:[%s4722_s1 + $0x270] sm:$0xff] }
  0x1b   :  { %2160 = vmatpush.bf16.msra.mxu1 %v3632_v26  ;;  %v3710_v12 = vld [vmem:[%s4722_s1 + $0x2b8] sm:$0xff]  ;;  %v3709_v16 = vld [vmem:[%s4722_s1 + $0x2b0] sm:$0xff]  ;;  %v3692_v18 = vld [vmem:[%s4722_s1 + $0x228] sm:$0xff] }
  0x1c   :  { %2173 = vmatpush.bf16.msra.mxu2 %v3640_v27  ;;  %v3718_v13 = vld [vmem:[%s4722_s1 + $0x2f8] sm:$0xff]  ;;  %v3717_v17 = vld [vmem:[%s4722_s1 + $0x2f0] sm:$0xff]  ;;  %v3700_v19 = vld [vmem:[%s4722_s1 + $0x268] sm:$0xff] }
  0x1d   :  { %2186 = vmatpush.bf16.msra.mxu3 %v3648_v28  ;;  %v3708_v20 = vld [vmem:[%s4722_s1 + $0x2a8] sm:$0xff]  ;;  %v3691_v22 = vld [vmem:[%s4722_s1 + $0x220] sm:$0xff]  ;;  %v3690_v26 = vld [vmem:[%s4722_s1 + $0x218] sm:$0xff] }
  0x1e   :  { %2148 = vmatpush.bf16.msra.mxu0 %v3623_v29  ;;  %v3716_v21 = vld [vmem:[%s4722_s1 + $0x2e8] sm:$0xff]  ;;  %v3699_v23 = vld [vmem:[%s4722_s1 + $0x260] sm:$0xff]  ;;  %v3698_v27 = vld [vmem:[%s4722_s1 + $0x258] sm:$0xff] }
  0x1f   :  { %2161 = vmatpush.bf16.msra.mxu1 %v3631_v30  ;;  %v3707_v24 = vld [vmem:[%s4722_s1 + $0x2a0] sm:$0xff]  ;;  %v3706_v28 = vld [vmem:[%s4722_s1 + $0x298] sm:$0xff]  ;;  %v3689_v30 = vld [vmem:[%s4722_s1 + $0x210] sm:$0xff] }
  0x20   :  { %2174 = vmatpush.bf16.msra.mxu2 %v3639_v31  ;;  %v3715_v25 = vld [vmem:[%s4722_s1 + $0x2e0] sm:$0xff]  ;;  %v3714_v29 = vld [vmem:[%s4722_s1 + $0x2d8] sm:$0xff]  ;;  %v3697_v31 = vld [vmem:[%s4722_s1 + $0x250] sm:$0xff] }
  0x21   :  { %2187 = vmatpush.bf16.msra.mxu3 %v3647_v32  ;;  %2149 = vmatmul.bf16.vlgmr.msra.gmra.mxu0 %v535_v39  ;;  %v3705_v32 = vld [vmem:[%s4722_s1 + $0x290] sm:$0xff]  ;;  %v3695_v39 = vld [vmem:[%s4722_s1 + $0x240] sm:$0xff] }
  0x22   :  { %2193 = vmatpush.bf16.msrb.mxu0 %v3662_v33  ;;  %2162 = vmatmul.bf16.vlgmr.msra.gmra.mxu1 %v536_v42  ;;  %v3713_v33 = vld [vmem:[%s4722_s1 + $0x2d0] sm:$0xff]  ;;  %v3726_v42 = vld [vmem:[%s4722_s1 + $0x338] sm:$0xff] }
  0x23   :  { %2206 = vmatpush.bf16.msrb.mxu1 %v3670_v34  ;;  %2175 = vmatmul.bf16.vlgmr.msra.gmra.mxu2 %v537_v38  ;;  %v3688_v34 = vld [vmem:[%s4722_s1 + $0x208] sm:$0xff]  ;;  %v3687_v38 = vld [vmem:[%s4722_s1 + $0x200] sm:$0xff] }
  0x24   :  { %2219 = vmatpush.bf16.msrb.mxu2 %v3678_v35  ;;  %2188 = vmatmul.bf16.vlgmr.msra.gmra.mxu3 %v538_v41  ;;  %v3696_v35 = vld [vmem:[%s4722_s1 + $0x248] sm:$0xff]  ;;  %v3711_v41 = vld [vmem:[%s4722_s1 + $0x2c0] sm:$0xff] }
  0x25   :  { %2232 = vmatpush.bf16.msrb.mxu3 %v3686_v36  ;;  %v3704_v36 = vld [vmem:[%s4722_s1 + $0x288] sm:$0xff] }
  0x26   :  { %2194 = vmatpush.bf16.msrb.mxu0 %v3661_v37  ;;  %v3712_v37 = vld [vmem:[%s4722_s1 + $0x2c8] sm:$0xff] }
  0x27   :  { %2207 = vmatpush.bf16.msrb.mxu1 %v3669_v40  ;;  %v3703_v40 = vld [vmem:[%s4722_s1 + $0x280] sm:$0xff]  ;;  %v546_v49 = vld [vmem:[#allocation1 + $0x9] sm:$0xff] }
  0x28   :  { %2220 = vmatpush.bf16.msrb.mxu2 %v3677_v43  ;;  %v3734_v43 = vld [vmem:[%s4722_s1 + $0x378] sm:$0xff] }
  0x29   :  { %2233 = vmatpush.bf16.msrb.mxu3 %v3685_v44  ;;  %v19_v44 = vld [vmem:[%s4723_s0 + $0x10] sm:$0xff] }
  0x2a   :  { %2195 = vmatpush.bf16.msrb.mxu0 %v3660_v45  ;;  %v3742_v45 = vld [vmem:[%s4722_s1 + $0x3b8] sm:$0xff] }
  0x2b   :  { %2208 = vmatpush.bf16.msrb.mxu1 %v3668_v46  ;;  %v3750_v46 = vld [vmem:[%s4722_s1 + $0x3f8] sm:$0xff] }
  0x2c   :  { %2221 = vmatpush.bf16.msrb.mxu2 %v3676_v47  ;;  %v545_v47 = vld [vmem:[#allocation1] sm:$0xff] }
  0x2d   :  { %2234 = vmatpush.bf16.msrb.mxu3 %v3684_v48  ;;  %v547_v48 = vld [vmem:[#allocation1 + $0x12] sm:$0xff] }
  0x2e   :  { %2196 = vmatpush.bf16.msrb.mxu0 %v3659_v54  ;;  %v3749_v54 = vld [vmem:[%s4722_s1 + $0x3f0] sm:$0xff] }
  0x2f   :  { %2209 = vmatpush.bf16.msrb.mxu1 %v3667_v55  ;;  %v4230_v55 = vld [vmem:[#allocation1 + $0x24] sm:$0xff] }
  0x30   :  { %2222 = vmatpush.bf16.msrb.mxu2 %v3675_v56  ;;  %v4232_v56 = vld [vmem:[#allocation1 + $0x36] sm:$0xff] }
  0x31   :  { %2235 = vmatpush.bf16.msrb.mxu3 %v3683_v57  ;;  %v4234_v57 = vld [vmem:[#allocation1 + $0x2d] sm:$0xff] }
  0x32   :  { %2197 = vmatpush.bf16.msrb.mxu0 %v3658_v58  ;;  %v4236_v58 = vld [vmem:[#allocation1 + $0x3f] sm:$0xff] }
  0x33   :  { %2210 = vmatpush.bf16.msrb.mxu1 %v3666_v59  ;;  %v3724_v59 = vld [vmem:[%s4722_s1 + $0x328] sm:$0xff] }
  0x34   :  { %2223 = vmatpush.bf16.msrb.mxu2 %v3674_v60  ;;  %v3732_v60 = vld [vmem:[%s4722_s1 + $0x368] sm:$0xff] }
  0x35   :  { %2236 = vmatpush.bf16.msrb.mxu3 %v3682_v61  ;;  %v3740_v61 = vld [vmem:[%s4722_s1 + $0x3a8] sm:$0xff] }
  0x36   :  { %2198 = vmatpush.bf16.msrb.mxu0 %v3657_v62  ;;  %v3748_v62 = vld [vmem:[%s4722_s1 + $0x3e8] sm:$0xff] }
  0x37   :  { %2211 = vmatpush.bf16.msrb.mxu1 %v3665_v63  ;;  %v3723_v63 = vld [vmem:[%s4722_s1 + $0x320] sm:$0xff] }
  0x38   :  { %2224 = vmatpush.bf16.msrb.mxu2 %v3673_v0  ;;  %v3731_v0 = vld [vmem:[%s4722_s1 + $0x360] sm:$0xff] }
  0x39   :  { %2237 = vmatpush.bf16.msrb.mxu3 %v3681_v1  ;;  %v3739_v1 = vld [vmem:[%s4722_s1 + $0x3a0] sm:$0xff] }
  0x3a   :  { %2199 = vmatpush.bf16.msrb.mxu0 %v3656_v2  ;;  %v3747_v2 = vld [vmem:[%s4722_s1 + $0x3e0] sm:$0xff] }
  0x3b   :  { %2212 = vmatpush.bf16.msrb.mxu1 %v3664_v3  ;;  %v3722_v3 = vld [vmem:[%s4722_s1 + $0x318] sm:$0xff] }
  0x3c   :  { %2225 = vmatpush.bf16.msrb.mxu2 %v3672_v4  ;;  %v3730_v4 = vld [vmem:[%s4722_s1 + $0x358] sm:$0xff] }
  0x3d   :  { %2238 = vmatpush.bf16.msrb.mxu3 %v3680_v5  ;;  %v3738_v5 = vld [vmem:[%s4722_s1 + $0x398] sm:$0xff] }
  0x3e   :  { %2200 = vmatpush.bf16.msrb.mxu0 %v3655_v6  ;;  %v3746_v6 = vld [vmem:[%s4722_s1 + $0x3d8] sm:$0xff] }
  0x3f   :  { %2213 = vmatpush.bf16.msrb.mxu1 %v3663_v7  ;;  %v3721_v7 = vld [vmem:[%s4722_s1 + $0x310] sm:$0xff] }
  0x40   :  { %2226 = vmatpush.bf16.msrb.mxu2 %v3671_v8  ;;  %v3729_v8 = vld [vmem:[%s4722_s1 + $0x350] sm:$0xff] }
  0x41   :  { %2239 = vmatpush.bf16.msrb.mxu3 %v3679_v9  ;;  %2201 = vmatmul.bf16.vlgmr.msrb.gmra.mxu0 %v539_v51  ;;  %v3725_v51 = vld [vmem:[%s4722_s1 + $0x330] sm:$0xff] }
  0x42   :  { %2245 = vmatpush.bf16.msra.mxu0 %v3694_v10  ;;  %2214 = vmatmul.bf16.vlgmr.msrb.gmra.mxu1 %v540_v53  ;;  %v3741_v53 = vld [vmem:[%s4722_s1 + $0x3b0] sm:$0xff] }
  0x43   :  { %2258 = vmatpush.bf16.msra.mxu1 %v3702_v11  ;;  %2227 = vmatmul.bf16.vlgmr.msrb.gmra.mxu2 %v541_v50  ;;  %v548_v50 = vld [vmem:[#allocation1 + $0x1b] sm:$0xff]  ;;  %v3737_v9 = vld [vmem:[%s4722_s1 + $0x390] sm:$0xff]  ;;  %v3720_v11 = vld [vmem:[%s4722_s1 + $0x308] sm:$0xff] }
  0x44   :  { %2271 = vmatpush.bf16.msra.mxu2 %v3710_v12  ;;  %2240 = vmatmul.bf16.vlgmr.msrb.gmra.mxu3 %v542_v52  ;;  %v3733_v52 = vld [vmem:[%s4722_s1 + $0x370] sm:$0xff]  ;;  %554 = vst [vmem:[#allocation1] ss:$9 sm:$0xff] %v19_v44  ;;  %v3728_v12 = vld [vmem:[%s4722_s1 + $0x348] sm:$0xff] }
  0x45   :  { %2284 = vmatpush.bf16.msra.mxu3 %v3718_v13  ;;  %v3745_v10 = vld [vmem:[%s4722_s1 + $0x3d0] sm:$0xff]  ;;  %v3736_v13 = vld [vmem:[%s4722_s1 + $0x388] sm:$0xff] }
  0x46   :  { %2246 = vmatpush.bf16.msra.mxu0 %v3693_v14  ;;  %v3744_v14 = vld [vmem:[%s4722_s1 + $0x3c8] sm:$0xff] }
  0x47   :  { %2259 = vmatpush.bf16.msra.mxu1 %v3701_v15  ;;  %v3719_v15 = vld [vmem:[%s4722_s1 + $0x300] sm:$0xff]  ;;  %v3760_v44 = vld [vmem:[%s4722_s1 + $0x448] sm:$0xff] }
  0x48   :  { %2272 = vmatpush.bf16.msra.mxu2 %v3709_v16  ;;  %v3727_v16 = vld [vmem:[%s4722_s1 + $0x340] sm:$0xff] }
  0x49   :  { %2285 = vmatpush.bf16.msra.mxu3 %v3717_v17  ;;  %v3735_v17 = vld [vmem:[%s4722_s1 + $0x380] sm:$0xff] }
  0x4a   :  { %2247 = vmatpush.bf16.msra.mxu0 %v3692_v18  ;;  %v3743_v18 = vld [vmem:[%s4722_s1 + $0x3c0] sm:$0xff] }
  0x4b   :  { %2260 = vmatpush.bf16.msra.mxu1 %v3700_v19  ;;  %v3758_v19 = vld [vmem:[%s4722_s1 + $0x438] sm:$0xff] }
  0x4c   :  { %2273 = vmatpush.bf16.msra.mxu2 %v3708_v20  ;;  %v3766_v20 = vld [vmem:[%s4722_s1 + $0x478] sm:$0xff] }
  0x4d   :  { %2286 = vmatpush.bf16.msra.mxu3 %v3716_v21  ;;  %v3774_v21 = vld [vmem:[%s4722_s1 + $0x4b8] sm:$0xff] }
  0x4e   :  { %2248 = vmatpush.bf16.msra.mxu0 %v3691_v22  ;;  %v3782_v22 = vld [vmem:[%s4722_s1 + $0x4f8] sm:$0xff] }
  0x4f   :  { %2261 = vmatpush.bf16.msra.mxu1 %v3699_v23  ;;  %v3757_v23 = vld [vmem:[%s4722_s1 + $0x430] sm:$0xff] }
  0x50   :  { %2274 = vmatpush.bf16.msra.mxu2 %v3707_v24  ;;  %v3765_v24 = vld [vmem:[%s4722_s1 + $0x470] sm:$0xff] }
  0x51   :  { %2287 = vmatpush.bf16.msra.mxu3 %v3715_v25  ;;  %v3773_v25 = vld [vmem:[%s4722_s1 + $0x4b0] sm:$0xff] }
  0x52   :  { %2249 = vmatpush.bf16.msra.mxu0 %v3690_v26  ;;  %v3781_v26 = vld [vmem:[%s4722_s1 + $0x4f0] sm:$0xff] }
  0x53   :  { %2262 = vmatpush.bf16.msra.mxu1 %v3698_v27  ;;  %v3756_v27 = vld [vmem:[%s4722_s1 + $0x428] sm:$0xff] }
  0x54   :  { %2275 = vmatpush.bf16.msra.mxu2 %v3706_v28  ;;  %v3764_v28 = vld [vmem:[%s4722_s1 + $0x468] sm:$0xff] }
  0x55   :  { %2288 = vmatpush.bf16.msra.mxu3 %v3714_v29  ;;  %v3772_v29 = vld [vmem:[%s4722_s1 + $0x4a8] sm:$0xff] }
  0x56   :  { %2250 = vmatpush.bf16.msra.mxu0 %v3689_v30  ;;  %v3780_v30 = vld [vmem:[%s4722_s1 + $0x4e8] sm:$0xff] }
  0x57   :  { %2263 = vmatpush.bf16.msra.mxu1 %v3697_v31  ;;  %v3755_v31 = vld [vmem:[%s4722_s1 + $0x420] sm:$0xff] }
  0x58   :  { %2276 = vmatpush.bf16.msra.mxu2 %v3705_v32  ;;  %v3763_v32 = vld [vmem:[%s4722_s1 + $0x460] sm:$0xff] }
  0x59   :  { %2289 = vmatpush.bf16.msra.mxu3 %v3713_v33  ;;  %v3771_v33 = vld [vmem:[%s4722_s1 + $0x4a0] sm:$0xff] }
  0x5a   :  { %2251 = vmatpush.bf16.msra.mxu0 %v3688_v34  ;;  %v3779_v34 = vld [vmem:[%s4722_s1 + $0x4e0] sm:$0xff] }
  0x5b   :  { %2264 = vmatpush.bf16.msra.mxu1 %v3696_v35  ;;  %v3754_v35 = vld [vmem:[%s4722_s1 + $0x418] sm:$0xff] }
  0x5c   :  { %2277 = vmatpush.bf16.msra.mxu2 %v3704_v36  ;;  %v3762_v36 = vld [vmem:[%s4722_s1 + $0x458] sm:$0xff] }
  0x5d   :  { %2290 = vmatpush.bf16.msra.mxu3 %v3712_v37  ;;  %v3770_v37 = vld [vmem:[%s4722_s1 + $0x498] sm:$0xff] }
  0x5e   :  { %2252 = vmatpush.bf16.msra.mxu0 %v3687_v38  ;;  %v3778_v38 = vld [vmem:[%s4722_s1 + $0x4d8] sm:$0xff] }
  0x5f   :  { %2265 = vmatpush.bf16.msra.mxu1 %v3695_v39  ;;  %v3753_v39 = vld [vmem:[%s4722_s1 + $0x410] sm:$0xff] }
  0x60   :  { %2278 = vmatpush.bf16.msra.mxu2 %v3703_v40  ;;  %v3761_v40 = vld [vmem:[%s4722_s1 + $0x450] sm:$0xff] }
  0x61   :  { %2291 = vmatpush.bf16.msra.mxu3 %v3711_v41  ;;  %2253 = vmatmul.bf16.vlgmr.msra.gmra.mxu0 %v545_v47  ;;  %v3769_v41 = vld [vmem:[%s4722_s1 + $0x490] sm:$0xff]  ;;  %v3751_v47 = vld [vmem:[%s4722_s1 + $0x400] sm:$0xff] }
  0x62   :  { %2297 = vmatpush.bf16.msrb.mxu0 %v3726_v42  ;;  %2266 = vmatmul.bf16.vlgmr.msra.gmra.mxu1 %v546_v49  ;;  %v3777_v42 = vld [vmem:[%s4722_s1 + $0x4d0] sm:$0xff]  ;;  %v3767_v49 = vld [vmem:[%s4722_s1 + $0x480] sm:$0xff] }
  0x63   :  { %2310 = vmatpush.bf16.msrb.mxu1 %v3734_v43  ;;  %2279 = vmatmul.bf16.vlgmr.msra.gmra.mxu2 %v547_v48  ;;  %v3752_v43 = vld [vmem:[%s4722_s1 + $0x408] sm:$0xff]  ;;  %v3759_v48 = vld [vmem:[%s4722_s1 + $0x440] sm:$0xff] }
  0x64   :  { %2323 = vmatpush.bf16.msrb.mxu2 %v3742_v45  ;;  %2292 = vmatmul.bf16.vlgmr.msra.gmra.mxu3 %v548_v50  ;;  %v3768_v45 = vld [vmem:[%s4722_s1 + $0x488] sm:$0xff]  ;;  %v3775_v50 = vld [vmem:[%s4722_s1 + $0x4c0] sm:$0xff] }
  0x65   :  { %2336 = vmatpush.bf16.msrb.mxu3 %v3750_v46  ;;  %v3776_v46 = vld [vmem:[%s4722_s1 + $0x4c8] sm:$0xff] }
  0x66   :  { %2298 = vmatpush.bf16.msrb.mxu0 %v3725_v51  ;;  %v3790_v51 = vld [vmem:[%s4722_s1 + $0x538] sm:$0xff] }
  0x67   :  { %2311 = vmatpush.bf16.msrb.mxu1 %v3733_v52  ;;  %v3798_v52 = vld [vmem:[%s4722_s1 + $0x578] sm:$0xff] }
  0x68   :  { %2324 = vmatpush.bf16.msrb.mxu2 %v3741_v53  ;;  %v20_v53 = vld [vmem:[%s4723_s0 + $0x18] sm:$0xff] }
  0x69   :  { %2337 = vmatpush.bf16.msrb.mxu3 %v3749_v54  ;;  %v3806_v54 = vld [vmem:[%s4722_s1 + $0x5b8] sm:$0xff] }
  0x6a   :  { %2299 = vmatpush.bf16.msrb.mxu0 %v3724_v59  ;;  %v558_v59 = vld [vmem:[#allocation1 + $0x1b] sm:$0xff] }
  0x6b   :  { %2312 = vmatpush.bf16.msrb.mxu1 %v3732_v60  ;;  %v3789_v60 = vld [vmem:[%s4722_s1 + $0x530] sm:$0xff] }
  0x6c   :  { %2325 = vmatpush.bf16.msrb.mxu2 %v3740_v61  ;;  %v3797_v61 = vld [vmem:[%s4722_s1 + $0x570] sm:$0xff] }
  0x6d   :  { %2338 = vmatpush.bf16.msrb.mxu3 %v3748_v62  ;;  %v3805_v62 = vld [vmem:[%s4722_s1 + $0x5b0] sm:$0xff] }
  0x6e   :  { %2300 = vmatpush.bf16.msrb.mxu0 %v3723_v63  ;;  %v3813_v63 = vld [vmem:[%s4722_s1 + $0x5f0] sm:$0xff] }
  0x6f   :  { %2313 = vmatpush.bf16.msrb.mxu1 %v3731_v0  ;;  %v4437_v0 = vld [vmem:[#allocation1 + $0x24] sm:$0xff] }
  0x70   :  { %2326 = vmatpush.bf16.msrb.mxu2 %v3739_v1  ;;  %v4439_v1 = vld [vmem:[#allocation1 + $0x36] sm:$0xff] }
  0x71   :  { %2339 = vmatpush.bf16.msrb.mxu3 %v3747_v2  ;;  %v4441_v2 = vld [vmem:[#allocation1 + $0x2d] sm:$0xff] }
  0x72   :  { %2301 = vmatpush.bf16.msrb.mxu0 %v3722_v3  ;;  %v4443_v3 = vld [vmem:[#allocation1 + $0x3f] sm:$0xff] }
  0x73   :  { %2314 = vmatpush.bf16.msrb.mxu1 %v3730_v4  ;;  %v3788_v4 = vld [vmem:[%s4722_s1 + $0x528] sm:$0xff] }
  0x74   :  { %2327 = vmatpush.bf16.msrb.mxu2 %v3738_v5  ;;  %v3796_v5 = vld [vmem:[%s4722_s1 + $0x568] sm:$0xff] }
  0x75   :  { %2340 = vmatpush.bf16.msrb.mxu3 %v3746_v6  ;;  %v3804_v6 = vld [vmem:[%s4722_s1 + $0x5a8] sm:$0xff] }
  0x76   :  { %2302 = vmatpush.bf16.msrb.mxu0 %v3721_v7  ;;  %v3812_v7 = vld [vmem:[%s4722_s1 + $0x5e8] sm:$0xff] }
  0x77   :  { %2315 = vmatpush.bf16.msrb.mxu1 %v3729_v8 }
  0x78   :  { %2328 = vmatpush.bf16.msrb.mxu2 %v3737_v9  ;;  %v3787_v9 = vld [vmem:[%s4722_s1 + $0x520] sm:$0xff] }
  0x79   :  { %2341 = vmatpush.bf16.msrb.mxu3 %v3745_v10  ;;  %v3795_v10 = vld [vmem:[%s4722_s1 + $0x560] sm:$0xff] }
  0x7a   :  { %2303 = vmatpush.bf16.msrb.mxu0 %v3720_v11 }
  0x7b   :  { %2316 = vmatpush.bf16.msrb.mxu1 %v3728_v12  ;;  %v3803_v12 = vld [vmem:[%s4722_s1 + $0x5a0] sm:$0xff] }
  0x7c   :  { %2329 = vmatpush.bf16.msrb.mxu2 %v3736_v13  ;;  %v3811_v13 = vld [vmem:[%s4722_s1 + $0x5e0] sm:$0xff] }
  0x7d   :  { %2342 = vmatpush.bf16.msrb.mxu3 %v3744_v14 }
  0x7e   :  { %2304 = vmatpush.bf16.msrb.mxu0 %v3719_v15  ;;  %v3786_v15 = vld [vmem:[%s4722_s1 + $0x518] sm:$0xff] }
  0x7f   :  { %2317 = vmatpush.bf16.msrb.mxu1 %v3727_v16  ;;  %v3794_v16 = vld [vmem:[%s4722_s1 + $0x558] sm:$0xff] }
  0x80   :  { %2330 = vmatpush.bf16.msrb.mxu2 %v3735_v17  ;;  %v3802_v17 = vld [vmem:[%s4722_s1 + $0x598] sm:$0xff] }
  0x81   :  { %2343 = vmatpush.bf16.msrb.mxu3 %v3743_v18  ;;  %2305 = vmatmul.bf16.vlgmr.msrb.gmra.mxu0 %v4230_v55  ;;  %v3814_v55 = vld [vmem:[%s4722_s1 + $0x5f8] sm:$0xff] }
  0x82   :  { %2349 = vmatpush.bf16.msra.mxu0 %v3758_v19  ;;  %2318 = vmatmul.bf16.vlgmr.msrb.gmra.mxu1 %v4234_v57  ;;  %v557_v57 = vld [vmem:[#allocation1 + $0x12] sm:$0xff] }
  0x83   :  { %2362 = vmatpush.bf16.msra.mxu1 %v3766_v20  ;;  %2331 = vmatmul.bf16.vlgmr.msrb.gmra.mxu2 %v4232_v56  ;;  %v555_v56 = vld [vmem:[#allocation1] sm:$0xff]  ;;  %v3810_v18 = vld [vmem:[%s4722_s1 + $0x5d8] sm:$0xff] }
  0x84   :  { %2375 = vmatpush.bf16.msra.mxu2 %v3774_v21  ;;  %2344 = vmatmul.bf16.vlgmr.msrb.gmra.mxu3 %v4236_v58  ;;  %v556_v58 = vld [vmem:[#allocation1 + $0x9] sm:$0xff] }
  0x85   :  { %2388 = vmatpush.bf16.msra.mxu3 %v3782_v22  ;;  %564 = vst [vmem:[#allocation1] ss:$9 sm:$0xff] %v20_v53  ;;  %v3827_v53 = vld [vmem:[%s4722_s1 + $0x660] sm:$0xff] }
  0x86   :  { %2350 = vmatpush.bf16.msra.mxu0 %v3757_v23  ;;  %v3785_v23 = vld [vmem:[%s4722_s1 + $0x510] sm:$0xff] }
  0x87   :  { %2363 = vmatpush.bf16.msra.mxu1 %v3765_v24  ;;  %v3793_v24 = vld [vmem:[%s4722_s1 + $0x550] sm:$0xff] }
  0x88   :  { %2376 = vmatpush.bf16.msra.mxu2 %v3773_v25 }
  0x89   :  { %2389 = vmatpush.bf16.msra.mxu3 %v3781_v26 }
  0x8a   :  { %2351 = vmatpush.bf16.msra.mxu0 %v3756_v27  ;;  %v3801_v27 = vld [vmem:[%s4722_s1 + $0x590] sm:$0xff] }
  0x8b   :  { %2364 = vmatpush.bf16.msra.mxu1 %v3764_v28  ;;  %v3809_v28 = vld [vmem:[%s4722_s1 + $0x5d0] sm:$0xff] }
  0x8c   :  { %2377 = vmatpush.bf16.msra.mxu2 %v3772_v29  ;;  %v3784_v29 = vld [vmem:[%s4722_s1 + $0x508] sm:$0xff] }
  0x8d   :  { %2390 = vmatpush.bf16.msra.mxu3 %v3780_v30  ;;  %v3792_v30 = vld [vmem:[%s4722_s1 + $0x548] sm:$0xff] }
  0x8e   :  { %2352 = vmatpush.bf16.msra.mxu0 %v3755_v31  ;;  %v3800_v31 = vld [vmem:[%s4722_s1 + $0x588] sm:$0xff] }
  0x8f   :  { %2365 = vmatpush.bf16.msra.mxu1 %v3763_v32  ;;  %v3808_v32 = vld [vmem:[%s4722_s1 + $0x5c8] sm:$0xff] }
  0x90   :  { %2378 = vmatpush.bf16.msra.mxu2 %v3771_v33 }
  0x91   :  { %2391 = vmatpush.bf16.msra.mxu3 %v3779_v34 }
  0x92   :  { %2353 = vmatpush.bf16.msra.mxu0 %v3754_v35  ;;  %v3783_v35 = vld [vmem:[%s4722_s1 + $0x500] sm:$0xff] }
  0x93   :  { %2366 = vmatpush.bf16.msra.mxu1 %v3762_v36  ;;  %v3791_v36 = vld [vmem:[%s4722_s1 + $0x540] sm:$0xff] }
  0x94   :  { %2379 = vmatpush.bf16.msra.mxu2 %v3770_v37  ;;  %v3799_v37 = vld [vmem:[%s4722_s1 + $0x580] sm:$0xff] }
  0x95   :  { %2392 = vmatpush.bf16.msra.mxu3 %v3778_v38  ;;  %v3807_v38 = vld [vmem:[%s4722_s1 + $0x5c0] sm:$0xff] }
  0x96   :  { %2354 = vmatpush.bf16.msra.mxu0 %v3753_v39  ;;  %v3822_v39 = vld [vmem:[%s4722_s1 + $0x638] sm:$0xff] }
  0x97   :  { %2367 = vmatpush.bf16.msra.mxu1 %v3761_v40  ;;  %v3830_v40 = vld [vmem:[%s4722_s1 + $0x678] sm:$0xff] }
  0x98   :  { %2380 = vmatpush.bf16.msra.mxu2 %v3769_v41  ;;  %v3838_v41 = vld [vmem:[%s4722_s1 + $0x6b8] sm:$0xff] }
  0x99   :  { %2393 = vmatpush.bf16.msra.mxu3 %v3777_v42  ;;  %v3846_v42 = vld [vmem:[%s4722_s1 + $0x6f8] sm:$0xff] }
  0x9a   :  { %2355 = vmatpush.bf16.msra.mxu0 %v3752_v43  ;;  %v3821_v43 = vld [vmem:[%s4722_s1 + $0x630] sm:$0xff] }
  0x9b   :  { %2368 = vmatpush.bf16.msra.mxu1 %v3760_v44  ;;  %v3829_v44 = vld [vmem:[%s4722_s1 + $0x670] sm:$0xff] }
  0x9c   :  { %2381 = vmatpush.bf16.msra.mxu2 %v3768_v45  ;;  %v3837_v45 = vld [vmem:[%s4722_s1 + $0x6b0] sm:$0xff] }
  0x9d   :  { %2394 = vmatpush.bf16.msra.mxu3 %v3776_v46  ;;  %v3845_v46 = vld [vmem:[%s4722_s1 + $0x6f0] sm:$0xff] }
  0x9e   :  { %2356 = vmatpush.bf16.msra.mxu0 %v3751_v47  ;;  %v2150_v8 = vpop.f32.mrf.mxu0  ;;  %v3820_v47 = vld [vmem:[%s4722_s1 + $0x628] sm:$0xff] }
  0x9f   :  { %2369 = vmatpush.bf16.msra.mxu1 %v3759_v48  ;;  %v2163_v11 = vpop.f32.mrf.mxu1  ;;  %v3828_v48 = vld [vmem:[%s4722_s1 + $0x668] sm:$0xff] }
  0xa0   :  { %2382 = vmatpush.bf16.msra.mxu2 %v3767_v49  ;;  %v2164_v14 = vadd.f32 %v2163_v11, %v2150_v8  ;;  %v3836_v49 = vld [vmem:[%s4722_s1 + $0x6a8] sm:$0xff]  ;;  %v3841_v8 = vld [vmem:[%s4722_s1 + $0x6d0] sm:$0xff] }
  0xa1   :  { %2395 = vmatpush.bf16.msra.mxu3 %v3775_v50  ;;  %2357 = vmatmul.bf16.vlgmr.msra.gmra.mxu0 %v555_v56  ;;  %v3844_v50 = vld [vmem:[%s4722_s1 + $0x6e8] sm:$0xff]  ;;  %v3835_v56 = vld [vmem:[%s4722_s1 + $0x6a0] sm:$0xff] }
  0xa2   :  { %2401 = vmatpush.bf16.msrb.mxu0 %v3790_v51  ;;  %2370 = vmatmul.bf16.vlgmr.msra.gmra.mxu1 %v556_v58  ;;  %v3832_v11 = vld [vmem:[%s4722_s1 + $0x688] sm:$0xff] }
  0xa3   :  { %2414 = vmatpush.bf16.msrb.mxu1 %v3798_v52  ;;  %2383 = vmatmul.bf16.vlgmr.msra.gmra.mxu2 %v557_v57  ;;  %v3819_v52 = vld [vmem:[%s4722_s1 + $0x620] sm:$0xff] }
  0xa4   :  { %2427 = vmatpush.bf16.msrb.mxu2 %v3806_v54  ;;  %2396 = vmatmul.bf16.vlgmr.msra.gmra.mxu3 %v558_v59  ;;  %v3843_v57 = vld [vmem:[%s4722_s1 + $0x6e0] sm:$0xff]  ;;  %v3818_v59 = vld [vmem:[%s4722_s1 + $0x618] sm:$0xff] }
  0xa5   :  { %2440 = vmatpush.bf16.msrb.mxu3 %v3814_v55 }
  0xa6   :  { %2402 = vmatpush.bf16.msrb.mxu0 %v3789_v60  ;;  %v2176_v19 = vpop.f32.mrf.mxu2  ;;  %v2152_v22 = vpop.f32.mrf.mxu0  ;;  %v3826_v60 = vld [vmem:[%s4722_s1 + $0x658] sm:$0xff] }
  0xa7   :  { %2415 = vmatpush.bf16.msrb.mxu1 %v3797_v61  ;;  %v2177_v20 = vadd.f32 %v2176_v19, %v2164_v14  ;;  %v2189_v21 = vpop.f32.mrf.mxu3  ;;  %v2165_v26 = vpop.f32.mrf.mxu1  ;;  %v3834_v61 = vld [vmem:[%s4722_s1 + $0x698] sm:$0xff] }
  0xa8   :  { %2428 = vmatpush.bf16.msrb.mxu2 %v3805_v62  ;;  %v3842_v62 = vld [vmem:[%s4722_s1 + $0x6d8] sm:$0xff] }
  0xa9   :  { %2441 = vmatpush.bf16.msrb.mxu3 %v3813_v63  ;;  %v2190_v25 = vadd.f32 %v2189_v21, %v2177_v20  ;;  %v3854_v19 = vld [vmem:[%s4722_s1 + $0x738] sm:$0xff] }
  0xaa   :  { %2403 = vmatpush.bf16.msrb.mxu0 %v3788_v4  ;;  %v3825_v4 = vld [vmem:[%s4722_s1 + $0x650] sm:$0xff]  ;;  %v3862_v20 = vld [vmem:[%s4722_s1 + $0x778] sm:$0xff] }
  0xab   :  { %2416 = vmatpush.bf16.msrb.mxu1 %v3796_v5  ;;  %v3870_v21 = vld [vmem:[%s4722_s1 + $0x7b8] sm:$0xff] }
  0xac   :  { %2429 = vmatpush.bf16.msrb.mxu2 %v3804_v6  ;;  %v3878_v22 = vld [vmem:[%s4722_s1 + $0x7f8] sm:$0xff] }
  0xad   :  { %2442 = vmatpush.bf16.msrb.mxu3 %v3812_v7  ;;  %v3833_v7 = vld [vmem:[%s4722_s1 + $0x690] sm:$0xff]  ;;  %v568_v26 = vld [vmem:[#allocation1 + $0x1b] sm:$0xff] }
  0xae   :  { %2404 = vmatpush.bf16.msrb.mxu0 %v3787_v9  ;;  %v2178_v33 = vpop.f32.mrf.mxu2  ;;  %v3816_v9 = vld [vmem:[%s4722_s1 + $0x608] sm:$0xff] }
  0xaf   :  { %2417 = vmatpush.bf16.msrb.mxu1 %v3795_v10  ;;  %v2191_v34 = vpop.f32.mrf.mxu3  ;;  %v3824_v10 = vld [vmem:[%s4722_s1 + $0x648] sm:$0xff] }
  0xb0   :  { %2430 = vmatpush.bf16.msrb.mxu2 %v3803_v12  ;;  %v3840_v12 = vld [vmem:[%s4722_s1 + $0x6c8] sm:$0xff] }
  0xb1   :  { %2443 = vmatpush.bf16.msrb.mxu3 %v3811_v13  ;;  %v3868_v33 = vld [vmem:[%s4722_s1 + $0x7a8] sm:$0xff] }
  0xb2   :  { %2405 = vmatpush.bf16.msrb.mxu0 %v3786_v15  ;;  %v3815_v15 = vld [vmem:[%s4722_s1 + $0x600] sm:$0xff]  ;;  %v3876_v34 = vld [vmem:[%s4722_s1 + $0x7e8] sm:$0xff] }
  0xb3   :  { %2418 = vmatpush.bf16.msrb.mxu1 %v3794_v16  ;;  %v3823_v16 = vld [vmem:[%s4722_s1 + $0x640] sm:$0xff] }
  0xb4   :  { %2431 = vmatpush.bf16.msrb.mxu2 %v3802_v17  ;;  %v3831_v17 = vld [vmem:[%s4722_s1 + $0x680] sm:$0xff] }
  0xb5   :  { %2444 = vmatpush.bf16.msrb.mxu3 %v3810_v18  ;;  %v3839_v18 = vld [vmem:[%s4722_s1 + $0x6c0] sm:$0xff] }
  0xb6   :  { %2406 = vmatpush.bf16.msrb.mxu0 %v3785_v23  ;;  %v565_v23 = vld [vmem:[#allocation1] sm:$0xff] }
  0xb7   :  { %2419 = vmatpush.bf16.msrb.mxu1 %v3793_v24  ;;  %v567_v24 = vld [vmem:[#allocation1 + $0x12] sm:$0xff] }
  0xb8   :  { %2432 = vmatpush.bf16.msrb.mxu2 %v3801_v27  ;;  %v3853_v27 = vld [vmem:[%s4722_s1 + $0x730] sm:$0xff] }
  0xb9   :  { %2445 = vmatpush.bf16.msrb.mxu3 %v3809_v28  ;;  %v3861_v28 = vld [vmem:[%s4722_s1 + $0x770] sm:$0xff] }
  0xba   :  { %2407 = vmatpush.bf16.msrb.mxu0 %v3784_v29  ;;  %v3869_v29 = vld [vmem:[%s4722_s1 + $0x7b0] sm:$0xff] }
  0xbb   :  { %2420 = vmatpush.bf16.msrb.mxu1 %v3792_v30  ;;  %v3877_v30 = vld [vmem:[%s4722_s1 + $0x7f0] sm:$0xff] }
  0xbc   :  { %2433 = vmatpush.bf16.msrb.mxu2 %v3800_v31  ;;  %v3852_v31 = vld [vmem:[%s4722_s1 + $0x728] sm:$0xff] }
  0xbd   :  { %2446 = vmatpush.bf16.msrb.mxu3 %v3808_v32  ;;  %v3860_v32 = vld [vmem:[%s4722_s1 + $0x768] sm:$0xff] }
  0xbe   :  { %2408 = vmatpush.bf16.msrb.mxu0 %v3783_v35  ;;  %v2202_v51 = vpop.f32.mrf.mxu0 }
  0xbf   :  { %2421 = vmatpush.bf16.msrb.mxu1 %v3791_v36  ;;  %v2203_v54 = vadd.f32 %v2202_v51, %v2190_v25  ;;  %v2215_v55 = vpop.f32.mrf.mxu1  ;;  %v566_v25 = vld [vmem:[#allocation1 + $0x9] sm:$0xff] }
  0xc0   :  { %2434 = vmatpush.bf16.msrb.mxu2 %v3799_v37  ;;  %v3851_v37 = vld [vmem:[%s4722_s1 + $0x720] sm:$0xff] }
  0xc1   :  { %2447 = vmatpush.bf16.msrb.mxu3 %v3807_v38  ;;  %2409 = vmatmul.bf16.vlgmr.msrb.gmra.mxu0 %v4437_v0  ;;  %v2216_v58 = vadd.f32 %v2215_v55, %v2203_v54  ;;  %v3859_v38 = vld [vmem:[%s4722_s1 + $0x760] sm:$0xff]  ;;  %v3865_v55 = vld [vmem:[%s4722_s1 + $0x790] sm:$0xff] }
  0xc2   :  { %2453 = vmatpush.bf16.msra.mxu0 %v3822_v39  ;;  %2422 = vmatmul.bf16.vlgmr.msrb.gmra.mxu1 %v4441_v2 }
  0xc3   :  { %2466 = vmatpush.bf16.msra.mxu1 %v3830_v40  ;;  %2435 = vmatmul.bf16.vlgmr.msrb.gmra.mxu2 %v4439_v1  ;;  %v3867_v40 = vld [vmem:[%s4722_s1 + $0x7a0] sm:$0xff] }
  0xc4   :  { %2479 = vmatpush.bf16.msra.mxu2 %v3838_v41  ;;  %2448 = vmatmul.bf16.vlgmr.msrb.gmra.mxu3 %v4443_v3  ;;  %v3817_v3 = vld [vmem:[%s4722_s1 + $0x610] sm:$0xff]  ;;  %v3875_v41 = vld [vmem:[%s4722_s1 + $0x7e0] sm:$0xff] }
  0xc5   :  { %2492 = vmatpush.bf16.msra.mxu3 %v3846_v42 }
  0xc6   :  { %2454 = vmatpush.bf16.msra.mxu0 %v3821_v43  ;;  %v2228_v63 = vpop.f32.mrf.mxu2  ;;  %v2204_v2 = vpop.f32.mrf.mxu0  ;;  %v3850_v43 = vld [vmem:[%s4722_s1 + $0x718] sm:$0xff] }
  0xc7   :  { %2467 = vmatpush.bf16.msra.mxu1 %v3829_v44  ;;  %v2229_v0 = vadd.f32 %v2228_v63, %v2216_v58  ;;  %v2241_v1 = vpop.f32.mrf.mxu3  ;;  %v2217_v6 = vpop.f32.mrf.mxu1  ;;  %v3858_v44 = vld [vmem:[%s4722_s1 + $0x758] sm:$0xff]  ;;  %v3856_v58 = vld [vmem:[%s4722_s1 + $0x748] sm:$0xff]  ;;  %v3847_v63 = vld [vmem:[%s4722_s1 + $0x700] sm:$0xff] }
  0xc8   :  { %2480 = vmatpush.bf16.msra.mxu2 %v3837_v45  ;;  %v3866_v45 = vld [vmem:[%s4722_s1 + $0x798] sm:$0xff]  ;;  %v3871_v2 = vld [vmem:[%s4722_s1 + $0x7c0] sm:$0xff] }
  0xc9   :  { %2493 = vmatpush.bf16.msra.mxu3 %v3845_v46  ;;  %v2242_v5 = vadd.f32 %v2241_v1, %v2229_v0  ;;  %v3874_v46 = vld [vmem:[%s4722_s1 + $0x7d8] sm:$0xff]  ;;  %v3855_v0 = vld [vmem:[%s4722_s1 + $0x740] sm:$0xff] }
  0xca   :  { %2455 = vmatpush.bf16.msra.mxu0 %v3820_v47  ;;  %v3863_v1 = vld [vmem:[%s4722_s1 + $0x780] sm:$0xff] }
  0xcb   :  { %2468 = vmatpush.bf16.msra.mxu1 %v3828_v48  ;;  %v572_v6 = vld [vmem:[#allocation1 + $0x3f] sm:$0xff] }
  0xcc   :  { %2481 = vmatpush.bf16.msra.mxu2 %v3836_v49 }
  0xcd   :  { %2494 = vmatpush.bf16.msra.mxu3 %v3844_v50 }
  0xce   :  { %2456 = vmatpush.bf16.msra.mxu0 %v3819_v52  ;;  %v2230_v13 = vpop.f32.mrf.mxu2  ;;  %v3849_v52 = vld [vmem:[%s4722_s1 + $0x710] sm:$0xff] }
  0xcf   :  { %2469 = vmatpush.bf16.msra.mxu1 %v3827_v53  ;;  %v2243_v14 = vpop.f32.mrf.mxu3  ;;  %v3857_v53 = vld [vmem:[%s4722_s1 + $0x750] sm:$0xff] }
  0xd0   :  { %2482 = vmatpush.bf16.msra.mxu2 %v3835_v56  ;;  %v3873_v56 = vld [vmem:[%s4722_s1 + $0x7d0] sm:$0xff] }
  0xd1   :  { %2495 = vmatpush.bf16.msra.mxu3 %v3843_v57  ;;  %v3848_v57 = vld [vmem:[%s4722_s1 + $0x708] sm:$0xff] }
  0xd2   :  { %2457 = vmatpush.bf16.msra.mxu0 %v3818_v59  ;;  %v3864_v59 = vld [vmem:[%s4722_s1 + $0x788] sm:$0xff] }
  0xd3   :  { %2470 = vmatpush.bf16.msra.mxu1 %v3826_v60  ;;  %v3872_v60 = vld [vmem:[%s4722_s1 + $0x7c8] sm:$0xff] }
  0xd4   :  { %2483 = vmatpush.bf16.msra.mxu2 %v3834_v61 }
  0xd5   :  { %2496 = vmatpush.bf16.msra.mxu3 %v3842_v62 }
  0xd6   :  { %2458 = vmatpush.bf16.msra.mxu0 %v3817_v3  ;;  %v569_v3 = vld [vmem:[#allocation1 + $0x24] sm:$0xff] }
  0xd7   :  { %2471 = vmatpush.bf16.msra.mxu1 %v3825_v4  ;;  %v570_v4 = vld [vmem:[#allocation1 + $0x2d] sm:$0xff] }
  0xd8   :  { %2484 = vmatpush.bf16.msra.mxu2 %v3833_v7 }
  0xd9   :  { %2497 = vmatpush.bf16.msra.mxu3 %v3841_v8 }
  0xda   :  { %2459 = vmatpush.bf16.msra.mxu0 %v3816_v9 }
  0xdb   :  { %2472 = vmatpush.bf16.msra.mxu1 %v3824_v10 }
  0xdc   :  { %2485 = vmatpush.bf16.msra.mxu2 %v3832_v11 }
  0xdd   :  { %2498 = vmatpush.bf16.msra.mxu3 %v3840_v12 }
  0xde   :  { %2460 = vmatpush.bf16.msra.mxu0 %v3815_v15  ;;  %v2254_v35 = vpop.f32.mrf.mxu0 }
  0xdf   :  { %2473 = vmatpush.bf16.msra.mxu1 %v3823_v16  ;;  %v2255_v36 = vadd.f32 %v2254_v35, %v2242_v5  ;;  %v2267_v39 = vpop.f32.mrf.mxu1  ;;  %v571_v5 = vld [vmem:[#allocation1 + $0x36] sm:$0xff] }
  0xe0   :  { %2486 = vmatpush.bf16.msra.mxu2 %v3831_v17 }
  0xe1   :  { %2499 = vmatpush.bf16.msra.mxu3 %v3839_v18  ;;  %2461 = vmatmul.bf16.vlgmr.msra.gmra.mxu0 %v565_v23  ;;  %v2268_v42 = vadd.f32 %v2267_v39, %v2255_v36 }
  0xe2   :  { %2505 = vmatpush.bf16.msrb.mxu0 %v3854_v19  ;;  %2474 = vmatmul.bf16.vlgmr.msra.gmra.mxu1 %v566_v25 }
  0xe3   :  { %2518 = vmatpush.bf16.msrb.mxu1 %v3862_v20  ;;  %2487 = vmatmul.bf16.vlgmr.msra.gmra.mxu2 %v567_v24 }
  0xe4   :  { %2531 = vmatpush.bf16.msrb.mxu2 %v3870_v21  ;;  %2500 = vmatmul.bf16.vlgmr.msra.gmra.mxu3 %v568_v26 }
  0xe5   :  { %2544 = vmatpush.bf16.msrb.mxu3 %v3878_v22 }
  0xe6   :  { %2506 = vmatpush.bf16.msrb.mxu0 %v3853_v27  ;;  %v2280_v47 = vpop.f32.mrf.mxu2  ;;  %v2256_v50 = vpop.f32.mrf.mxu0 }
  0xe7   :  { %2519 = vmatpush.bf16.msrb.mxu1 %v3861_v28  ;;  %v2281_v48 = vadd.f32 %v2280_v47, %v2268_v42  ;;  %v2293_v49 = vpop.f32.mrf.mxu3  ;;  %v2269_v54 = vpop.f32.mrf.mxu1 }
  0xe8   :  { %2532 = vmatpush.bf16.msrb.mxu2 %v3869_v29 }
  0xe9   :  { %2545 = vmatpush.bf16.msrb.mxu3 %v3877_v30  ;;  %v2294_v51 = vadd.f32 %v2293_v49, %v2281_v48 }
  0xea   :  { %2507 = vmatpush.bf16.msrb.mxu0 %v3852_v31 }
  0xeb   :  { %2520 = vmatpush.bf16.msrb.mxu1 %v3860_v32 }
  0xec   :  { %2533 = vmatpush.bf16.msrb.mxu2 %v3868_v33 }
  0xed   :  { %2546 = vmatpush.bf16.msrb.mxu3 %v3876_v34 }
  0xee   :  { %2508 = vmatpush.bf16.msrb.mxu0 %v3851_v37  ;;  %v2282_v61 = vpop.f32.mrf.mxu2 }
  0xef   :  { %2521 = vmatpush.bf16.msrb.mxu1 %v3859_v38  ;;  %v2295_v62 = vpop.f32.mrf.mxu3 }
  0xf0   :  { %2534 = vmatpush.bf16.msrb.mxu2 %v3867_v40 }
  0xf1   :  { %2547 = vmatpush.bf16.msrb.mxu3 %v3875_v41 }
  0xf2   :  { %2509 = vmatpush.bf16.msrb.mxu0 %v3850_v43 }
  0xf3   :  { %2522 = vmatpush.bf16.msrb.mxu1 %v3858_v44 }
  0xf4   :  { %2535 = vmatpush.bf16.msrb.mxu2 %v3866_v45 }
  0xf5   :  { %2548 = vmatpush.bf16.msrb.mxu3 %v3874_v46 }
  0xf6   :  { %2510 = vmatpush.bf16.msrb.mxu0 %v3849_v52 }
  0xf7   :  { %2523 = vmatpush.bf16.msrb.mxu1 %v3857_v53 }
  0xf8   :  { %2536 = vmatpush.bf16.msrb.mxu2 %v3865_v55 }
  0xf9   :  { %2549 = vmatpush.bf16.msrb.mxu3 %v3873_v56 }
  0xfa   :  { %2511 = vmatpush.bf16.msrb.mxu0 %v3848_v57 }
  0xfb   :  { %2524 = vmatpush.bf16.msrb.mxu1 %v3856_v58 }
  0xfc   :  { %2537 = vmatpush.bf16.msrb.mxu2 %v3864_v59 }
  0xfd   :  { %2550 = vmatpush.bf16.msrb.mxu3 %v3872_v60 }
  0xfe   :  { %2512 = vmatpush.bf16.msrb.mxu0 %v3847_v63  ;;  %v2306_v7 = vpop.f32.mrf.mxu0 }
  0xff   :  { %2525 = vmatpush.bf16.msrb.mxu1 %v3855_v0  ;;  %v2307_v8 = vadd.f32 %v2306_v7, %v2294_v51  ;;  %v2319_v9 = vpop.f32.mrf.mxu1 }
 0x100   :  { %2538 = vmatpush.bf16.msrb.mxu2 %v3863_v1  ;;  %v3879_v1 = vld [vmem:[%s4724_s2] ss:$0 sm:$0xff] }
 0x101   :  { %2551 = vmatpush.bf16.msrb.mxu3 %v3871_v2  ;;  %2513 = vmatmul.bf16.vlgmr.msrb.gmra.mxu0 %v569_v3  ;;  %v2320_v10 = vadd.f32 %v2319_v9, %v2307_v8  ;;  %v2569_v8 = vld [vmem:[%s4725_s3] sm:$0x3] }
 0x102   :  { %2526 = vmatmul.bf16.vlgmr.msrb.gmra.mxu1 %v570_v4 }
 0x103   :  { %2539 = vmatmul.bf16.vlgmr.msrb.gmra.mxu2 %v571_v5 }
 0x104   :  { %2552 = vmatmul.bf16.vlgmr.msrb.gmra.mxu3 %v572_v6 }
 0x106   :  { %v2332_v11 = vpop.f32.mrf.mxu2  ;;  %v2308_v14 = vpop.f32.mrf.mxu0 }
 0x107   :  { %v2333_v12 = vadd.f32 %v2332_v11, %v2320_v10  ;;  %v2345_v13 = vpop.f32.mrf.mxu3  ;;  %v2321_v16 = vpop.f32.mrf.mxu1 }
 0x109   :  { %v2346_v15 = vadd.f32 %v2345_v13, %v2333_v12 }
 0x10e   :  { %v2334_v17 = vpop.f32.mrf.mxu2 }
 0x10f   :  { %v2347_v18 = vpop.f32.mrf.mxu3 }
 0x11e   :  { %v2358_v19 = vpop.f32.mrf.mxu0 }
 0x11f   :  { %v2359_v20 = vadd.f32 %v2358_v19, %v2346_v15  ;;  %v2371_v21 = vpop.f32.mrf.mxu1 }
 0x121   :  { %v2372_v22 = vadd.f32 %v2371_v21, %v2359_v20 }
 0x126   :  { %v2384_v23 = vpop.f32.mrf.mxu2  ;;  %v2360_v26 = vpop.f32.mrf.mxu0 }
 0x127   :  { %v2385_v24 = vadd.f32 %v2384_v23, %v2372_v22  ;;  %v2397_v25 = vpop.f32.mrf.mxu3  ;;  %v2373_v28 = vpop.f32.mrf.mxu1 }
 0x129   :  { %v2398_v27 = vadd.f32 %v2397_v25, %v2385_v24 }
 0x12e   :  { %v2386_v29 = vpop.f32.mrf.mxu2 }
 0x12f   :  { %v2399_v30 = vpop.f32.mrf.mxu3 }
 0x13e   :  { %v2410_v31 = vpop.f32.mrf.mxu0 }
 0x13f   :  { %v2423_v32 = vpop.f32.mrf.mxu1  ;;  %v2411_v42 = vadd.f32 %v2410_v31, %v2398_v27 }
 0x141   :  { %v2424_v46 = vadd.f32 %v2423_v32, %v2411_v42 }
 0x146   :  { %v2436_v33 = vpop.f32.mrf.mxu2  ;;  %v2412_v35 = vpop.f32.mrf.mxu0 }
 0x147   :  { %v2449_v34 = vpop.f32.mrf.mxu3  ;;  %v2425_v36 = vpop.f32.mrf.mxu1  ;;  %v2437_v47 = vadd.f32 %v2436_v33, %v2424_v46 }
 0x149   :  { %v2450_v50 = vadd.f32 %v2449_v34, %v2437_v47 }
 0x14e   :  { %v2438_v37 = vpop.f32.mrf.mxu2 }
 0x14f   :  { %v2451_v38 = vpop.f32.mrf.mxu3 }
 0x15e   :  { %v2462_v39 = vpop.f32.mrf.mxu0 }
 0x15f   :  { %v2475_v40 = vpop.f32.mrf.mxu1  ;;  %v2463_v51 = vadd.f32 %v2462_v39, %v2450_v50 }
 0x161   :  { %v2476_v52 = vadd.f32 %v2475_v40, %v2463_v51 }
 0x166   :  { %v2488_v41 = vpop.f32.mrf.mxu2  ;;  %v2464_v44 = vpop.f32.mrf.mxu0 }
 0x167   :  { %v2501_v43 = vpop.f32.mrf.mxu3  ;;  %v2477_v45 = vpop.f32.mrf.mxu1  ;;  %v2489_v53 = vadd.f32 %v2488_v41, %v2476_v52 }
 0x169   :  { %v2502_v54 = vadd.f32 %v2501_v43, %v2489_v53 }
 0x16e   :  { %v2490_v48 = vpop.f32.mrf.mxu2 }
 0x16f   :  { %v2503_v49 = vpop.f32.mrf.mxu3 }
 0x17e   :  { %v2514_v55 = vpop.f32.mrf.mxu0 }
 0x17f   :  { %v2527_v56 = vpop.f32.mrf.mxu1  ;;  %v2515_v57 = vadd.f32 %v2514_v55, %v2502_v54 }
 0x181   :  { %v2528_v58 = vadd.f32 %v2527_v56, %v2515_v57 }
 0x186   :  { %v2540_v59 = vpop.f32.mrf.mxu2  ;;  %v2516_v62 = vpop.f32.mrf.mxu0 }
 0x187   :  { %v2553_v60 = vpop.f32.mrf.mxu3  ;;  %v2541_v61 = vadd.f32 %v2540_v59, %v2528_v58  ;;  %v2529_v63 = vpop.f32.mrf.mxu1 }
 0x189   :  { %v2554_v0 = vadd.f32 %v2553_v60, %v2541_v61 }
 0x18b   :  { %v2558_v2 = vmul.f32 0.2, %v2554_v0  ;;  %vm2557_vm0 = vcmp.ge.f32.partialorder %v2554_v0, 0.0 }
 0x18d   :  { %v2559_v3 = vsel %vm2557_vm0, %v2554_v0, %v2558_v2 }
 0x18e   :  { %v2542_v4 = vpop.f32.mrf.mxu2  ;;  %v2564_v6 = vmul.f32 %v3879_v1, %v2559_v3 }
 0x18f   :  { %v2555_v5 = vpop.f32.mrf.mxu3 }
 0x190   :  { %v2566_v7 = vsel %vm2565_vm1, %v2564_v6, 0.0 }
 0x191   :  { %2567 = vadd.xlane.f32.xlu0 %v2566_v7 }
 0x204   :  { %v2568_v9 = vpop.xlane.xlu0 %2567 }
 0x205   :  { %v2570_v10 = vadd.f32 %v2569_v8, %v2568_v9 }
 0x207   :  { %v3622_v11 = vclamps-f32 %v2570_v10, 30.0 }
 0x209   :  { %v2573_v12 = vsub.f32 0.0, %v3622_v11 }
 0x20b   :  { %v2574_v13 = vmul.f32 1.442695, %v2573_v12 }
 0x20d   :  { %3880 = vpow2.f32 %v2574_v13 }
 0x213   :  { %v3881_v14 = vpop.eup %3880 }
 0x214   :  { %v2576_v15 = vadd.f32 1.0, %v3881_v14 }
 0x216   :  { %3882 = vrcp.f32 %v2576_v15  ;;  %v2588_v19 = vand.u32 2147483648, %v2576_v15  ;;  %v2586_v21 = vand.u32 2147483647, %v2576_v15  ;;  %vm2582_vm3 = vweird.f32 %v2576_v15 }
 0x218   :  { %v2589_v23 = vor.u32 1.1754944e-38, %v2588_v19  ;;  %vm2587_vm6 = vcmp.eq.f32.partialorder %v2586_v21, 8.507059e+37 }
 0x21c   :  { %v3883_v16 = vpop.eup %3882 }
 0x21d   :  { %v2578_v17 = vmul.f32 %v3883_v16, %v2576_v15  ;;  %vm2583_vm2 = vweird.f32 %v3883_v16 }
 0x21e   :  { %vm2584_vm4 = vmor %vm2582_vm3, %vm2583_vm2 }
 0x21f   :  { %v2579_v18 = vsub.f32 1.0, %v2578_v17 }
 0x221   :  { %v2580_v20 = vmul.f32 %v3883_v16, %v2579_v18 }
 0x223   :  { %v2581_v22 = vadd.f32 %v3883_v16, %v2580_v20 }
 0x225   :  { %v2585_v24 = vsel %vm2584_vm4, %v3883_v16, %v2581_v22 }
 0x226   :  { %v2590_v25 = vsel %vm2587_vm6, %v2589_v23, %v2585_v24 }
 0x227   :  { %2593 = vst.msk [vmem:[%s4726_s4] sm:$0x3] %vm2592_vm5, %v2590_v25 }

</bundles_post_ra>
